<compile_context>
chip_gen: v7x
topology: tpu7x:2x2x1
jax: 0.10.0
libtpu: 0.0.40
codegen_flags: <defaults>
</compile_context>

<pallas_src>
import math
import jax
import jax.numpy as jnp
from jax.experimental import pallas as pl
from jax.experimental.pallas import tpu as pltpu

# ----------------------------- configuration -------------------------------
B, T, N_CH = 2, 8, 16          # batch, seq length, spike channels
INPUT_DIM = 32                 # embedder input_dim
HIDDEN = 128                   # transformer hidden size
N_HEADS = 4
HEAD = HIDDEN // N_HEADS       # 32
HALF = HEAD // 2               # 16
INTER = 256                    # MLP intermediate size
N_LAYERS = 2
MAX_F = 16                     # max positions (>= T)
ROPE_BASE = 10000.0
LN_EPS = 1e-5
NEG_INF = -1e30
M_ROWS = B * T                 # batch folded into the matmul M dimension

F32 = jnp.float32
BF16 = jnp.bfloat16


# ------------------------------- helpers ------------------------------------
def _layernorm(v, g, b):
    mu = jnp.mean(v, axis=-1, keepdims=True)
    var = jnp.mean((v - mu) ** 2, axis=-1, keepdims=True)
    return (v - mu) * jax.lax.rsqrt(var + LN_EPS) * g + b


def _rope_full_width(x, cos, sin_a, sin_b):
    # x: (M_ROWS, HIDDEN) with heads side-by-side in lanes.
    # rotate_half within each 32-lane head, done at full width:
    #   first  half of head j: x[j]*cos[j] - x[j+HALF]*sin[j]
    #   second half of head j: x[j]*cos[j] + x[j-HALF]*sin[j]
    # sin_a is (-sin) on first-half lanes / 0 elsewhere,
    # sin_b is (+sin) on second-half lanes / 0 elsewhere, so the cross-head
    # wrap lanes of each roll are multiplied by exactly 0.
    left = pltpu.roll(x, HIDDEN - HALF, axis=1)   # lane j -> x[(j + HALF) % HIDDEN]
    right = pltpu.roll(x, HALF, axis=1)           # lane j -> x[(j - HALF) % HIDDEN]
    return x * cos + left * sin_a + right * sin_b


# ------------------------------- fused kernel --------------------------------
def encoder_kernel(spk_ref, bias_ref, pos_ref, cos_ref, sina_ref, sinb_ref,
                   we_ref, be_ref, wp_ref, bp_ref,
                   ln1g_ref, ln1b_ref, wqkv_ref, bqkv_ref, wo_ref, bo_ref,
                   ln2g_ref, ln2b_ref, wu_ref, bu_ref, wd_ref, bd_ref,
                   lng_ref, lnb_ref,
                   o_ref):
    # ---- embedder: linear -> relu -> projection -> + positional embedding ----
    s = spk_ref[...]                                                  # (M, N_CH) f32
    h = jnp.dot(s.astype(BF16), we_ref[...], preferred_element_type=F32) + be_ref[...]
    h = jnp.maximum(h, 0.0)                                           # act = relu
    x = jnp.dot(h.astype(BF16), wp_ref[...], preferred_element_type=F32) + bp_ref[...]
    x = x + pos_ref[...]                                              # (M, HIDDEN)

    cos = cos_ref[...]
    sin_a = sina_ref[...]
    sin_b = sinb_ref[...]
    bias = bias_ref[...]                                              # (M, M) block-diag

    scale = 1.0 / math.sqrt(HEAD)

    for l in range(N_LAYERS):                                         # unrolled
        # ------------------------- attention block --------------------------
        xn = _layernorm(x, ln1g_ref[l], ln1b_ref[l])
        qkv = (jnp.dot(xn.astype(BF16), wqkv_ref[l], preferred_element_type=F32)
               + bqkv_ref[l])                                         # (M, 3*HIDDEN)
        q = _rope_full_width(qkv[:, 0:HIDDEN], cos, sin_a, sin_b) * scale
        k = _rope_full_width(qkv[:, HIDDEN:2 * HIDDEN], cos, sin_a, sin_b)
        qb = q.astype(BF16)                                           # (M, HIDDEN)
        kb = k.astype(BF16)
        vb = qkv[:, 2 * HIDDEN:3 * HIDDEN].astype(BF16)
        wo_l = wo_ref[l]                                              # (HIDDEN, HIDDEN) bf16

        attn = jnp.zeros((M_ROWS, HIDDEN), F32)
        for hh in range(N_HEADS):                                     # unrolled (4)
            c0, c1 = hh * HEAD, (hh + 1) * HEAD
            sc = jax.lax.dot_general(                                 # q @ k^T, batch folded
                qb[:, c0:c1], kb[:, c0:c1],
                (((1,), (1,)), ((), ())),
                preferred_element_type=F32) + bias                    # (M, M)
            sc = sc - jnp.max(sc, axis=-1, keepdims=True)
            p = jnp.exp(sc)
            p = p * pl.reciprocal(jnp.sum(p, axis=-1, keepdims=True), approx=True)
            ctx = jnp.dot(p.astype(BF16), vb[:, c0:c1],
                          preferred_element_type=F32)                 # (M, HEAD)
            # fold the output projection into the head loop: no masked stores
            # or lane concatenation, identical math to concat(ctx) @ Wo.
            attn = attn + jnp.dot(ctx.astype(BF16), wo_l[c0:c1, :],
                                  preferred_element_type=F32)
        x = x + attn + bo_ref[l]

        # ---------------------------- MLP block ------------------------------
        xn2 = _layernorm(x, ln2g_ref[l], ln2b_ref[l])
        up = (jnp.dot(xn2.astype(BF16), wu_ref[l], preferred_element_type=F32)
              + bu_ref[l])
        up = jax.nn.gelu(up, approximate=True)                        # gelu_pytorch_tanh
        dn = (jnp.dot(up.astype(BF16), wd_ref[l], preferred_element_type=F32)
              + bd_ref[l])
        x = x + dn

    o_ref[...] = _layernorm(x, lng_ref[...], lnb_ref[...])


# ------------------------------ parameters ----------------------------------
def init_params(key):
    def dense(k, fan_in, fan_out):
        kw, kb = jax.random.split(k)
        w = (jax.random.normal(kw, (fan_in, fan_out), F32) * 0.02).astype(BF16)
        b = jax.random.normal(kb, (1, fan_out), F32) * 0.02
        return w, b

    keys = jax.random.split(key, 4 + N_LAYERS)
    p = {}
    p["w_embed"], p["b_embed"] = dense(keys[0], N_CH, INPUT_DIM)
    p["w_proj"], p["b_proj"] = dense(keys[1], INPUT_DIM, HIDDEN)
    p["pos_table"] = jax.random.normal(keys[2], (MAX_F, HIDDEN), F32) * 0.02
    p["ln_out_g"] = jnp.ones((1, HIDDEN), F32)
    p["ln_out_b"] = jnp.zeros((1, HIDDEN), F32)

    # RoPE tables (get_cos_sin)
    inv_freq = 1.0 / (ROPE_BASE ** (jnp.arange(0, HEAD, 2, dtype=F32) / HEAD))
    t = jnp.arange(MAX_F, dtype=F32)
    freqs = jnp.einsum("i,j->ij", t, inv_freq)
    emb = jnp.concatenate([freqs, freqs], axis=-1)                    # (MAX_F, HEAD)
    p["cos_table"] = jnp.cos(emb)
    p["sin_table"] = jnp.sin(emb)

    # per-layer weights, stacked along a leading layer axis
    ln1_g, ln1_b, ln2_g, ln2_b = [], [], [], []
    wqkv, bqkv, wo, bo, wu, bu, wd, bd = [], [], [], [], [], [], [], []
    for l in range(N_LAYERS):
        lk = jax.random.split(keys[4 + l], 6)
        wq, bq = dense(lk[0], HIDDEN, HIDDEN)
        wk, bk = dense(lk[1], HIDDEN, HIDDEN)
        wv, bv = dense(lk[2], HIDDEN, HIDDEN)
        wo_l, bo_l = dense(lk[3], HIDDEN, HIDDEN)
        wu_l, bu_l = dense(lk[4], HIDDEN, INTER)
        wd_l, bd_l = dense(lk[5], INTER, HIDDEN)
        wqkv.append(jnp.concatenate([wq, wk, wv], axis=1))            # (H, 3H)
        bqkv.append(jnp.concatenate([bq, bk, bv], axis=1))            # (1, 3H)
        wo.append(wo_l); bo.append(bo_l)
        wu.append(wu_l); bu.append(bu_l)
        wd.append(wd_l); bd.append(bd_l)
        ln1_g.append(jnp.ones((1, HIDDEN), F32)); ln1_b.append(jnp.zeros((1, HIDDEN), F32))
        ln2_g.append(jnp.ones((1, HIDDEN), F32)); ln2_b.append(jnp.zeros((1, HIDDEN), F32))

    p["wqkv"] = jnp.stack(wqkv); p["bqkv"] = jnp.stack(bqkv)
    p["wo"] = jnp.stack(wo);     p["bo"] = jnp.stack(bo)
    p["wu"] = jnp.stack(wu);     p["bu"] = jnp.stack(bu)
    p["wd"] = jnp.stack(wd);     p["bd"] = jnp.stack(bd)
    p["ln1_g"] = jnp.stack(ln1_g); p["ln1_b"] = jnp.stack(ln1_b)
    p["ln2_g"] = jnp.stack(ln2_g); p["ln2_b"] = jnp.stack(ln2_b)
    return p


# ------------------------------- forward ------------------------------------
def neural_encoder_forward(spikes, spikes_mask, spikes_timestamp, spikes_lengths,
                           params):
    del spikes_lengths  # unused in forward (as in the reference)
    # SmoothAndNoise: identity (no smoothing kernel, eval -> no noise)
    # Masker list is empty -> targets_mask stays all zeros
    targets_mask = jnp.zeros_like(spikes, dtype=jnp.int32)

    # TODO(synk): timestamp-indexed table gathers are host-side XLA glue; they
    # could be moved in-kernel via SMEM scalar prefetch, but the win is minor.
    ts = spikes_timestamp                                             # (B, T) int32
    pos_g = params["pos_table"][ts].reshape(M_ROWS, HIDDEN)
    cos_h = params["cos_table"][ts]                                   # (B, T, HEAD)
    sin_h = params["sin_table"][ts]
    first_half = jnp.arange(HEAD) < HALF
    cos_g = jnp.tile(cos_h, (1, 1, N_HEADS)).reshape(M_ROWS, HIDDEN)
    sina_g = jnp.tile(jnp.where(first_half, -sin_h, 0.0),
                      (1, 1, N_HEADS)).reshape(M_ROWS, HIDDEN)
    sinb_g = jnp.tile(jnp.where(first_half, 0.0, sin_h),
                      (1, 1, N_HEADS)).reshape(M_ROWS, HIDDEN)

    # block-diagonal additive attention bias over the batch-folded M axis:
    #   keep[i, j] = same_batch(i, j) & ((row_t(i) == col_t(j)) | spikes_mask[b, col_t(j)])
    # (context mask is all ones for forward=-2 / backward=-2)
    batch_ids = jnp.repeat(jnp.arange(M_ROWS) // T, 1)                # (M,)
    same_batch = batch_ids[:, None] == batch_ids[None, :]
    eye_m = jnp.eye(M_ROWS, dtype=bool)
    key_mask = spikes_mask.reshape(M_ROWS).astype(bool)               # per key column
    keep = eye_m | (same_batch & key_mask[None, :])
    attn_bias = jnp.where(keep, 0.0, NEG_INF).astype(F32)             # (M, M)

    spikes2d = spikes.reshape(M_ROWS, N_CH)

    out = pl.pallas_call(
        encoder_kernel,
        out_shape=jax.ShapeDtypeStruct((M_ROWS, HIDDEN), F32),
    )(spikes2d, attn_bias, pos_g, cos_g, sina_g, sinb_g,
      params["w_embed"], params["b_embed"], params["w_proj"], params["b_proj"],
      params["ln1_g"], params["ln1_b"], params["wqkv"], params["bqkv"],
      params["wo"], params["bo"], params["ln2_g"], params["ln2_b"],
      params["wu"], params["bu"], params["wd"], params["bd"],
      params["ln_out_g"], params["ln_out_b"])

    # factors projection inactive -> identity; no day/block token to strip
    return out.reshape(B, T, HIDDEN), spikes_mask, targets_mask


# -------------------- pure-JAX reference (for validation) -------------------
def reference_forward(spikes, spikes_mask, spikes_timestamp, params):
    ts = spikes_timestamp
    h = (jnp.dot(spikes.reshape(M_ROWS, N_CH).astype(BF16), params["w_embed"],
                 preferred_element_type=F32) + params["b_embed"])
    h = jnp.maximum(h, 0.0)
    x = (jnp.dot(h.astype(BF16), params["w_proj"], preferred_element_type=F32)
         + params["b_proj"])
    x = x + params["pos_table"][ts].reshape(M_ROWS, HIDDEN)

    cos = params["cos_table"][ts]                                     # (B, T, HEAD)
    sin = params["sin_table"][ts]
    eye = jnp.eye(T, dtype=jnp.int32)
    keep = (eye[None, :, :] | spikes_mask[:, None, :].astype(jnp.int32)) > 0
    bias = jnp.where(keep, 0.0, NEG_INF)                              # (B, T, T)

    def rotate_half(u):
        return jnp.concatenate([-u[..., HALF:], u[..., :HALF]], axis=-1)

    scale = 1.0 / math.sqrt(HEAD)
    for l in range(N_LAYERS):
        xn = _layernorm(x, params["ln1_g"][l], params["ln1_b"][l])
        qkv = (jnp.dot(xn.astype(BF16), params["wqkv"][l],
                       preferred_element_type=F32) + params["bqkv"][l])
        q = qkv[:, :HIDDEN].reshape(B, T, N_HEADS, HEAD).transpose(0, 2, 1, 3)
        k = qkv[:, HIDDEN:2 * HIDDEN].reshape(B, T, N_HEADS, HEAD).transpose(0, 2, 1, 3)
        v = qkv[:, 2 * HIDDEN:].reshape(B, T, N_HEADS, HEAD).transpose(0, 2, 1, 3)
        c, s_ = cos[:, None], sin[:, None]
        q = q * c + rotate_half(q) * s_
        k = k * c + rotate_half(k) * s_
        sc = jnp.einsum("bhtd,bhsd->bhts", q.astype(BF16), k.astype(BF16),
                        preferred_element_type=F32) * scale + bias[:, None]
        sc = sc - sc.max(-1, keepdims=True)
        p = jnp.exp(sc)
        p = p / p.sum(-1, keepdims=True)
        ctx = jnp.einsum("bhts,bhsd->bhtd", p.astype(BF16), v.astype(BF16),
                         preferred_element_type=F32)
        ctx = ctx.transpose(0, 2, 1, 3).reshape(M_ROWS, HIDDEN)
        attn = (jnp.dot(ctx.astype(BF16), params["wo"][l],
                        preferred_element_type=F32) + params["bo"][l])
        x = x + attn
        xn2 = _layernorm(x, params["ln2_g"][l], params["ln2_b"][l])
        up = jax.nn.gelu(jnp.dot(xn2.astype(BF16), params["wu"][l],
                                 preferred_element_type=F32) + params["bu"][l],
                         approximate=True)
        x = x + (jnp.dot(up.astype(BF16), params["wd"][l],
                         preferred_element_type=F32) + params["bd"][l])
    x = _layernorm(x, params["ln_out_g"], params["ln_out_b"])
    return x.reshape(B, T, HIDDEN)


# --------------------------------- main --------------------------------------
if __name__ == "__main__":
    key = jax.random.PRNGKey(0)
    kp, ks = jax.random.split(key)
    params = init_params(kp)

    spikes = jax.random.normal(ks, (B, T, N_CH), F32)                 # (B, T, N)
    spikes_mask = jnp.ones((B, T), jnp.int32).at[1, -2:].set(0)       # pad last 2 of batch 1
    spikes_timestamp = jnp.tile(jnp.arange(T, dtype=jnp.int32), (B, 1))
    spikes_lengths = jnp.array([T, T - 2], jnp.int32)

    fwd = jax.jit(neural_encoder_forward)
    out, out_mask, targets_mask = fwd(spikes, spikes_mask, spikes_timestamp,
                                      spikes_lengths, params)
    out = jax.block_until_ready(out)

    assert out.shape == (B, T, HIDDEN)
    assert out_mask.shape == (B, T)
    assert targets_mask.shape == (B, T, N_CH)
    assert bool(jnp.all(jnp.isfinite(out)))

    # cross-check against a pure-JAX reference with identical bf16 casts
    ref = jax.jit(reference_forward)(spikes, spikes_mask, spikes_timestamp, params)
    max_err = float(jnp.max(jnp.abs(out - ref)))
    assert max_err < 3e-2, f"kernel/reference mismatch: max abs err {max_err}"

    print("KERNEL_OK")
</pallas_src>

<mosaic_0001>
module attributes {stable_mosaic.version = 11 : i64} {
  func.func @encoder_kernel(%arg0: memref<16x16xf32, #tpu.memory_space<vmem>>, %arg1: memref<16x16xf32, #tpu.memory_space<vmem>>, %arg2: memref<16x128xf32, #tpu.memory_space<vmem>>, %arg3: memref<16x128xf32, #tpu.memory_space<vmem>>, %arg4: memref<16x128xf32, #tpu.memory_space<vmem>>, %arg5: memref<16x128xf32, #tpu.memory_space<vmem>>, %arg6: memref<16x32xbf16, #tpu.memory_space<vmem>>, %arg7: memref<1x32xf32, #tpu.memory_space<vmem>>, %arg8: memref<32x128xbf16, #tpu.memory_space<vmem>>, %arg9: memref<1x128xf32, #tpu.memory_space<vmem>>, %arg10: memref<2x1x128xf32, #tpu.memory_space<vmem>>, %arg11: memref<2x1x128xf32, #tpu.memory_space<vmem>>, %arg12: memref<2x128x384xbf16, #tpu.memory_space<vmem>>, %arg13: memref<2x1x384xf32, #tpu.memory_space<vmem>>, %arg14: memref<2x128x128xbf16, #tpu.memory_space<vmem>>, %arg15: memref<2x1x128xf32, #tpu.memory_space<vmem>>, %arg16: memref<2x1x128xf32, #tpu.memory_space<vmem>>, %arg17: memref<2x1x128xf32, #tpu.memory_space<vmem>>, %arg18: memref<2x128x256xbf16, #tpu.memory_space<vmem>>, %arg19: memref<2x1x256xf32, #tpu.memory_space<vmem>>, %arg20: memref<2x256x128xbf16, #tpu.memory_space<vmem>>, %arg21: memref<2x1x128xf32, #tpu.memory_space<vmem>>, %arg22: memref<1x128xf32, #tpu.memory_space<vmem>>, %arg23: memref<1x128xf32, #tpu.memory_space<vmem>>, %arg24: memref<16x128xf32, #tpu.memory_space<vmem>>) attributes {dimension_semantics = [], scalar_prefetch = 0 : i64, scratch_operands = 0 : i64, tpu.core_type = #tpu.core_type<tc>} {
    %c0 = arith.constant 0 : index
    %c0_0 = arith.constant 0 : index
    %0 = vector.load %arg0[%c0, %c0_0] : memref<16x16xf32, #tpu.memory_space<vmem>>, vector<16x16xf32>
    %1 = arith.truncf %0 : vector<16x16xf32> to vector<16x16xbf16>
    %c0_1 = arith.constant 0 : index
    %c0_2 = arith.constant 0 : index
    %2 = vector.load %arg6[%c0_1, %c0_2] : memref<16x32xbf16, #tpu.memory_space<vmem>>, vector<16x32xbf16>
    %cst = arith.constant dense<0.000000e+00> : vector<16x32xf32>
    %3 = tpu.matmul %1, %2, %cst {dimension_numbers = #tpu.dot_dimension_numbers<[1], [0], [0], [1], [0, 0, 1, 1], [], []>} : vector<16x16xbf16>, vector<16x32xbf16>, vector<16x32xf32> -> vector<16x32xf32>
    %c0_3 = arith.constant 0 : index
    %c0_4 = arith.constant 0 : index
    %4 = vector.load %arg7[%c0_3, %c0_4] : memref<1x32xf32, #tpu.memory_space<vmem>>, vector<1x32xf32>
    %5 = vector.broadcast %4 : vector<1x32xf32> to vector<16x32xf32>
    %6 = arith.addf %3, %5 : vector<16x32xf32>
    %cst_5 = arith.constant 0.000000e+00 : f32
    %7 = vector.broadcast %cst_5 : f32 to vector<16x32xf32>
    %8 = arith.maximumf %6, %7 : vector<16x32xf32>
    %9 = arith.truncf %8 : vector<16x32xf32> to vector<16x32xbf16>
    %c0_6 = arith.constant 0 : index
    %c0_7 = arith.constant 0 : index
    %10 = vector.load %arg8[%c0_6, %c0_7] : memref<32x128xbf16, #tpu.memory_space<vmem>>, vector<32x128xbf16>
    %cst_8 = arith.constant dense<0.000000e+00> : vector<16x128xf32>
    %11 = tpu.matmul %9, %10, %cst_8 {dimension_numbers = #tpu.dot_dimension_numbers<[1], [0], [0], [1], [0, 0, 1, 1], [], []>} : vector<16x32xbf16>, vector<32x128xbf16>, vector<16x128xf32> -> vector<16x128xf32>
    %c0_9 = arith.constant 0 : index
    %c0_10 = arith.constant 0 : index
    %12 = vector.load %arg9[%c0_9, %c0_10] : memref<1x128xf32, #tpu.memory_space<vmem>>, vector<1x128xf32>
    %13 = vector.broadcast %12 : vector<1x128xf32> to vector<16x128xf32>
    %14 = arith.addf %11, %13 : vector<16x128xf32>
    %c0_11 = arith.constant 0 : index
    %c0_12 = arith.constant 0 : index
    %15 = vector.load %arg2[%c0_11, %c0_12] : memref<16x128xf32, #tpu.memory_space<vmem>>, vector<16x128xf32>
    %16 = arith.addf %14, %15 : vector<16x128xf32>
    %c0_13 = arith.constant 0 : index
    %c0_14 = arith.constant 0 : index
    %17 = vector.load %arg3[%c0_13, %c0_14] : memref<16x128xf32, #tpu.memory_space<vmem>>, vector<16x128xf32>
    %c0_15 = arith.constant 0 : index
    %c0_16 = arith.constant 0 : index
    %18 = vector.load %arg4[%c0_15, %c0_16] : memref<16x128xf32, #tpu.memory_space<vmem>>, vector<16x128xf32>
    %c0_17 = arith.constant 0 : index
    %c0_18 = arith.constant 0 : index
    %19 = vector.load %arg5[%c0_17, %c0_18] : memref<16x128xf32, #tpu.memory_space<vmem>>, vector<16x128xf32>
    %c0_19 = arith.constant 0 : index
    %c0_20 = arith.constant 0 : index
    %20 = vector.load %arg1[%c0_19, %c0_20] : memref<16x16xf32, #tpu.memory_space<vmem>>, vector<16x16xf32>
    %c0_21 = arith.constant 0 : index
    %c0_22 = arith.constant 0 : index
    %c0_23 = arith.constant 0 : index
    %21 = vector.load %arg10[%c0_21, %c0_22, %c0_23] : memref<2x1x128xf32, #tpu.memory_space<vmem>>, vector<1x1x128xf32>
    %22 = vector.shape_cast %21 : vector<1x1x128xf32> to vector<1x128xf32>
    %c0_24 = arith.constant 0 : index
    %c0_25 = arith.constant 0 : index
    %c0_26 = arith.constant 0 : index
    %23 = vector.load %arg11[%c0_24, %c0_25, %c0_26] : memref<2x1x128xf32, #tpu.memory_space<vmem>>, vector<1x1x128xf32>
    %24 = vector.shape_cast %23 : vector<1x1x128xf32> to vector<1x128xf32>
    %cst_27 = arith.constant dense<0.000000e+00> : vector<16xf32>
    %25 = vector.multi_reduction <add>, %16, %cst_27 [1] : vector<16x128xf32> to vector<16xf32>
    %26 = vector.shape_cast %25 : vector<16xf32> to vector<16x1xf32>
    %cst_28 = arith.constant 1.280000e+02 : f32
    %27 = vector.broadcast %cst_28 : f32 to vector<16x1xf32>
    %28 = arith.divf %26, %27 : vector<16x1xf32>
    %29 = vector.broadcast %28 : vector<16x1xf32> to vector<16x128xf32>
    %30 = arith.subf %16, %29 : vector<16x128xf32>
    %31 = arith.mulf %30, %30 : vector<16x128xf32>
    %cst_29 = arith.constant dense<0.000000e+00> : vector<16xf32>
    %32 = vector.multi_reduction <add>, %31, %cst_29 [1] : vector<16x128xf32> to vector<16xf32>
    %33 = vector.shape_cast %32 : vector<16xf32> to vector<16x1xf32>
    %cst_30 = arith.constant 1.280000e+02 : f32
    %34 = vector.broadcast %cst_30 : f32 to vector<16x1xf32>
    %35 = arith.divf %33, %34 : vector<16x1xf32>
    %36 = vector.broadcast %28 : vector<16x1xf32> to vector<16x128xf32>
    %37 = arith.subf %16, %36 : vector<16x128xf32>
    %cst_31 = arith.constant 9.99999974E-6 : f32
    %38 = vector.broadcast %cst_31 : f32 to vector<16x1xf32>
    %39 = arith.addf %35, %38 : vector<16x1xf32>
    %40 = math.rsqrt %39 : vector<16x1xf32>
    %41 = vector.broadcast %40 : vector<16x1xf32> to vector<16x128xf32>
    %42 = arith.mulf %37, %41 : vector<16x128xf32>
    %43 = vector.broadcast %22 : vector<1x128xf32> to vector<16x128xf32>
    %44 = arith.mulf %42, %43 : vector<16x128xf32>
    %45 = vector.broadcast %24 : vector<1x128xf32> to vector<16x128xf32>
    %46 = arith.addf %44, %45 : vector<16x128xf32>
    %47 = arith.truncf %46 : vector<16x128xf32> to vector<16x128xbf16>
    %c0_32 = arith.constant 0 : index
    %c0_33 = arith.constant 0 : index
    %c0_34 = arith.constant 0 : index
    %48 = vector.load %arg12[%c0_32, %c0_33, %c0_34] : memref<2x128x384xbf16, #tpu.memory_space<vmem>>, vector<1x128x384xbf16>
    %49 = vector.shape_cast %48 : vector<1x128x384xbf16> to vector<128x384xbf16>
    %cst_35 = arith.constant dense<0.000000e+00> : vector<16x384xf32>
    %50 = tpu.matmul %47, %49, %cst_35 {dimension_numbers = #tpu.dot_dimension_numbers<[1], [0], [0], [1], [0, 0, 1, 1], [], []>} : vector<16x128xbf16>, vector<128x384xbf16>, vector<16x384xf32> -> vector<16x384xf32>
    %c0_36 = arith.constant 0 : index
    %c0_37 = arith.constant 0 : index
    %c0_38 = arith.constant 0 : index
    %51 = vector.load %arg13[%c0_36, %c0_37, %c0_38] : memref<2x1x384xf32, #tpu.memory_space<vmem>>, vector<1x1x384xf32>
    %52 = vector.shape_cast %51 : vector<1x1x384xf32> to vector<1x384xf32>
    %53 = vector.broadcast %52 : vector<1x384xf32> to vector<16x384xf32>
    %54 = arith.addf %50, %53 : vector<16x384xf32>
    %55 = vector.extract_strided_slice %54 {offsets = [0, 0], sizes = [16, 128], strides = [1, 1]} : vector<16x384xf32> to vector<16x128xf32>
    %c112_i32 = arith.constant 112 : i32
    %56 = tpu.dynamic_rotate %55 by %c112_i32 dim 1 : vector<16x128xf32>, i32 -> vector<16x128xf32>
    %c16_i32 = arith.constant 16 : i32
    %57 = tpu.dynamic_rotate %55 by %c16_i32 dim 1 : vector<16x128xf32>, i32 -> vector<16x128xf32>
    %58 = arith.mulf %55, %17 : vector<16x128xf32>
    %59 = arith.mulf %56, %18 : vector<16x128xf32>
    %60 = arith.addf %58, %59 : vector<16x128xf32>
    %61 = arith.mulf %57, %19 : vector<16x128xf32>
    %62 = arith.addf %60, %61 : vector<16x128xf32>
    %cst_39 = arith.constant 0.176776692 : f32
    %63 = vector.broadcast %cst_39 : f32 to vector<16x128xf32>
    %64 = arith.mulf %62, %63 : vector<16x128xf32>
    %65 = vector.extract_strided_slice %54 {offsets = [0, 128], sizes = [16, 128], strides = [1, 1]} : vector<16x384xf32> to vector<16x128xf32>
    %c112_i32_40 = arith.constant 112 : i32
    %66 = tpu.dynamic_rotate %65 by %c112_i32_40 dim 1 : vector<16x128xf32>, i32 -> vector<16x128xf32>
    %c16_i32_41 = arith.constant 16 : i32
    %67 = tpu.dynamic_rotate %65 by %c16_i32_41 dim 1 : vector<16x128xf32>, i32 -> vector<16x128xf32>
    %68 = arith.mulf %65, %17 : vector<16x128xf32>
    %69 = arith.mulf %66, %18 : vector<16x128xf32>
    %70 = arith.addf %68, %69 : vector<16x128xf32>
    %71 = arith.mulf %67, %19 : vector<16x128xf32>
    %72 = arith.addf %70, %71 : vector<16x128xf32>
    %73 = arith.truncf %64 : vector<16x128xf32> to vector<16x128xbf16>
    %74 = arith.truncf %72 : vector<16x128xf32> to vector<16x128xbf16>
    %75 = vector.extract_strided_slice %54 {offsets = [0, 256], sizes = [16, 128], strides = [1, 1]} : vector<16x384xf32> to vector<16x128xf32>
    %76 = arith.truncf %75 : vector<16x128xf32> to vector<16x128xbf16>
    %c0_42 = arith.constant 0 : index
    %c0_43 = arith.constant 0 : index
    %c0_44 = arith.constant 0 : index
    %77 = vector.load %arg14[%c0_42, %c0_43, %c0_44] : memref<2x128x128xbf16, #tpu.memory_space<vmem>>, vector<1x128x128xbf16>
    %78 = vector.shape_cast %77 : vector<1x128x128xbf16> to vector<128x128xbf16>
    %cst_45 = arith.constant 0.000000e+00 : f32
    %79 = vector.broadcast %cst_45 : f32 to vector<16x128xf32>
    %80 = vector.extract_strided_slice %73 {offsets = [0, 0], sizes = [16, 32], strides = [1, 1]} : vector<16x128xbf16> to vector<16x32xbf16>
    %81 = vector.extract_strided_slice %74 {offsets = [0, 0], sizes = [16, 32], strides = [1, 1]} : vector<16x128xbf16> to vector<16x32xbf16>
    %cst_46 = arith.constant dense<0.000000e+00> : vector<16x16xf32>
    %82 = tpu.matmul %80, %81, %cst_46 {dimension_numbers = #tpu.dot_dimension_numbers<[1], [1], [0], [0], [0, 0, 1, 0], [], []>} : vector<16x32xbf16>, vector<16x32xbf16>, vector<16x16xf32> -> vector<16x16xf32>
    %83 = arith.addf %82, %20 : vector<16x16xf32>
    %cst_47 = arith.constant dense<0xFF800000> : vector<16xf32>
    %84 = vector.multi_reduction <maximumf>, %83, %cst_47 [1] : vector<16x16xf32> to vector<16xf32>
    %85 = vector.shape_cast %84 : vector<16xf32> to vector<16x1xf32>
    %86 = vector.broadcast %85 : vector<16x1xf32> to vector<16x16xf32>
    %87 = arith.subf %83, %86 : vector<16x16xf32>
    %88 = math.exp %87 : vector<16x16xf32>
    %cst_48 = arith.constant dense<0.000000e+00> : vector<16xf32>
    %89 = vector.multi_reduction <add>, %88, %cst_48 [1] : vector<16x16xf32> to vector<16xf32>
    %90 = vector.shape_cast %89 : vector<16xf32> to vector<16x1xf32>
    %91 = tpu.reciprocal %90 {approx = true} : vector<16x1xf32> -> vector<16x1xf32>
    %92 = vector.broadcast %91 : vector<16x1xf32> to vector<16x16xf32>
    %93 = arith.mulf %88, %92 : vector<16x16xf32>
    %94 = arith.truncf %93 : vector<16x16xf32> to vector<16x16xbf16>
    %95 = vector.extract_strided_slice %76 {offsets = [0, 0], sizes = [16, 32], strides = [1, 1]} : vector<16x128xbf16> to vector<16x32xbf16>
    %cst_49 = arith.constant dense<0.000000e+00> : vector<16x32xf32>
    %96 = tpu.matmul %94, %95, %cst_49 {dimension_numbers = #tpu.dot_dimension_numbers<[1], [0], [0], [1], [0, 0, 1, 1], [], []>} : vector<16x16xbf16>, vector<16x32xbf16>, vector<16x32xf32> -> vector<16x32xf32>
    %97 = arith.truncf %96 : vector<16x32xf32> to vector<16x32xbf16>
    %98 = vector.extract_strided_slice %78 {offsets = [0, 0], sizes = [32, 128], strides = [1, 1]} : vector<128x128xbf16> to vector<32x128xbf16>
    %cst_50 = arith.constant dense<0.000000e+00> : vector<16x128xf32>
    %99 = tpu.matmul %97, %98, %cst_50 {dimension_numbers = #tpu.dot_dimension_numbers<[1], [0], [0], [1], [0, 0, 1, 1], [], []>} : vector<16x32xbf16>, vector<32x128xbf16>, vector<16x128xf32> -> vector<16x128xf32>
    %100 = arith.addf %79, %99 : vector<16x128xf32>
    %101 = vector.extract_strided_slice %73 {offsets = [0, 32], sizes = [16, 32], strides = [1, 1]} : vector<16x128xbf16> to vector<16x32xbf16>
    %102 = vector.extract_strided_slice %74 {offsets = [0, 32], sizes = [16, 32], strides = [1, 1]} : vector<16x128xbf16> to vector<16x32xbf16>
    %cst_51 = arith.constant dense<0.000000e+00> : vector<16x16xf32>
    %103 = tpu.matmul %101, %102, %cst_51 {dimension_numbers = #tpu.dot_dimension_numbers<[1], [1], [0], [0], [0, 0, 1, 0], [], []>} : vector<16x32xbf16>, vector<16x32xbf16>, vector<16x16xf32> -> vector<16x16xf32>
    %104 = arith.addf %103, %20 : vector<16x16xf32>
    %cst_52 = arith.constant dense<0xFF800000> : vector<16xf32>
    %105 = vector.multi_reduction <maximumf>, %104, %cst_52 [1] : vector<16x16xf32> to vector<16xf32>
    %106 = vector.shape_cast %105 : vector<16xf32> to vector<16x1xf32>
    %107 = vector.broadcast %106 : vector<16x1xf32> to vector<16x16xf32>
    %108 = arith.subf %104, %107 : vector<16x16xf32>
    %109 = math.exp %108 : vector<16x16xf32>
    %cst_53 = arith.constant dense<0.000000e+00> : vector<16xf32>
    %110 = vector.multi_reduction <add>, %109, %cst_53 [1] : vector<16x16xf32> to vector<16xf32>
    %111 = vector.shape_cast %110 : vector<16xf32> to vector<16x1xf32>
    %112 = tpu.reciprocal %111 {approx = true} : vector<16x1xf32> -> vector<16x1xf32>
    %113 = vector.broadcast %112 : vector<16x1xf32> to vector<16x16xf32>
    %114 = arith.mulf %109, %113 : vector<16x16xf32>
    %115 = arith.truncf %114 : vector<16x16xf32> to vector<16x16xbf16>
    %116 = vector.extract_strided_slice %76 {offsets = [0, 32], sizes = [16, 32], strides = [1, 1]} : vector<16x128xbf16> to vector<16x32xbf16>
    %cst_54 = arith.constant dense<0.000000e+00> : vector<16x32xf32>
    %117 = tpu.matmul %115, %116, %cst_54 {dimension_numbers = #tpu.dot_dimension_numbers<[1], [0], [0], [1], [0, 0, 1, 1], [], []>} : vector<16x16xbf16>, vector<16x32xbf16>, vector<16x32xf32> -> vector<16x32xf32>
    %118 = arith.truncf %117 : vector<16x32xf32> to vector<16x32xbf16>
    %119 = vector.extract_strided_slice %78 {offsets = [32, 0], sizes = [32, 128], strides = [1, 1]} : vector<128x128xbf16> to vector<32x128xbf16>
    %cst_55 = arith.constant dense<0.000000e+00> : vector<16x128xf32>
    %120 = tpu.matmul %118, %119, %cst_55 {dimension_numbers = #tpu.dot_dimension_numbers<[1], [0], [0], [1], [0, 0, 1, 1], [], []>} : vector<16x32xbf16>, vector<32x128xbf16>, vector<16x128xf32> -> vector<16x128xf32>
    %121 = arith.addf %100, %120 : vector<16x128xf32>
    %122 = vector.extract_strided_slice %73 {offsets = [0, 64], sizes = [16, 32], strides = [1, 1]} : vector<16x128xbf16> to vector<16x32xbf16>
    %123 = vector.extract_strided_slice %74 {offsets = [0, 64], sizes = [16, 32], strides = [1, 1]} : vector<16x128xbf16> to vector<16x32xbf16>
    %cst_56 = arith.constant dense<0.000000e+00> : vector<16x16xf32>
    %124 = tpu.matmul %122, %123, %cst_56 {dimension_numbers = #tpu.dot_dimension_numbers<[1], [1], [0], [0], [0, 0, 1, 0], [], []>} : vector<16x32xbf16>, vector<16x32xbf16>, vector<16x16xf32> -> vector<16x16xf32>
    %125 = arith.addf %124, %20 : vector<16x16xf32>
    %cst_57 = arith.constant dense<0xFF800000> : vector<16xf32>
    %126 = vector.multi_reduction <maximumf>, %125, %cst_57 [1] : vector<16x16xf32> to vector<16xf32>
    %127 = vector.shape_cast %126 : vector<16xf32> to vector<16x1xf32>
    %128 = vector.broadcast %127 : vector<16x1xf32> to vector<16x16xf32>
    %129 = arith.subf %125, %128 : vector<16x16xf32>
    %130 = math.exp %129 : vector<16x16xf32>
    %cst_58 = arith.constant dense<0.000000e+00> : vector<16xf32>
    %131 = vector.multi_reduction <add>, %130, %cst_58 [1] : vector<16x16xf32> to vector<16xf32>
    %132 = vector.shape_cast %131 : vector<16xf32> to vector<16x1xf32>
    %133 = tpu.reciprocal %132 {approx = true} : vector<16x1xf32> -> vector<16x1xf32>
    %134 = vector.broadcast %133 : vector<16x1xf32> to vector<16x16xf32>
    %135 = arith.mulf %130, %134 : vector<16x16xf32>
    %136 = arith.truncf %135 : vector<16x16xf32> to vector<16x16xbf16>
    %137 = vector.extract_strided_slice %76 {offsets = [0, 64], sizes = [16, 32], strides = [1, 1]} : vector<16x128xbf16> to vector<16x32xbf16>
    %cst_59 = arith.constant dense<0.000000e+00> : vector<16x32xf32>
    %138 = tpu.matmul %136, %137, %cst_59 {dimension_numbers = #tpu.dot_dimension_numbers<[1], [0], [0], [1], [0, 0, 1, 1], [], []>} : vector<16x16xbf16>, vector<16x32xbf16>, vector<16x32xf32> -> vector<16x32xf32>
    %139 = arith.truncf %138 : vector<16x32xf32> to vector<16x32xbf16>
    %140 = vector.extract_strided_slice %78 {offsets = [64, 0], sizes = [32, 128], strides = [1, 1]} : vector<128x128xbf16> to vector<32x128xbf16>
    %cst_60 = arith.constant dense<0.000000e+00> : vector<16x128xf32>
    %141 = tpu.matmul %139, %140, %cst_60 {dimension_numbers = #tpu.dot_dimension_numbers<[1], [0], [0], [1], [0, 0, 1, 1], [], []>} : vector<16x32xbf16>, vector<32x128xbf16>, vector<16x128xf32> -> vector<16x128xf32>
    %142 = arith.addf %121, %141 : vector<16x128xf32>
    %143 = vector.extract_strided_slice %73 {offsets = [0, 96], sizes = [16, 32], strides = [1, 1]} : vector<16x128xbf16> to vector<16x32xbf16>
    %144 = vector.extract_strided_slice %74 {offsets = [0, 96], sizes = [16, 32], strides = [1, 1]} : vector<16x128xbf16> to vector<16x32xbf16>
    %cst_61 = arith.constant dense<0.000000e+00> : vector<16x16xf32>
    %145 = tpu.matmul %143, %144, %cst_61 {dimension_numbers = #tpu.dot_dimension_numbers<[1], [1], [0], [0], [0, 0, 1, 0], [], []>} : vector<16x32xbf16>, vector<16x32xbf16>, vector<16x16xf32> -> vector<16x16xf32>
    %146 = arith.addf %145, %20 : vector<16x16xf32>
    %cst_62 = arith.constant dense<0xFF800000> : vector<16xf32>
    %147 = vector.multi_reduction <maximumf>, %146, %cst_62 [1] : vector<16x16xf32> to vector<16xf32>
    %148 = vector.shape_cast %147 : vector<16xf32> to vector<16x1xf32>
    %149 = vector.broadcast %148 : vector<16x1xf32> to vector<16x16xf32>
    %150 = arith.subf %146, %149 : vector<16x16xf32>
    %151 = math.exp %150 : vector<16x16xf32>
    %cst_63 = arith.constant dense<0.000000e+00> : vector<16xf32>
    %152 = vector.multi_reduction <add>, %151, %cst_63 [1] : vector<16x16xf32> to vector<16xf32>
    %153 = vector.shape_cast %152 : vector<16xf32> to vector<16x1xf32>
    %154 = tpu.reciprocal %153 {approx = true} : vector<16x1xf32> -> vector<16x1xf32>
    %155 = vector.broadcast %154 : vector<16x1xf32> to vector<16x16xf32>
    %156 = arith.mulf %151, %155 : vector<16x16xf32>
    %157 = arith.truncf %156 : vector<16x16xf32> to vector<16x16xbf16>
    %158 = vector.extract_strided_slice %76 {offsets = [0, 96], sizes = [16, 32], strides = [1, 1]} : vector<16x128xbf16> to vector<16x32xbf16>
    %cst_64 = arith.constant dense<0.000000e+00> : vector<16x32xf32>
    %159 = tpu.matmul %157, %158, %cst_64 {dimension_numbers = #tpu.dot_dimension_numbers<[1], [0], [0], [1], [0, 0, 1, 1], [], []>} : vector<16x16xbf16>, vector<16x32xbf16>, vector<16x32xf32> -> vector<16x32xf32>
    %160 = arith.truncf %159 : vector<16x32xf32> to vector<16x32xbf16>
    %161 = vector.extract_strided_slice %78 {offsets = [96, 0], sizes = [32, 128], strides = [1, 1]} : vector<128x128xbf16> to vector<32x128xbf16>
    %cst_65 = arith.constant dense<0.000000e+00> : vector<16x128xf32>
    %162 = tpu.matmul %160, %161, %cst_65 {dimension_numbers = #tpu.dot_dimension_numbers<[1], [0], [0], [1], [0, 0, 1, 1], [], []>} : vector<16x32xbf16>, vector<32x128xbf16>, vector<16x128xf32> -> vector<16x128xf32>
    %163 = arith.addf %142, %162 : vector<16x128xf32>
    %164 = arith.addf %16, %163 : vector<16x128xf32>
    %c0_66 = arith.constant 0 : index
    %c0_67 = arith.constant 0 : index
    %c0_68 = arith.constant 0 : index
    %165 = vector.load %arg15[%c0_66, %c0_67, %c0_68] : memref<2x1x128xf32, #tpu.memory_space<vmem>>, vector<1x1x128xf32>
    %166 = vector.shape_cast %165 : vector<1x1x128xf32> to vector<1x128xf32>
    %167 = vector.broadcast %166 : vector<1x128xf32> to vector<16x128xf32>
    %168 = arith.addf %164, %167 : vector<16x128xf32>
    %c0_69 = arith.constant 0 : index
    %c0_70 = arith.constant 0 : index
    %c0_71 = arith.constant 0 : index
    %169 = vector.load %arg16[%c0_69, %c0_70, %c0_71] : memref<2x1x128xf32, #tpu.memory_space<vmem>>, vector<1x1x128xf32>
    %170 = vector.shape_cast %169 : vector<1x1x128xf32> to vector<1x128xf32>
    %c0_72 = arith.constant 0 : index
    %c0_73 = arith.constant 0 : index
    %c0_74 = arith.constant 0 : index
    %171 = vector.load %arg17[%c0_72, %c0_73, %c0_74] : memref<2x1x128xf32, #tpu.memory_space<vmem>>, vector<1x1x128xf32>
    %172 = vector.shape_cast %171 : vector<1x1x128xf32> to vector<1x128xf32>
    %cst_75 = arith.constant dense<0.000000e+00> : vector<16xf32>
    %173 = vector.multi_reduction <add>, %168, %cst_75 [1] : vector<16x128xf32> to vector<16xf32>
    %174 = vector.shape_cast %173 : vector<16xf32> to vector<16x1xf32>
    %cst_76 = arith.constant 1.280000e+02 : f32
    %175 = vector.broadcast %cst_76 : f32 to vector<16x1xf32>
    %176 = arith.divf %174, %175 : vector<16x1xf32>
    %177 = vector.broadcast %176 : vector<16x1xf32> to vector<16x128xf32>
    %178 = arith.subf %168, %177 : vector<16x128xf32>
    %179 = arith.mulf %178, %178 : vector<16x128xf32>
    %cst_77 = arith.constant dense<0.000000e+00> : vector<16xf32>
    %180 = vector.multi_reduction <add>, %179, %cst_77 [1] : vector<16x128xf32> to vector<16xf32>
    %181 = vector.shape_cast %180 : vector<16xf32> to vector<16x1xf32>
    %cst_78 = arith.constant 1.280000e+02 : f32
    %182 = vector.broadcast %cst_78 : f32 to vector<16x1xf32>
    %183 = arith.divf %181, %182 : vector<16x1xf32>
    %184 = vector.broadcast %176 : vector<16x1xf32> to vector<16x128xf32>
    %185 = arith.subf %168, %184 : vector<16x128xf32>
    %cst_79 = arith.constant 9.99999974E-6 : f32
    %186 = vector.broadcast %cst_79 : f32 to vector<16x1xf32>
    %187 = arith.addf %183, %186 : vector<16x1xf32>
    %188 = math.rsqrt %187 : vector<16x1xf32>
    %189 = vector.broadcast %188 : vector<16x1xf32> to vector<16x128xf32>
    %190 = arith.mulf %185, %189 : vector<16x128xf32>
    %191 = vector.broadcast %170 : vector<1x128xf32> to vector<16x128xf32>
    %192 = arith.mulf %190, %191 : vector<16x128xf32>
    %193 = vector.broadcast %172 : vector<1x128xf32> to vector<16x128xf32>
    %194 = arith.addf %192, %193 : vector<16x128xf32>
    %195 = arith.truncf %194 : vector<16x128xf32> to vector<16x128xbf16>
    %c0_80 = arith.constant 0 : index
    %c0_81 = arith.constant 0 : index
    %c0_82 = arith.constant 0 : index
    %196 = vector.load %arg18[%c0_80, %c0_81, %c0_82] : memref<2x128x256xbf16, #tpu.memory_space<vmem>>, vector<1x128x256xbf16>
    %197 = vector.shape_cast %196 : vector<1x128x256xbf16> to vector<128x256xbf16>
    %cst_83 = arith.constant dense<0.000000e+00> : vector<16x256xf32>
    %198 = tpu.matmul %195, %197, %cst_83 {dimension_numbers = #tpu.dot_dimension_numbers<[1], [0], [0], [1], [0, 0, 1, 1], [], []>} : vector<16x128xbf16>, vector<128x256xbf16>, vector<16x256xf32> -> vector<16x256xf32>
    %c0_84 = arith.constant 0 : index
    %c0_85 = arith.constant 0 : index
    %c0_86 = arith.constant 0 : index
    %199 = vector.load %arg19[%c0_84, %c0_85, %c0_86] : memref<2x1x256xf32, #tpu.memory_space<vmem>>, vector<1x1x256xf32>
    %200 = vector.shape_cast %199 : vector<1x1x256xf32> to vector<1x256xf32>
    %201 = vector.broadcast %200 : vector<1x256xf32> to vector<16x256xf32>
    %202 = arith.addf %198, %201 : vector<16x256xf32>
    %203 = arith.mulf %202, %202 : vector<16x256xf32>
    %204 = arith.mulf %202, %203 : vector<16x256xf32>
    %cst_87 = arith.constant 4.471500e-02 : f32
    %205 = vector.broadcast %cst_87 : f32 to vector<16x256xf32>
    %206 = arith.mulf %205, %204 : vector<16x256xf32>
    %207 = arith.addf %202, %206 : vector<16x256xf32>
    %cst_88 = arith.constant 0.797884583 : f32
    %208 = vector.broadcast %cst_88 : f32 to vector<16x256xf32>
    %209 = arith.mulf %208, %207 : vector<16x256xf32>
    %210 = math.tanh %209 : vector<16x256xf32>
    %cst_89 = arith.constant 1.000000e+00 : f32
    %211 = vector.broadcast %cst_89 : f32 to vector<16x256xf32>
    %212 = arith.addf %211, %210 : vector<16x256xf32>
    %cst_90 = arith.constant 5.000000e-01 : f32
    %213 = vector.broadcast %cst_90 : f32 to vector<16x256xf32>
    %214 = arith.mulf %213, %212 : vector<16x256xf32>
    %215 = arith.mulf %202, %214 : vector<16x256xf32>
    %216 = arith.truncf %215 : vector<16x256xf32> to vector<16x256xbf16>
    %c0_91 = arith.constant 0 : index
    %c0_92 = arith.constant 0 : index
    %c0_93 = arith.constant 0 : index
    %217 = vector.load %arg20[%c0_91, %c0_92, %c0_93] : memref<2x256x128xbf16, #tpu.memory_space<vmem>>, vector<1x256x128xbf16>
    %218 = vector.shape_cast %217 : vector<1x256x128xbf16> to vector<256x128xbf16>
    %cst_94 = arith.constant dense<0.000000e+00> : vector<16x128xf32>
    %219 = tpu.matmul %216, %218, %cst_94 {dimension_numbers = #tpu.dot_dimension_numbers<[1], [0], [0], [1], [0, 0, 1, 1], [], []>} : vector<16x256xbf16>, vector<256x128xbf16>, vector<16x128xf32> -> vector<16x128xf32>
    %c0_95 = arith.constant 0 : index
    %c0_96 = arith.constant 0 : index
    %c0_97 = arith.constant 0 : index
    %220 = vector.load %arg21[%c0_95, %c0_96, %c0_97] : memref<2x1x128xf32, #tpu.memory_space<vmem>>, vector<1x1x128xf32>
    %221 = vector.shape_cast %220 : vector<1x1x128xf32> to vector<1x128xf32>
    %222 = vector.broadcast %221 : vector<1x128xf32> to vector<16x128xf32>
    %223 = arith.addf %219, %222 : vector<16x128xf32>
    %224 = arith.addf %168, %223 : vector<16x128xf32>
    %c1 = arith.constant 1 : index
    %c0_98 = arith.constant 0 : index
    %c0_99 = arith.constant 0 : index
    %225 = vector.load %arg10[%c1, %c0_98, %c0_99] : memref<2x1x128xf32, #tpu.memory_space<vmem>>, vector<1x1x128xf32>
    %226 = vector.shape_cast %225 : vector<1x1x128xf32> to vector<1x128xf32>
    %c1_100 = arith.constant 1 : index
    %c0_101 = arith.constant 0 : index
    %c0_102 = arith.constant 0 : index
    %227 = vector.load %arg11[%c1_100, %c0_101, %c0_102] : memref<2x1x128xf32, #tpu.memory_space<vmem>>, vector<1x1x128xf32>
    %228 = vector.shape_cast %227 : vector<1x1x128xf32> to vector<1x128xf32>
    %cst_103 = arith.constant dense<0.000000e+00> : vector<16xf32>
    %229 = vector.multi_reduction <add>, %224, %cst_103 [1] : vector<16x128xf32> to vector<16xf32>
    %230 = vector.shape_cast %229 : vector<16xf32> to vector<16x1xf32>
    %cst_104 = arith.constant 1.280000e+02 : f32
    %231 = vector.broadcast %cst_104 : f32 to vector<16x1xf32>
    %232 = arith.divf %230, %231 : vector<16x1xf32>
    %233 = vector.broadcast %232 : vector<16x1xf32> to vector<16x128xf32>
    %234 = arith.subf %224, %233 : vector<16x128xf32>
    %235 = arith.mulf %234, %234 : vector<16x128xf32>
    %cst_105 = arith.constant dense<0.000000e+00> : vector<16xf32>
    %236 = vector.multi_reduction <add>, %235, %cst_105 [1] : vector<16x128xf32> to vector<16xf32>
    %237 = vector.shape_cast %236 : vector<16xf32> to vector<16x1xf32>
    %cst_106 = arith.constant 1.280000e+02 : f32
    %238 = vector.broadcast %cst_106 : f32 to vector<16x1xf32>
    %239 = arith.divf %237, %238 : vector<16x1xf32>
    %240 = vector.broadcast %232 : vector<16x1xf32> to vector<16x128xf32>
    %241 = arith.subf %224, %240 : vector<16x128xf32>
    %cst_107 = arith.constant 9.99999974E-6 : f32
    %242 = vector.broadcast %cst_107 : f32 to vector<16x1xf32>
    %243 = arith.addf %239, %242 : vector<16x1xf32>
    %244 = math.rsqrt %243 : vector<16x1xf32>
    %245 = vector.broadcast %244 : vector<16x1xf32> to vector<16x128xf32>
    %246 = arith.mulf %241, %245 : vector<16x128xf32>
    %247 = vector.broadcast %226 : vector<1x128xf32> to vector<16x128xf32>
    %248 = arith.mulf %246, %247 : vector<16x128xf32>
    %249 = vector.broadcast %228 : vector<1x128xf32> to vector<16x128xf32>
    %250 = arith.addf %248, %249 : vector<16x128xf32>
    %251 = arith.truncf %250 : vector<16x128xf32> to vector<16x128xbf16>
    %c1_108 = arith.constant 1 : index
    %c0_109 = arith.constant 0 : index
    %c0_110 = arith.constant 0 : index
    %252 = vector.load %arg12[%c1_108, %c0_109, %c0_110] : memref<2x128x384xbf16, #tpu.memory_space<vmem>>, vector<1x128x384xbf16>
    %253 = vector.shape_cast %252 : vector<1x128x384xbf16> to vector<128x384xbf16>
    %cst_111 = arith.constant dense<0.000000e+00> : vector<16x384xf32>
    %254 = tpu.matmul %251, %253, %cst_111 {dimension_numbers = #tpu.dot_dimension_numbers<[1], [0], [0], [1], [0, 0, 1, 1], [], []>} : vector<16x128xbf16>, vector<128x384xbf16>, vector<16x384xf32> -> vector<16x384xf32>
    %c1_112 = arith.constant 1 : index
    %c0_113 = arith.constant 0 : index
    %c0_114 = arith.constant 0 : index
    %255 = vector.load %arg13[%c1_112, %c0_113, %c0_114] : memref<2x1x384xf32, #tpu.memory_space<vmem>>, vector<1x1x384xf32>
    %256 = vector.shape_cast %255 : vector<1x1x384xf32> to vector<1x384xf32>
    %257 = vector.broadcast %256 : vector<1x384xf32> to vector<16x384xf32>
    %258 = arith.addf %254, %257 : vector<16x384xf32>
    %259 = vector.extract_strided_slice %258 {offsets = [0, 0], sizes = [16, 128], strides = [1, 1]} : vector<16x384xf32> to vector<16x128xf32>
    %c112_i32_115 = arith.constant 112 : i32
    %260 = tpu.dynamic_rotate %259 by %c112_i32_115 dim 1 : vector<16x128xf32>, i32 -> vector<16x128xf32>
    %c16_i32_116 = arith.constant 16 : i32
    %261 = tpu.dynamic_rotate %259 by %c16_i32_116 dim 1 : vector<16x128xf32>, i32 -> vector<16x128xf32>
    %262 = arith.mulf %259, %17 : vector<16x128xf32>
    %263 = arith.mulf %260, %18 : vector<16x128xf32>
    %264 = arith.addf %262, %263 : vector<16x128xf32>
    %265 = arith.mulf %261, %19 : vector<16x128xf32>
    %266 = arith.addf %264, %265 : vector<16x128xf32>
    %cst_117 = arith.constant 0.176776692 : f32
    %267 = vector.broadcast %cst_117 : f32 to vector<16x128xf32>
    %268 = arith.mulf %266, %267 : vector<16x128xf32>
    %269 = vector.extract_strided_slice %258 {offsets = [0, 128], sizes = [16, 128], strides = [1, 1]} : vector<16x384xf32> to vector<16x128xf32>
    %c112_i32_118 = arith.constant 112 : i32
    %270 = tpu.dynamic_rotate %269 by %c112_i32_118 dim 1 : vector<16x128xf32>, i32 -> vector<16x128xf32>
    %c16_i32_119 = arith.constant 16 : i32
    %271 = tpu.dynamic_rotate %269 by %c16_i32_119 dim 1 : vector<16x128xf32>, i32 -> vector<16x128xf32>
    %272 = arith.mulf %269, %17 : vector<16x128xf32>
    %273 = arith.mulf %270, %18 : vector<16x128xf32>
    %274 = arith.addf %272, %273 : vector<16x128xf32>
    %275 = arith.mulf %271, %19 : vector<16x128xf32>
    %276 = arith.addf %274, %275 : vector<16x128xf32>
    %277 = arith.truncf %268 : vector<16x128xf32> to vector<16x128xbf16>
    %278 = arith.truncf %276 : vector<16x128xf32> to vector<16x128xbf16>
    %279 = vector.extract_strided_slice %258 {offsets = [0, 256], sizes = [16, 128], strides = [1, 1]} : vector<16x384xf32> to vector<16x128xf32>
    %280 = arith.truncf %279 : vector<16x128xf32> to vector<16x128xbf16>
    %c1_120 = arith.constant 1 : index
    %c0_121 = arith.constant 0 : index
    %c0_122 = arith.constant 0 : index
    %281 = vector.load %arg14[%c1_120, %c0_121, %c0_122] : memref<2x128x128xbf16, #tpu.memory_space<vmem>>, vector<1x128x128xbf16>
    %282 = vector.shape_cast %281 : vector<1x128x128xbf16> to vector<128x128xbf16>
    %cst_123 = arith.constant 0.000000e+00 : f32
    %283 = vector.broadcast %cst_123 : f32 to vector<16x128xf32>
    %284 = vector.extract_strided_slice %277 {offsets = [0, 0], sizes = [16, 32], strides = [1, 1]} : vector<16x128xbf16> to vector<16x32xbf16>
    %285 = vector.extract_strided_slice %278 {offsets = [0, 0], sizes = [16, 32], strides = [1, 1]} : vector<16x128xbf16> to vector<16x32xbf16>
    %cst_124 = arith.constant dense<0.000000e+00> : vector<16x16xf32>
    %286 = tpu.matmul %284, %285, %cst_124 {dimension_numbers = #tpu.dot_dimension_numbers<[1], [1], [0], [0], [0, 0, 1, 0], [], []>} : vector<16x32xbf16>, vector<16x32xbf16>, vector<16x16xf32> -> vector<16x16xf32>
    %287 = arith.addf %286, %20 : vector<16x16xf32>
    %cst_125 = arith.constant dense<0xFF800000> : vector<16xf32>
    %288 = vector.multi_reduction <maximumf>, %287, %cst_125 [1] : vector<16x16xf32> to vector<16xf32>
    %289 = vector.shape_cast %288 : vector<16xf32> to vector<16x1xf32>
    %290 = vector.broadcast %289 : vector<16x1xf32> to vector<16x16xf32>
    %291 = arith.subf %287, %290 : vector<16x16xf32>
    %292 = math.exp %291 : vector<16x16xf32>
    %cst_126 = arith.constant dense<0.000000e+00> : vector<16xf32>
    %293 = vector.multi_reduction <add>, %292, %cst_126 [1] : vector<16x16xf32> to vector<16xf32>
    %294 = vector.shape_cast %293 : vector<16xf32> to vector<16x1xf32>
    %295 = tpu.reciprocal %294 {approx = true} : vector<16x1xf32> -> vector<16x1xf32>
    %296 = vector.broadcast %295 : vector<16x1xf32> to vector<16x16xf32>
    %297 = arith.mulf %292, %296 : vector<16x16xf32>
    %298 = arith.truncf %297 : vector<16x16xf32> to vector<16x16xbf16>
    %299 = vector.extract_strided_slice %280 {offsets = [0, 0], sizes = [16, 32], strides = [1, 1]} : vector<16x128xbf16> to vector<16x32xbf16>
    %cst_127 = arith.constant dense<0.000000e+00> : vector<16x32xf32>
    %300 = tpu.matmul %298, %299, %cst_127 {dimension_numbers = #tpu.dot_dimension_numbers<[1], [0], [0], [1], [0, 0, 1, 1], [], []>} : vector<16x16xbf16>, vector<16x32xbf16>, vector<16x32xf32> -> vector<16x32xf32>
    %301 = arith.truncf %300 : vector<16x32xf32> to vector<16x32xbf16>
    %302 = vector.extract_strided_slice %282 {offsets = [0, 0], sizes = [32, 128], strides = [1, 1]} : vector<128x128xbf16> to vector<32x128xbf16>
    %cst_128 = arith.constant dense<0.000000e+00> : vector<16x128xf32>
    %303 = tpu.matmul %301, %302, %cst_128 {dimension_numbers = #tpu.dot_dimension_numbers<[1], [0], [0], [1], [0, 0, 1, 1], [], []>} : vector<16x32xbf16>, vector<32x128xbf16>, vector<16x128xf32> -> vector<16x128xf32>
    %304 = arith.addf %283, %303 : vector<16x128xf32>
    %305 = vector.extract_strided_slice %277 {offsets = [0, 32], sizes = [16, 32], strides = [1, 1]} : vector<16x128xbf16> to vector<16x32xbf16>
    %306 = vector.extract_strided_slice %278 {offsets = [0, 32], sizes = [16, 32], strides = [1, 1]} : vector<16x128xbf16> to vector<16x32xbf16>
    %cst_129 = arith.constant dense<0.000000e+00> : vector<16x16xf32>
    %307 = tpu.matmul %305, %306, %cst_129 {dimension_numbers = #tpu.dot_dimension_numbers<[1], [1], [0], [0], [0, 0, 1, 0], [], []>} : vector<16x32xbf16>, vector<16x32xbf16>, vector<16x16xf32> -> vector<16x16xf32>
    %308 = arith.addf %307, %20 : vector<16x16xf32>
    %cst_130 = arith.constant dense<0xFF800000> : vector<16xf32>
    %309 = vector.multi_reduction <maximumf>, %308, %cst_130 [1] : vector<16x16xf32> to vector<16xf32>
    %310 = vector.shape_cast %309 : vector<16xf32> to vector<16x1xf32>
    %311 = vector.broadcast %310 : vector<16x1xf32> to vector<16x16xf32>
    %312 = arith.subf %308, %311 : vector<16x16xf32>
    %313 = math.exp %312 : vector<16x16xf32>
    %cst_131 = arith.constant dense<0.000000e+00> : vector<16xf32>
    %314 = vector.multi_reduction <add>, %313, %cst_131 [1] : vector<16x16xf32> to vector<16xf32>
    %315 = vector.shape_cast %314 : vector<16xf32> to vector<16x1xf32>
    %316 = tpu.reciprocal %315 {approx = true} : vector<16x1xf32> -> vector<16x1xf32>
    %317 = vector.broadcast %316 : vector<16x1xf32> to vector<16x16xf32>
    %318 = arith.mulf %313, %317 : vector<16x16xf32>
    %319 = arith.truncf %318 : vector<16x16xf32> to vector<16x16xbf16>
    %320 = vector.extract_strided_slice %280 {offsets = [0, 32], sizes = [16, 32], strides = [1, 1]} : vector<16x128xbf16> to vector<16x32xbf16>
    %cst_132 = arith.constant dense<0.000000e+00> : vector<16x32xf32>
    %321 = tpu.matmul %319, %320, %cst_132 {dimension_numbers = #tpu.dot_dimension_numbers<[1], [0], [0], [1], [0, 0, 1, 1], [], []>} : vector<16x16xbf16>, vector<16x32xbf16>, vector<16x32xf32> -> vector<16x32xf32>
    %322 = arith.truncf %321 : vector<16x32xf32> to vector<16x32xbf16>
    %323 = vector.extract_strided_slice %282 {offsets = [32, 0], sizes = [32, 128], strides = [1, 1]} : vector<128x128xbf16> to vector<32x128xbf16>
    %cst_133 = arith.constant dense<0.000000e+00> : vector<16x128xf32>
    %324 = tpu.matmul %322, %323, %cst_133 {dimension_numbers = #tpu.dot_dimension_numbers<[1], [0], [0], [1], [0, 0, 1, 1], [], []>} : vector<16x32xbf16>, vector<32x128xbf16>, vector<16x128xf32> -> vector<16x128xf32>
    %325 = arith.addf %304, %324 : vector<16x128xf32>
    %326 = vector.extract_strided_slice %277 {offsets = [0, 64], sizes = [16, 32], strides = [1, 1]} : vector<16x128xbf16> to vector<16x32xbf16>
    %327 = vector.extract_strided_slice %278 {offsets = [0, 64], sizes = [16, 32], strides = [1, 1]} : vector<16x128xbf16> to vector<16x32xbf16>
    %cst_134 = arith.constant dense<0.000000e+00> : vector<16x16xf32>
    %328 = tpu.matmul %326, %327, %cst_134 {dimension_numbers = #tpu.dot_dimension_numbers<[1], [1], [0], [0], [0, 0, 1, 0], [], []>} : vector<16x32xbf16>, vector<16x32xbf16>, vector<16x16xf32> -> vector<16x16xf32>
    %329 = arith.addf %328, %20 : vector<16x16xf32>
    %cst_135 = arith.constant dense<0xFF800000> : vector<16xf32>
    %330 = vector.multi_reduction <maximumf>, %329, %cst_135 [1] : vector<16x16xf32> to vector<16xf32>
    %331 = vector.shape_cast %330 : vector<16xf32> to vector<16x1xf32>
    %332 = vector.broadcast %331 : vector<16x1xf32> to vector<16x16xf32>
    %333 = arith.subf %329, %332 : vector<16x16xf32>
    %334 = math.exp %333 : vector<16x16xf32>
    %cst_136 = arith.constant dense<0.000000e+00> : vector<16xf32>
    %335 = vector.multi_reduction <add>, %334, %cst_136 [1] : vector<16x16xf32> to vector<16xf32>
    %336 = vector.shape_cast %335 : vector<16xf32> to vector<16x1xf32>
    %337 = tpu.reciprocal %336 {approx = true} : vector<16x1xf32> -> vector<16x1xf32>
    %338 = vector.broadcast %337 : vector<16x1xf32> to vector<16x16xf32>
    %339 = arith.mulf %334, %338 : vector<16x16xf32>
    %340 = arith.truncf %339 : vector<16x16xf32> to vector<16x16xbf16>
    %341 = vector.extract_strided_slice %280 {offsets = [0, 64], sizes = [16, 32], strides = [1, 1]} : vector<16x128xbf16> to vector<16x32xbf16>
    %cst_137 = arith.constant dense<0.000000e+00> : vector<16x32xf32>
    %342 = tpu.matmul %340, %341, %cst_137 {dimension_numbers = #tpu.dot_dimension_numbers<[1], [0], [0], [1], [0, 0, 1, 1], [], []>} : vector<16x16xbf16>, vector<16x32xbf16>, vector<16x32xf32> -> vector<16x32xf32>
    %343 = arith.truncf %342 : vector<16x32xf32> to vector<16x32xbf16>
    %344 = vector.extract_strided_slice %282 {offsets = [64, 0], sizes = [32, 128], strides = [1, 1]} : vector<128x128xbf16> to vector<32x128xbf16>
    %cst_138 = arith.constant dense<0.000000e+00> : vector<16x128xf32>
    %345 = tpu.matmul %343, %344, %cst_138 {dimension_numbers = #tpu.dot_dimension_numbers<[1], [0], [0], [1], [0, 0, 1, 1], [], []>} : vector<16x32xbf16>, vector<32x128xbf16>, vector<16x128xf32> -> vector<16x128xf32>
    %346 = arith.addf %325, %345 : vector<16x128xf32>
    %347 = vector.extract_strided_slice %277 {offsets = [0, 96], sizes = [16, 32], strides = [1, 1]} : vector<16x128xbf16> to vector<16x32xbf16>
    %348 = vector.extract_strided_slice %278 {offsets = [0, 96], sizes = [16, 32], strides = [1, 1]} : vector<16x128xbf16> to vector<16x32xbf16>
    %cst_139 = arith.constant dense<0.000000e+00> : vector<16x16xf32>
    %349 = tpu.matmul %347, %348, %cst_139 {dimension_numbers = #tpu.dot_dimension_numbers<[1], [1], [0], [0], [0, 0, 1, 0], [], []>} : vector<16x32xbf16>, vector<16x32xbf16>, vector<16x16xf32> -> vector<16x16xf32>
    %350 = arith.addf %349, %20 : vector<16x16xf32>
    %cst_140 = arith.constant dense<0xFF800000> : vector<16xf32>
    %351 = vector.multi_reduction <maximumf>, %350, %cst_140 [1] : vector<16x16xf32> to vector<16xf32>
    %352 = vector.shape_cast %351 : vector<16xf32> to vector<16x1xf32>
    %353 = vector.broadcast %352 : vector<16x1xf32> to vector<16x16xf32>
    %354 = arith.subf %350, %353 : vector<16x16xf32>
    %355 = math.exp %354 : vector<16x16xf32>
    %cst_141 = arith.constant dense<0.000000e+00> : vector<16xf32>
    %356 = vector.multi_reduction <add>, %355, %cst_141 [1] : vector<16x16xf32> to vector<16xf32>
    %357 = vector.shape_cast %356 : vector<16xf32> to vector<16x1xf32>
    %358 = tpu.reciprocal %357 {approx = true} : vector<16x1xf32> -> vector<16x1xf32>
    %359 = vector.broadcast %358 : vector<16x1xf32> to vector<16x16xf32>
    %360 = arith.mulf %355, %359 : vector<16x16xf32>
    %361 = arith.truncf %360 : vector<16x16xf32> to vector<16x16xbf16>
    %362 = vector.extract_strided_slice %280 {offsets = [0, 96], sizes = [16, 32], strides = [1, 1]} : vector<16x128xbf16> to vector<16x32xbf16>
    %cst_142 = arith.constant dense<0.000000e+00> : vector<16x32xf32>
    %363 = tpu.matmul %361, %362, %cst_142 {dimension_numbers = #tpu.dot_dimension_numbers<[1], [0], [0], [1], [0, 0, 1, 1], [], []>} : vector<16x16xbf16>, vector<16x32xbf16>, vector<16x32xf32> -> vector<16x32xf32>
    %364 = arith.truncf %363 : vector<16x32xf32> to vector<16x32xbf16>
    %365 = vector.extract_strided_slice %282 {offsets = [96, 0], sizes = [32, 128], strides = [1, 1]} : vector<128x128xbf16> to vector<32x128xbf16>
    %cst_143 = arith.constant dense<0.000000e+00> : vector<16x128xf32>
    %366 = tpu.matmul %364, %365, %cst_143 {dimension_numbers = #tpu.dot_dimension_numbers<[1], [0], [0], [1], [0, 0, 1, 1], [], []>} : vector<16x32xbf16>, vector<32x128xbf16>, vector<16x128xf32> -> vector<16x128xf32>
    %367 = arith.addf %346, %366 : vector<16x128xf32>
    %368 = arith.addf %224, %367 : vector<16x128xf32>
    %c1_144 = arith.constant 1 : index
    %c0_145 = arith.constant 0 : index
    %c0_146 = arith.constant 0 : index
    %369 = vector.load %arg15[%c1_144, %c0_145, %c0_146] : memref<2x1x128xf32, #tpu.memory_space<vmem>>, vector<1x1x128xf32>
    %370 = vector.shape_cast %369 : vector<1x1x128xf32> to vector<1x128xf32>
    %371 = vector.broadcast %370 : vector<1x128xf32> to vector<16x128xf32>
    %372 = arith.addf %368, %371 : vector<16x128xf32>
    %c1_147 = arith.constant 1 : index
    %c0_148 = arith.constant 0 : index
    %c0_149 = arith.constant 0 : index
    %373 = vector.load %arg16[%c1_147, %c0_148, %c0_149] : memref<2x1x128xf32, #tpu.memory_space<vmem>>, vector<1x1x128xf32>
    %374 = vector.shape_cast %373 : vector<1x1x128xf32> to vector<1x128xf32>
    %c1_150 = arith.constant 1 : index
    %c0_151 = arith.constant 0 : index
    %c0_152 = arith.constant 0 : index
    %375 = vector.load %arg17[%c1_150, %c0_151, %c0_152] : memref<2x1x128xf32, #tpu.memory_space<vmem>>, vector<1x1x128xf32>
    %376 = vector.shape_cast %375 : vector<1x1x128xf32> to vector<1x128xf32>
    %cst_153 = arith.constant dense<0.000000e+00> : vector<16xf32>
    %377 = vector.multi_reduction <add>, %372, %cst_153 [1] : vector<16x128xf32> to vector<16xf32>
    %378 = vector.shape_cast %377 : vector<16xf32> to vector<16x1xf32>
    %cst_154 = arith.constant 1.280000e+02 : f32
    %379 = vector.broadcast %cst_154 : f32 to vector<16x1xf32>
    %380 = arith.divf %378, %379 : vector<16x1xf32>
    %381 = vector.broadcast %380 : vector<16x1xf32> to vector<16x128xf32>
    %382 = arith.subf %372, %381 : vector<16x128xf32>
    %383 = arith.mulf %382, %382 : vector<16x128xf32>
    %cst_155 = arith.constant dense<0.000000e+00> : vector<16xf32>
    %384 = vector.multi_reduction <add>, %383, %cst_155 [1] : vector<16x128xf32> to vector<16xf32>
    %385 = vector.shape_cast %384 : vector<16xf32> to vector<16x1xf32>
    %cst_156 = arith.constant 1.280000e+02 : f32
    %386 = vector.broadcast %cst_156 : f32 to vector<16x1xf32>
    %387 = arith.divf %385, %386 : vector<16x1xf32>
    %388 = vector.broadcast %380 : vector<16x1xf32> to vector<16x128xf32>
    %389 = arith.subf %372, %388 : vector<16x128xf32>
    %cst_157 = arith.constant 9.99999974E-6 : f32
    %390 = vector.broadcast %cst_157 : f32 to vector<16x1xf32>
    %391 = arith.addf %387, %390 : vector<16x1xf32>
    %392 = math.rsqrt %391 : vector<16x1xf32>
    %393 = vector.broadcast %392 : vector<16x1xf32> to vector<16x128xf32>
    %394 = arith.mulf %389, %393 : vector<16x128xf32>
    %395 = vector.broadcast %374 : vector<1x128xf32> to vector<16x128xf32>
    %396 = arith.mulf %394, %395 : vector<16x128xf32>
    %397 = vector.broadcast %376 : vector<1x128xf32> to vector<16x128xf32>
    %398 = arith.addf %396, %397 : vector<16x128xf32>
    %399 = arith.truncf %398 : vector<16x128xf32> to vector<16x128xbf16>
    %c1_158 = arith.constant 1 : index
    %c0_159 = arith.constant 0 : index
    %c0_160 = arith.constant 0 : index
    %400 = vector.load %arg18[%c1_158, %c0_159, %c0_160] : memref<2x128x256xbf16, #tpu.memory_space<vmem>>, vector<1x128x256xbf16>
    %401 = vector.shape_cast %400 : vector<1x128x256xbf16> to vector<128x256xbf16>
    %cst_161 = arith.constant dense<0.000000e+00> : vector<16x256xf32>
    %402 = tpu.matmul %399, %401, %cst_161 {dimension_numbers = #tpu.dot_dimension_numbers<[1], [0], [0], [1], [0, 0, 1, 1], [], []>} : vector<16x128xbf16>, vector<128x256xbf16>, vector<16x256xf32> -> vector<16x256xf32>
    %c1_162 = arith.constant 1 : index
    %c0_163 = arith.constant 0 : index
    %c0_164 = arith.constant 0 : index
    %403 = vector.load %arg19[%c1_162, %c0_163, %c0_164] : memref<2x1x256xf32, #tpu.memory_space<vmem>>, vector<1x1x256xf32>
    %404 = vector.shape_cast %403 : vector<1x1x256xf32> to vector<1x256xf32>
    %405 = vector.broadcast %404 : vector<1x256xf32> to vector<16x256xf32>
    %406 = arith.addf %402, %405 : vector<16x256xf32>
    %407 = arith.mulf %406, %406 : vector<16x256xf32>
    %408 = arith.mulf %406, %407 : vector<16x256xf32>
    %cst_165 = arith.constant 4.471500e-02 : f32
    %409 = vector.broadcast %cst_165 : f32 to vector<16x256xf32>
    %410 = arith.mulf %409, %408 : vector<16x256xf32>
    %411 = arith.addf %406, %410 : vector<16x256xf32>
    %cst_166 = arith.constant 0.797884583 : f32
    %412 = vector.broadcast %cst_166 : f32 to vector<16x256xf32>
    %413 = arith.mulf %412, %411 : vector<16x256xf32>
    %414 = math.tanh %413 : vector<16x256xf32>
    %cst_167 = arith.constant 1.000000e+00 : f32
    %415 = vector.broadcast %cst_167 : f32 to vector<16x256xf32>
    %416 = arith.addf %415, %414 : vector<16x256xf32>
    %cst_168 = arith.constant 5.000000e-01 : f32
    %417 = vector.broadcast %cst_168 : f32 to vector<16x256xf32>
    %418 = arith.mulf %417, %416 : vector<16x256xf32>
    %419 = arith.mulf %406, %418 : vector<16x256xf32>
    %420 = arith.truncf %419 : vector<16x256xf32> to vector<16x256xbf16>
    %c1_169 = arith.constant 1 : index
    %c0_170 = arith.constant 0 : index
    %c0_171 = arith.constant 0 : index
    %421 = vector.load %arg20[%c1_169, %c0_170, %c0_171] : memref<2x256x128xbf16, #tpu.memory_space<vmem>>, vector<1x256x128xbf16>
    %422 = vector.shape_cast %421 : vector<1x256x128xbf16> to vector<256x128xbf16>
    %cst_172 = arith.constant dense<0.000000e+00> : vector<16x128xf32>
    %423 = tpu.matmul %420, %422, %cst_172 {dimension_numbers = #tpu.dot_dimension_numbers<[1], [0], [0], [1], [0, 0, 1, 1], [], []>} : vector<16x256xbf16>, vector<256x128xbf16>, vector<16x128xf32> -> vector<16x128xf32>
    %c1_173 = arith.constant 1 : index
    %c0_174 = arith.constant 0 : index
    %c0_175 = arith.constant 0 : index
    %424 = vector.load %arg21[%c1_173, %c0_174, %c0_175] : memref<2x1x128xf32, #tpu.memory_space<vmem>>, vector<1x1x128xf32>
    %425 = vector.shape_cast %424 : vector<1x1x128xf32> to vector<1x128xf32>
    %426 = vector.broadcast %425 : vector<1x128xf32> to vector<16x128xf32>
    %427 = arith.addf %423, %426 : vector<16x128xf32>
    %428 = arith.addf %372, %427 : vector<16x128xf32>
    %c0_176 = arith.constant 0 : index
    %c0_177 = arith.constant 0 : index
    %429 = vector.load %arg22[%c0_176, %c0_177] : memref<1x128xf32, #tpu.memory_space<vmem>>, vector<1x128xf32>
    %c0_178 = arith.constant 0 : index
    %c0_179 = arith.constant 0 : index
    %430 = vector.load %arg23[%c0_178, %c0_179] : memref<1x128xf32, #tpu.memory_space<vmem>>, vector<1x128xf32>
    %cst_180 = arith.constant dense<0.000000e+00> : vector<16xf32>
    %431 = vector.multi_reduction <add>, %428, %cst_180 [1] : vector<16x128xf32> to vector<16xf32>
    %432 = vector.shape_cast %431 : vector<16xf32> to vector<16x1xf32>
    %cst_181 = arith.constant 1.280000e+02 : f32
    %433 = vector.broadcast %cst_181 : f32 to vector<16x1xf32>
    %434 = arith.divf %432, %433 : vector<16x1xf32>
    %435 = vector.broadcast %434 : vector<16x1xf32> to vector<16x128xf32>
    %436 = arith.subf %428, %435 : vector<16x128xf32>
    %437 = arith.mulf %436, %436 : vector<16x128xf32>
    %cst_182 = arith.constant dense<0.000000e+00> : vector<16xf32>
    %438 = vector.multi_reduction <add>, %437, %cst_182 [1] : vector<16x128xf32> to vector<16xf32>
    %439 = vector.shape_cast %438 : vector<16xf32> to vector<16x1xf32>
    %cst_183 = arith.constant 1.280000e+02 : f32
    %440 = vector.broadcast %cst_183 : f32 to vector<16x1xf32>
    %441 = arith.divf %439, %440 : vector<16x1xf32>
    %442 = vector.broadcast %434 : vector<16x1xf32> to vector<16x128xf32>
    %443 = arith.subf %428, %442 : vector<16x128xf32>
    %cst_184 = arith.constant 9.99999974E-6 : f32
    %444 = vector.broadcast %cst_184 : f32 to vector<16x1xf32>
    %445 = arith.addf %441, %444 : vector<16x1xf32>
    %446 = math.rsqrt %445 : vector<16x1xf32>
    %447 = vector.broadcast %446 : vector<16x1xf32> to vector<16x128xf32>
    %448 = arith.mulf %443, %447 : vector<16x128xf32>
    %449 = vector.broadcast %429 : vector<1x128xf32> to vector<16x128xf32>
    %450 = arith.mulf %448, %449 : vector<16x128xf32>
    %451 = vector.broadcast %430 : vector<1x128xf32> to vector<16x128xf32>
    %452 = arith.addf %450, %451 : vector<16x128xf32>
    %c0_185 = arith.constant 0 : index
    %c0_186 = arith.constant 0 : index
    %453 = vector.load %arg24[%c0_185, %c0_186] : memref<16x128xf32, #tpu.memory_space<vmem>>, vector<16x128xf32>
    tpu.vector_store %arg24[%c0_185, %c0_186], %452 {strides = array<i32>} : memref<16x128xf32, #tpu.memory_space<vmem>>, vector<16x128xf32>,
    return
  }
}

</mosaic_0001>

<bundles_post_ra>
// kernel: tile.24
= control target key start
LH: loop header
LB: loop body
LE: loop exit
PB: predicated region body
PF: predicated region fallthrough
CT: control target
= control target key end

     0   :  { %vm82_vm0 = vcmask 1047556   ;;  %vm84_vm1 = vcmask 261120   ;;  %s195_s9 = smov 96   ;;  %s196_s14 = smov 32   ;;  %vm103_vm2 = vcmask 1048320   ;;  %vm124_vm3 = vcmask 785920   ;;  %s289_s0 = inlined_call_operand.vmem [shape: f32[2,1,8,4,32], index: 0, kind: input, shape index: {}]   ;;  %s290_s1 = inlined_call_operand.vmem [shape: f32[16,128], index: 1, kind: output, shape index: {}]  }
   0x1   :  { %v180_v0 = vld [vmem:[%s289_s0 + $0x1c] sm:$0xf]  ;;  %v181_v1 = vld [vmem:[%s289_s0 + $0x18] sm:$0xf]  ;;  %v182_v2 = vld [vmem:[%s289_s0 + $0x14] sm:$0xf] }
   0x2   :  { %48 = vst [vmem:[#allocation0 + $0x38] sm:$0xf] %v180_v0  ;;  %53 = vst [vmem:[#allocation0 + $0x30] sm:$0xf] %v181_v1  ;;  %v183_v3 = vld [vmem:[%s289_s0 + $0x10] sm:$0xf] }
   0x3   :  { %58 = vst [vmem:[#allocation0 + $0x28] sm:$0xf] %v182_v2  ;;  %v184_v4 = vld [vmem:[%s289_s0 + $0xc] sm:$0xf]  ;;  %v185_v5 = vld [vmem:[%s289_s0 + $0x8] sm:$0xf] }
   0x4   :  { %63 = vst [vmem:[#allocation0 + $0x20] sm:$0xf] %v183_v3  ;;  %68 = vst [vmem:[#allocation0 + $0x18] sm:$0xf] %v184_v4  ;;  %v186_v6 = vld [vmem:[%s289_s0 + $0x4] sm:$0xf] }
   0x5   :  { %73 = vst [vmem:[#allocation0 + $0x10] sm:$0xf] %v185_v5  ;;  %v78_v7 = vld [vmem:[%s289_s0] sm:$0xf]  ;;  %77 = vst [vmem:[#allocation0 + $0x8] sm:$0xf] %v186_v6 }
   0x6   :  { %79 = vst [vmem:[#allocation0] sm:$0xf] %v78_v7  ;;  %v172_v8 = vld [vmem:[%s289_s0 + $0x3c] sm:$0xf]  ;;  %v173_v9 = vld [vmem:[%s289_s0 + $0x38] sm:$0xf] }
   0x7   :  { %8 = vst [vmem:[#allocation0 + $0x78] sm:$0xf] %v172_v8  ;;  %13 = vst [vmem:[#allocation0 + $0x70] sm:$0xf] %v173_v9  ;;  %v174_v10 = vld [vmem:[%s289_s0 + $0x34] sm:$0xf] }
   0x8   :  { %v175_v11 = vld [vmem:[%s289_s0 + $0x30] sm:$0xf]  ;;  %v176_v12 = vld [vmem:[%s289_s0 + $0x2c] sm:$0xf]  ;;  %18 = vst [vmem:[#allocation0 + $0x68] sm:$0xf] %v174_v10 }
   0x9   :  { %23 = vst [vmem:[#allocation0 + $0x60] sm:$0xf] %v175_v11  ;;  %28 = vst [vmem:[#allocation0 + $0x58] sm:$0xf] %v176_v12  ;;  %v177_v13 = vld [vmem:[%s289_s0 + $0x28] sm:$0xf] }
   0xa   :  { %v178_v14 = vld [vmem:[%s289_s0 + $0x24] sm:$0xf]  ;;  %v179_v15 = vld [vmem:[%s289_s0 + $0x20] sm:$0xf]  ;;  %33 = vst [vmem:[#allocation0 + $0x50] sm:$0xf] %v177_v13 }
   0xb   :  { %38 = vst [vmem:[#allocation0 + $0x48] sm:$0xf] %v178_v14  ;;  %43 = vst [vmem:[#allocation0 + $0x40] sm:$0xf] %v179_v15  ;;  %s194_s0 = smov 64   ;;  %vm145_vm4 = vcmask 523520  }
   0xc   :  { %v119_v16 = vld [vmem:[#allocation0 + $0x2] ss:$8 sm:$0xf0]   ;;  %v98_v17 = vld [vmem:[#allocation0 + $0x3] ss:$8 sm:$0xf0]  }
   0xd   :  { %v117_v18 = vld [vmem:[#allocation0 + $0x2] ss:$8 sm:$0xf]   ;;  %v96_v19 = vld [vmem:[#allocation0 + $0x3] ss:$8 sm:$0xf]  }
   0xe   :  { %v121_v20 = vsel %vm82_vm0, %v119_v16, %v117_v18  ;;  %v100_v21 = vsel %vm82_vm0, %v98_v17, %v96_v19  ;;  %v138_v24 = vld [vmem:[#allocation0 + $0x1] ss:$8 sm:$0xf]   ;;  %v80_v32 = vld [vmem:[#allocation0] ss:$8 sm:$0xf]  }
   0xf   :  { %122 = vrot.lane.b32.xlu1 %v121_v20, %s194_s0  ;;  %101 = vrot.lane.b32.xlu0 %v100_v21, %s195_s9  ;;  %v140_v25 = vld [vmem:[#allocation0 + $0x1] ss:$8 sm:$0xf0]   ;;  %v81_v33 = vld [vmem:[#allocation0] ss:$8 sm:$0xf0]  }
  0x10   :  { %v129_v22 = vld [vmem:[#allocation0 + $0x42] ss:$8 sm:$0xf0]   ;;  %v108_v23 = vld [vmem:[#allocation0 + $0x43] ss:$8 sm:$0xf0]   ;;  %v83_v34 = vsel %vm82_vm0, %v81_v33, %v80_v32  ;;  %v142_v38 = vsel %vm82_vm0, %v140_v25, %v138_v24 }
  0x11   :  { %v150_v31 = vld [vmem:[#allocation0 + $0x41] ss:$8 sm:$0xf0]   ;;  %v89_v36 = vld [vmem:[#allocation0 + $0x40] ss:$8 sm:$0xf0]  }
  0x12   :  { %v127_v26 = vld [vmem:[#allocation0 + $0x42] ss:$8 sm:$0xf]   ;;  %v106_v27 = vld [vmem:[#allocation0 + $0x43] ss:$8 sm:$0xf]  }
  0x13   :  { %v131_v28 = vsel %vm82_vm0, %v129_v22, %v127_v26  ;;  %v110_v29 = vsel %vm82_vm0, %v108_v23, %v106_v27  ;;  %v148_v30 = vld [vmem:[#allocation0 + $0x41] ss:$8 sm:$0xf]   ;;  %v87_v35 = vld [vmem:[#allocation0 + $0x40] ss:$8 sm:$0xf]  }
  0x14   :  { %132 = vrot.lane.b32.xlu1 %v131_v28, %s194_s0  ;;  %111 = vrot.lane.b32.xlu0 %v110_v29, %s195_s9  ;;  %v152_v37 = vsel %vm82_vm0, %v150_v31, %v148_v30  ;;  %85 = vst.msk [vmem:[%s290_s1] sm:$0xff] %vm84_vm1, %v83_v34   ;;  %v91_v39 = vsel %vm82_vm0, %v89_v36, %v87_v35 }
  0x15   :  { %187 = vst.msk [vmem:[%s290_s1 + $0x8] sm:$0xff] %vm84_vm1, %v91_v39  }
  0x18   :  { %153 = vrot.lane.b32.xlu1 %v152_v37, %s196_s14  ;;  %143 = vrot.lane.b32.xlu0 %v142_v38, %s196_s14 }
  0x81   :  { %v123_v40 = vpop.permute.xlu1 %122   ;;  %v102_v41 = vpop.permute.xlu0 %101  }
  0x82   :  { %104 = vst.msk [vmem:[%s290_s1] sm:$0xff] %vm103_vm2, %v102_v41  }
  0x83   :  { %125 = vst.msk [vmem:[%s290_s1] sm:$0xff] %vm124_vm3, %v123_v40  }
  0x86   :  { %v133_v42 = vpop.permute.xlu1 %132   ;;  %v112_v43 = vpop.permute.xlu0 %111  }
  0x87   :  { %188 = vst.msk [vmem:[%s290_s1 + $0x8] sm:$0xff] %vm103_vm2, %v112_v43  }
  0x88   :  { %189 = vst.msk [vmem:[%s290_s1 + $0x8] sm:$0xff] %vm124_vm3, %v133_v42  }
  0x8a   :  { %v154_v44 = vpop.permute.xlu1 %153   ;;  %v144_v45 = vpop.permute.xlu0 %143  }
  0x8b   :  { %190 = vst.msk [vmem:[%s290_s1 + $0x8] sm:$0xff] %vm145_vm4, %v154_v44   ;;  %146 = vst.msk [vmem:[%s290_s1] sm:$0xff] %vm145_vm4, %v144_v45  }

// kernel: neural_encoder_forward.1
= control target key start
LH: loop header
LB: loop body
LE: loop exit
PB: predicated region body
PF: predicated region fallthrough
CT: control target
= control target key end

     0   :  { %s5209_s0 = inlined_call_operand.vmem [shape: f32[16,16], index: 0, kind: input, shape index: {}]   ;;  %s5210_s1 = inlined_call_operand.vmem [shape: f32[16,16], index: 1, kind: input, shape index: {}]   ;;  %s5211_s2 = inlined_call_operand.vmem [shape: f32[16,128], index: 2, kind: input, shape index: {}]   ;;  %s5212_s3 = inlined_call_operand.vmem [shape: f32[16,128], index: 3, kind: input, shape index: {}]   ;;  %s5213_s4 = inlined_call_operand.vmem [shape: f32[16,128], index: 4, kind: input, shape index: {}]   ;;  %s5214_s5 = inlined_call_operand.vmem [shape: f32[16,128], index: 5, kind: input, shape index: {}]   ;;  %s5215_s6 = inlined_call_operand.vmem [shape: bf16[16,32], index: 6, kind: input, shape index: {}]   ;;  %s5216_s7 = inlined_call_operand.vmem [shape: f32[1,32], index: 7, kind: input, shape index: {}]   ;;  %s5217_s8 = inlined_call_operand.vmem [shape: bf16[32,128], index: 8, kind: input, shape index: {}]   ;;  %s5218_s9 = inlined_call_operand.vmem [shape: f32[1,128], index: 9, kind: input, shape index: {}]   ;;  %s5219_s10 = inlined_call_operand.vmem [shape: f32[2,1,128], index: 10, kind: input, shape index: {}]   ;;  %s5220_s11 = inlined_call_operand.vmem [shape: f32[2,1,128], index: 11, kind: input, shape index: {}]   ;;  %s5221_s12 = inlined_call_operand.vmem [shape: bf16[2,128,384], index: 12, kind: input, shape index: {}]   ;;  %s5222_s13 = inlined_call_operand.vmem [shape: f32[2,1,384], index: 13, kind: input, shape index: {}]   ;;  %s5223_s14 = inlined_call_operand.hbm [shape: bf16[2,128,128], index: 14, kind: input, shape index: {}]   ;;  %s5224_s15 = inlined_call_operand.vmem [shape: f32[2,1,128], index: 15, kind: input, shape index: {}]   ;;  %s5225_s16 = inlined_call_operand.vmem [shape: f32[2,1,128], index: 16, kind: input, shape index: {}]   ;;  %s5226_s17 = inlined_call_operand.vmem [shape: f32[2,1,128], index: 17, kind: input, shape index: {}]   ;;  %s5227_s18 = inlined_call_operand.vmem [shape: bf16[2,128,256], index: 18, kind: input, shape index: {}]   ;;  %s5228_s19 = inlined_call_operand.vmem [shape: f32[2,1,256], index: 19, kind: input, shape index: {}]   ;;  %s5229_s20 = inlined_call_operand.vmem [shape: bf16[2,256,128], index: 20, kind: input, shape index: {}]   ;;  %s5230_s21 = inlined_call_operand.vmem [shape: f32[2,1,128], index: 21, kind: input, shape index: {}]   ;;  %s5231_s22 = inlined_call_operand.vmem [shape: f32[1,128], index: 22, kind: input, shape index: {}]   ;;  %s5232_s23 = inlined_call_operand.vmem [shape: f32[1,128], index: 23, kind: input, shape index: {}]   ;;  %s5233_s24 = inlined_call_operand.hbm [shape: f32[16,128], index: 24, kind: output, shape index: {}]  }
   0x1   :  { %5245 = sst [smem:[#allocation8_spill]] %s5209_s0 }
   0x2   :  { %5246 = sst [smem:[#allocation9_spill]] %s5210_s1 }
   0x3   :  { %5247 = sst [smem:[#allocation10_spill]] %s5211_s2 }
   0x4   :  { %5248 = sst [smem:[#allocation11_spill]] %s5212_s3 }
   0x5   :  { %5249 = sst [smem:[#allocation12_spill]] %s5213_s4 }
   0x6   :  { %5250 = sst [smem:[#allocation13_spill]] %s5214_s5 }
   0x7   :  { %5251 = sst [smem:[#allocation14_spill]] %s5215_s6 }
   0x8   :  { %5252 = sst [smem:[#allocation15_spill]] %s5216_s7 }
   0x9   :  { %5253 = sst [smem:[#allocation16_spill]] %s5217_s8 }
   0xa   :  { %29 = vsyncpa [#allocation3], 0 }
   0xb   :  { %30 = vsyncpa [#allocation4], 0  ;;  %s4221_s5 = smov [#allocation2]   ;;  %s4173_s6 = scalar_lea.hbm %s5223_s14, 2048 }
   0xc   :  { %s64_s26 = sshll.u32 %s4221_s5, 4  ;;  %p4174_p0 = scmp.ne.s32.totalorder %s5223_s14, %s4173_s6  ;;  %s65_s26 = int_to_ptr.vmem [resolvable:$true] %s64_s26 }
   0xd   :  { %p4177_p1 = scmp.lt.u32.totalorder %s4173_s6, %s5223_s14 }
   0xf   :  { %p4179_p2 = pnand %p4177_p1, %p4174_p0 }
  0x11   :  { %4182 = shalt.err (!%p4179_p2)
}
  0x12   :  { %s4183_s30 = scalar_lea.vmem %s65_s26, 2048  ;;  %p4188_p4 = scmp.lt.s32.totalorder %s65_s26, %s65_s26 }
  0x13   :  { %p4184_p3 = scmp.ne.s32.totalorder %s65_s26, %s4183_s30  ;;  %p4189_p5 = scmp.lt.s32.totalorder %s4183_s30, %s4183_s30 }
  0x15   :  { %p4190_p6 = por %p4189_p5, %p4188_p4 }
  0x17   :  { %p4191_p7 = pnand %p4190_p6, %p4184_p3 }
  0x19   :  { %4194 = shalt.err (!%p4191_p7)
}
  0x1a   :  { %s5243_s3 = smov 64   ;;  %s4223_s25 = smov 4  }
  0x1b   :  { %70 = dma.hbm_to_vmem [thread:$0]  %s5223_s14, 2048, %s65_s26, [#allocation3], %s5243_s3, %s5243_s3, %s4223_s25  }
  0x1c   :  { %4217 = dma.done.wait [#allocation3], 2048  }
  0x1d   :  { %4218 = vsyncadd [#allocation3], 4294965248  ;;  %v4224_v0 = vmov 0.0   ;;  %vm4225_vm0 = vmmov 0   ;;  %s5254_s27 = sld [smem:[#allocation14_spill]]  ;;  %s5255_s26 = sld [smem:[#allocation8_spill]] }
  0x1e   :  { %3675 = vmatprep.subr.bf16.mxu0 %v4224_v0  ;;  %3677 = vmatprep.mubr.msk.bf16.mxu0 %vm4225_vm0, %v4224_v0  ;;  %vm111_vm1 = vcmask 130048   ;;  %s5256_s7 = sld [smem:[#allocation16_spill]]  ;;  %s5257_s1 = sld [smem:[#allocation15_spill]]  ;;  %vm182_vm2 = vcmask 261120   ;;  %v3294_v17 = vld [vmem:[%s5218_s9] ss:$0 sm:$0xff] }
  0x1f   :  { %3681 = vmatprep.subr.bf16.mxu1 %v4224_v0  ;;  %3685 = vmatprep.mubr.msk.bf16.mxu1 %vm4225_vm0, %v4224_v0  ;;  %v3905_v28 = vld [vmem:[%s5221_s12] ss:$12 sps:$4 sm:$0xff]   ;;  %v3907_v29 = vld [vmem:[%s5221_s12 + $0x4] ss:$12 sps:$4 sm:$0xff]   ;;  %v3908_v30 = vld [vmem:[%s5221_s12 + $0x8] ss:$12 sps:$4 sm:$0xff]  }
  0x20   :  { %v3911_v31 = vld [vmem:[%s5221_s12 + $0x1c] ss:$12 sps:$4 sm:$0xff]   ;;  %v3909_v32 = vld [vmem:[%s5221_s12 + $0x18] ss:$12 sps:$4 sm:$0xff]   ;;  %v3912_v41 = vld [vmem:[%s5221_s12 + $0x20] ss:$12 sps:$4 sm:$0xff]  }
  0x21   :  { %v3915_v42 = vld [vmem:[%s5221_s12 + $0x34] ss:$12 sps:$4 sm:$0xff]   ;;  %v3913_v43 = vld [vmem:[%s5221_s12 + $0x30] ss:$12 sps:$4 sm:$0xff]   ;;  %v3916_v44 = vld [vmem:[%s5221_s12 + $0x38] ss:$12 sps:$4 sm:$0xff]  }
  0x22   :  { %v3919_v45 = vld [vmem:[%s5221_s12 + $0x4c] ss:$12 sps:$4 sm:$0xff]   ;;  %v3917_v46 = vld [vmem:[%s5221_s12 + $0x48] ss:$12 sps:$4 sm:$0xff]   ;;  %v3920_v47 = vld [vmem:[%s5221_s12 + $0x50] ss:$12 sps:$4 sm:$0xff]  }
  0x23   :  { %v3902_v1 = vld [vmem:[%s5254_s27] sm:$0xff]   ;;  %v94_v3 = vld [vmem:[%s5255_s26 + $0x8] sm:$0xff]  ;;  %v3929_v55 = vld [vmem:[%s5221_s12 + $0x90] ss:$12 sps:$4 sm:$0xff]   ;;  %v4226_v60 = vmov 0   ;;  %s4227_s8 = smov 16  }
  0x24   :  { %v93_v2 = vld [vmem:[%s5255_s26] sm:$0xff]  ;;  %3676 = vmatpush3.bf16.msra.mxu0 %v3902_v1  ;;  %v3904_v6 = vld [vmem:[%s5256_s7 + $0x8] sm:$0xff]   ;;  %s5258_s26 = sld [smem:[#allocation10_spill]]  ;;  %v3936_v59 = vld [vmem:[%s5221_s12 + $0xb0] ss:$12 sps:$4 sm:$0xff]   ;;  %s4228_s4 = smov 112  }
  0x25   :  { %v95_v4 = vpack.c.bf16 %v94_v3, %v93_v2  ;;  %v3903_v5 = vld [vmem:[%s5256_s7] sm:$0xff]   ;;  %458 = vmatprep.subr.bf16.mxu0 %v3907_v29  ;;  %v3924_v50 = vld [vmem:[%s5221_s12 + $0x68] ss:$12 sps:$4 sm:$0xff]   ;;  %v3935_v57 = vld [vmem:[%s5221_s12 + $0xac] ss:$12 sps:$4 sm:$0xff]   ;;  %s5259_s27 = sld [smem:[#allocation12_spill]] }
  0x26   :  { %3682 = vmatpush3.bf16.msra.mxu1 %v3903_v5  ;;  %v3291_v7 = vld [vmem:[%s5257_s1] ss:$0 sm:$0xff]  ;;  %v3923_v48 = vld [vmem:[%s5221_s12 + $0x64] ss:$12 sps:$4 sm:$0xff]   ;;  %v3927_v51 = vld [vmem:[%s5221_s12 + $0x7c] ss:$12 sps:$4 sm:$0xff]  }
  0x27   :  { %3678 = vmatmul.mubr.msk.bf16.vlgmr.msra.gmra.mrb[0].mxu0 %vm111_vm1, %v95_v4  ;;  %3683 = vmatprep.subr.bf16.mxu1 %v4224_v0  ;;  %v3921_v49 = vld [vmem:[%s5221_s12 + $0x60] ss:$12 sps:$4 sm:$0xff]   ;;  %v3925_v52 = vld [vmem:[%s5221_s12 + $0x78] ss:$12 sps:$4 sm:$0xff]   ;;  %v3933_v58 = vld [vmem:[%s5221_s12 + $0xa8] ss:$12 sps:$4 sm:$0xff]  }
  0x28   :  { %459 = vmatpush1.bf16.msra.mxu0 %v3905_v28  ;;  %v3928_v53 = vld [vmem:[%s5221_s12 + $0x80] ss:$12 sps:$4 sm:$0xff]   ;;  %v3932_v56 = vld [vmem:[%s5221_s12 + $0x98] ss:$12 sps:$4 sm:$0xff]   ;;  %490 = vmatprep.mubr.bf16.mxu0 %v4226_v60  ;;  %s5261_s30 = sld [smem:[#allocation13_spill]]  ;;  %s4229_s5 = smov 96  }
  0x29   :  { %460 = vmatprep.subr.bf16.mxu0 %v3911_v31  ;;  %v3931_v54 = vld [vmem:[%s5221_s12 + $0x94] ss:$12 sps:$4 sm:$0xff]   ;;  %s5262_s6 = sld [smem:[#allocation9_spill]]  ;;  %s5241_s29 = smov 32  }
  0x2a   :  { %3684 = vmatpush3.bf16.msra.mxu1 %v3904_v6  ;;  %v227_v19 = vld [vmem:[%s5258_s26] sm:$0xff]  ;;  %v228_v26 = vld [vmem:[%s5258_s26 + $0x8] sm:$0xff]  ;;  %s5260_s26 = sld [smem:[#allocation11_spill]] }
  0x2b   :  { %3689 = vmatprep.subr.bf16.mxu1 %v4224_v0  ;;  %v3298_v6 = vld [vmem:[%s5219_s10] ss:$0 sm:$0xff] }
  0x2c   :  { %461 = vmatpush1.bf16.msra.mxu0 %v3909_v32 }
  0x2d   :  { %462 = vmatprep.subr.bf16.mxu0 %v3915_v42  ;;  %v233_v42 = vld [vmem:[%s5259_s27] sm:$0xff] }
  0x30   :  { %463 = vmatpush1.bf16.msra.mxu0 %v3913_v43 }
  0x31   :  { %464 = vmatprep.subr.bf16.mxu0 %v3919_v45  ;;  %v234_v45 = vld [vmem:[%s5259_s27 + $0x8] sm:$0xff] }
  0x34   :  { %465 = vmatpush1.bf16.msra.mxu0 %v3917_v46 }
  0x35   :  { %466 = vmatprep.subr.bf16.mxu0 %v3923_v48 }
  0x38   :  { %467 = vmatpush1.bf16.msra.mxu0 %v3921_v49 }
  0x39   :  { %468 = vmatprep.subr.bf16.mxu0 %v3927_v51 }
  0x3c   :  { %469 = vmatpush1.bf16.msra.mxu0 %v3925_v52  ;;  %v235_v52 = vld [vmem:[%s5261_s30] sm:$0xff] }
  0x3d   :  { %470 = vmatprep.subr.bf16.mxu0 %v3931_v54 }
  0x40   :  { %471 = vmatpush1.bf16.msra.mxu0 %v3929_v55 }
  0x41   :  { %472 = vmatprep.subr.bf16.mxu0 %v3935_v57 }
  0x44   :  { %473 = vmatpush1.bf16.msra.mxu0 %v3933_v58 }
  0x45   :  { %3709 = vmatprep.subr.bf16.mxu0 %v4224_v0 }
  0xfa   :  { %v149_v8 = vpop.f32.mrb[0].mxu0 }
  0xfb   :  { %v150_v9 = vadd.f32 %v3291_v7, %v149_v8  ;;  %v3679_v10 = vpop.f32.mrb[1].mxu0 }
  0xfc   :  { %v152_v11 = vpop.f32.mrb[2].mxu0  ;;  %v3299_v10 = vld [vmem:[%s5220_s11] ss:$0 sm:$0xff] }
  0xfd   :  { %v153_v12 = vadd.f32 %v3291_v7, %v152_v11  ;;  %v3680_v13 = vpop.f32.mrb[3].mxu0  ;;  %v156_v14 = vmax.f32 %v150_v9, 0.0 }
  0xff   :  { %v157_v15 = vmax.f32 %v153_v12, 0.0 }
 0x101   :  { %v158_v16 = vpack.c.bf16 %v157_v15, %v156_v14  ;;  %v315_v15 = vlaneseq }
 0x103   :  { %3686 = vmatmul.mubr.msk.bf16.vlgmr.msra.gmra.mrb[0].mxu1 %vm182_vm2, %v158_v16  ;;  %v4522_v16 = vshrl.u32 %v315_v15, 7 }
 0x104   :  { %3705 = vmatprep.mubr.msk.bf16.mxu1 %vm4225_vm0, %v4224_v0  ;;  %3690 = vmatpush3.bf16.msra.mxu1 %v3908_v30 }
 0x105   :  { %3691 = vmatprep.subr.bf16.mxu1 %v4224_v0 }
 0x108   :  { %3692 = vmatpush3.bf16.msra.mxu1 %v3912_v41 }
 0x109   :  { %3693 = vmatprep.subr.bf16.mxu1 %v4224_v0 }
 0x10c   :  { %3694 = vmatpush3.bf16.msra.mxu1 %v3916_v44  ;;  %v231_v44 = vld [vmem:[%s5260_s26] sm:$0xff] }
 0x10d   :  { %3695 = vmatprep.subr.bf16.mxu1 %v4224_v0 }
 0x110   :  { %3696 = vmatpush3.bf16.msra.mxu1 %v3920_v47  ;;  %v232_v47 = vld [vmem:[%s5260_s26 + $0x8] sm:$0xff] }
 0x111   :  { %3697 = vmatprep.subr.bf16.mxu1 %v4224_v0 }
 0x114   :  { %3698 = vmatpush3.bf16.msra.mxu1 %v3924_v50 }
 0x115   :  { %3699 = vmatprep.subr.bf16.mxu1 %v4224_v0 }
 0x118   :  { %3700 = vmatpush3.bf16.msra.mxu1 %v3928_v53  ;;  %v236_v53 = vld [vmem:[%s5261_s30 + $0x8] sm:$0xff] }
 0x119   :  { %3701 = vmatprep.subr.bf16.mxu1 %v4224_v0 }
 0x11c   :  { %3702 = vmatpush3.bf16.msra.mxu1 %v3932_v56 }
 0x11d   :  { %3703 = vmatprep.subr.bf16.mxu1 %v4224_v0 }
 0x120   :  { %3704 = vmatpush3.bf16.msra.mxu1 %v3936_v59 }
 0x121   :  { %3715 = vmatprep.subr.bf16.mxu1 %v4224_v0 }
 0x1d6   :  { %v220_v18 = vpop.f32.mrb[0].mxu1 }
 0x1d7   :  { %v221_v20 = vadd.f32 %v3294_v17, %v220_v18  ;;  %v3687_v21 = vpop.f32.mrb[1].mxu1  ;;  %v313_v18 = vld [vmem:[%s5222_s13] sm:$0x7] }
 0x1d8   :  { %v223_v22 = vpop.f32.mrb[2].mxu1 }
 0x1d9   :  { %v4409_v23 = vadd.f32 %v227_v19, %v221_v20  ;;  %v224_v24 = vadd.f32 %v3294_v17, %v223_v22  ;;  %v3688_v25 = vpop.f32.mrb[3].mxu1  ;;  %v4525_v17 = vsub.s32 1, %v4522_v16  ;;  %v325_v19 = vsub.s32 2, %v4522_v16 }
 0x1da   :  { %v4532_v20 = vsub.s32 0, %v4522_v16 }
 0x1db   :  { %241 = vadd.xlane.f32.xlu0 %v4409_v23  ;;  %v4415_v27 = vadd.f32 %v228_v26, %v224_v24  ;;  %v322_v21 = vrot.slane %v313_v18, %v4525_v17  ;;  %v326_v22 = vrot.slane %v313_v18, %v325_v19 }
 0x1dc   :  { %v318_v29 = vrot.slane %v313_v18, %v4532_v20 }
 0x1df   :  { %243 = vadd.xlane.f32.xlu0 %v4415_v27 }
 0x268   :  { %v242_v33 = vpop.xlane.xlu0 %241 }
 0x269   :  { %v246_v34 = vmul.f32 0.0078125, %v242_v33 }
 0x26b   :  { %v4435_v35 = vsub.f32 %v4409_v23, %v246_v34 }
 0x26c   :  { %v244_v36 = vpop.xlane.xlu0 %243 }
 0x26d   :  { %v247_v37 = vmul.f32 0.0078125, %v244_v36  ;;  %v250_v38 = vmul.f32 %v4435_v35, %v4435_v35 }
 0x26f   :  { %v4440_v39 = vsub.f32 %v4415_v27, %v247_v37  ;;  %252 = vadd.xlane.f32.xlu1 %v250_v38 }
 0x271   :  { %v251_v40 = vmul.f32 %v4440_v39, %v4440_v39 }
 0x273   :  { %254 = vadd.xlane.f32.xlu1 %v251_v40 }
 0x2fc   :  { %v253_v61 = vpop.xlane.xlu1 %252 }
 0x2fd   :  { %v256_v62 = vmul.f32 0.0078125, %v253_v61 }
 0x2ff   :  { %v258_v63 = vadd.f32 1e-05, %v256_v62 }
 0x300   :  { %v255_v1 = vpop.xlane.xlu1 %254 }
 0x301   :  { %4065 = vrsqrt.f32 %v258_v63  ;;  %v257_v2 = vmul.f32 0.0078125, %v255_v1 }
 0x303   :  { %v259_v3 = vadd.f32 1e-05, %v257_v2 }
 0x305   :  { %4067 = vrsqrt.f32 %v259_v3 }
 0x30b   :  { %v4066_v4 = vpop.eup %4065 }
 0x30c   :  { %v262_v5 = vmul.f32 %v4066_v4, %v4435_v35 }
 0x30e   :  { %v270_v9 = vmul.f32 %v3298_v6, %v262_v5 }
 0x30f   :  { %v4068_v7 = vpop.eup %4067 }
 0x310   :  { %v263_v8 = vmul.f32 %v4068_v7, %v4440_v39  ;;  %v278_v12 = vadd.f32 %v3299_v10, %v270_v9 }
 0x312   :  { %v271_v11 = vmul.f32 %v3298_v6, %v263_v8 }
 0x314   :  { %v279_v13 = vadd.f32 %v3299_v10, %v271_v11 }
 0x316   :  { %v280_v14 = vpack.c.bf16 %v279_v13, %v278_v12 }
 0x318   :  { %491 = vmatmul.mubr.bf16.vlgmr.msra.gmra.mrb[4].mxu0 %v280_v14  ;;  %3706 = vmatmul.mubr.bf16.vlgmr.msra.gmra.mrb[4].mxu1 %v280_v14 }
 0x319   :  { %3711 = vmatprep.mubr.msk.bf16.mxu0 %vm4225_vm0, %v4224_v0  ;;  %3717 = vmatprep.mubr.msk.bf16.mxu1 %vm4225_vm0, %v4224_v0 }
 0x3eb   :  { %v492_v24 = vpop.f32.mrb[4].mxu0  ;;  %v535_v25 = vpop.f32.mrb[4].mxu1 }
 0x3ec   :  { %v494_v26 = vpop.f32.mrb[5].mxu0  ;;  %v3707_v28 = vpop.f32.mrb[5].mxu1  ;;  %v536_v33 = vadd.f32 %v535_v25, %v326_v22  ;;  %v493_v38 = vadd.f32 %v492_v24, %v318_v29 }
 0x3ed   :  { %v495_v30 = vadd.f32 %v494_v26, %v322_v21  ;;  %v496_v31 = vpop.f32.mrb[6].mxu0  ;;  %v538_v32 = vpop.f32.mrb[6].mxu1  ;;  %v4591_v26 = vld [vmem:[%s5262_s6] sm:$0xff] }
 0x3ee   :  { %v539_v34 = vadd.f32 %v538_v32, %v326_v22  ;;  %v498_v35 = vpop.f32.mrb[7].mxu0  ;;  %v3708_v36 = vpop.f32.mrb[7].mxu1  ;;  %v497_v40 = vadd.f32 %v496_v31, %v318_v29  ;;  %v550_v3 = vmul.f32 %v493_v38, %v231_v44  ;;  %v4596_v29 = vld [vmem:[%s5262_s6 + $0x8] sm:$0xff] }
 0x3ef   :  { %566 = vrot.lane.b32.xlu1 %v495_v30, %s4227_s8  ;;  %562 = vrot.lane.b32.xlu0 %v495_v30, %s4228_s4  ;;  %v499_v39 = vadd.f32 %v498_v35, %v322_v21  ;;  %v570_v50 = vmul.f32 %v495_v30, %v231_v44 }
 0x3f0   :  { %v4540_v37 = vpack.c.bf16 %v539_v34, %v536_v33  ;;  %v551_v8 = vmul.f32 %v497_v40, %v232_v47 }
 0x3f1   :  { %v571_v55 = vmul.f32 %v499_v39, %v232_v47 }
 0x3f2   :  { %3716 = vmatpush3.bf16.msra.mxu1 %v4540_v37 }
 0x3f3   :  { %564 = vrot.lane.b32.xlu1 %v499_v39, %s4228_s4  ;;  %542 = vrot.lane.b32.xlu0 %v493_v38, %s4228_s4 }
 0x3f4   :  { %3727 = vmatprep.subr.bf16.mxu1 %v4224_v0 }
 0x3f7   :  { %568 = vrot.lane.b32.xlu1 %v499_v39, %s4227_s8  ;;  %546 = vrot.lane.b32.xlu0 %v493_v38, %s4227_s8 }
 0x3fb   :  { %544 = vrot.lane.b32.xlu1 %v497_v40, %s4228_s4 }
 0x3ff   :  { %548 = vrot.lane.b32.xlu1 %v497_v40, %s4227_s8 }
 0x461   :  { %v567_v41 = vpop.permute.xlu1 %566  ;;  %v563_v43 = vpop.permute.xlu0 %562 }
 0x462   :  { %v572_v46 = vmul.f32 %v563_v43, %v233_v42  ;;  %v576_v57 = vmul.f32 %v567_v41, %v235_v52 }
 0x464   :  { %v574_v54 = vadd.f32 %v572_v46, %v570_v50 }
 0x465   :  { %v565_v48 = vpop.permute.xlu1 %564  ;;  %v543_v49 = vpop.permute.xlu0 %542 }
 0x466   :  { %v573_v51 = vmul.f32 %v565_v48, %v234_v45  ;;  %v578_v62 = vadd.f32 %v576_v57, %v574_v54  ;;  %v552_v63 = vmul.f32 %v543_v49, %v233_v42 }
 0x468   :  { %v575_v58 = vadd.f32 %v573_v51, %v571_v55  ;;  %v554_v7 = vadd.f32 %v552_v63, %v550_v3 }
 0x469   :  { %v569_v56 = vpop.permute.xlu1 %568  ;;  %v547_v61 = vpop.permute.xlu0 %546 }
 0x46a   :  { %v577_v59 = vmul.f32 %v569_v56, %v236_v53  ;;  %v556_v5 = vmul.f32 %v547_v61, %v235_v52 }
 0x46c   :  { %v579_v1 = vadd.f32 %v577_v59, %v575_v58  ;;  %v558_v11 = vadd.f32 %v556_v5, %v554_v7 }
 0x46d   :  { %v545_v2 = vpop.permute.xlu1 %544 }
 0x46e   :  { %v4568_v4 = vpack.c.bf16 %v579_v1, %v578_v62  ;;  %v553_v6 = vmul.f32 %v545_v2, %v234_v45  ;;  %v560_v15 = vmul.f32 0.17677669, %v558_v11 }
 0x470   :  { %718 = vrot.lane.b32.xlu0 %v4568_v4, %s4229_s5  ;;  %v603_v9 = vsel %vm182_vm2, %v4568_v4, 0  ;;  %v555_v12 = vadd.f32 %v553_v6, %v551_v8 }
 0x471   :  { %v549_v10 = vpop.permute.xlu1 %548  ;;  %3710 = vmatpush3.bf16.xpose.msra.mxu0 %v603_v9 }
 0x472   :  { %v557_v13 = vmul.f32 %v549_v10, %v236_v53  ;;  %3721 = vmatprep.subr.bf16.mxu0 %v4224_v0 }
 0x474   :  { %v559_v14 = vadd.f32 %v557_v13, %v555_v12  ;;  %v3939_v12 = vld [vmem:[#allocation2 + $0x10] sm:$0xff]   ;;  %v3940_v13 = vld [vmem:[#allocation2 + $0x18] sm:$0xff]  }
 0x476   :  { %v561_v18 = vmul.f32 0.17677669, %v559_v14 }
 0x478   :  { %v4575_v21 = vpack.c.bf16 %v561_v18, %v560_v15 }
 0x47a   :  { %715 = vrot.lane.b32.xlu1 %v4575_v21, %s4229_s5  ;;  %3712 = vmatmul.mubr.msk.bf16.vlgmr.msra.gmra.mrb[8].mxu0 %vm182_vm2, %v4575_v21 }
 0x47b   :  { %3723 = vmatprep.mubr.msk.bf16.mxu0 %vm4225_vm0, %v4224_v0 }
 0x4e2   :  { %v719_v22 = vpop.permute.xlu0 %718 }
 0x4e3   :  { %v724_v24 = vsel %vm182_vm2, %v719_v22, 0 }
 0x4e4   :  { %3722 = vmatpush3.bf16.xpose.msra.mxu0 %v724_v24 }
 0x4e5   :  { %3733 = vmatprep.subr.bf16.mxu0 %v4224_v0 }
 0x4ec   :  { %v716_v25 = vpop.permute.xlu1 %715 }
 0x4ed   :  { %3724 = vmatmul.mubr.msk.bf16.vlgmr.msra.gmra.mrb[12].mxu0 %vm182_vm2, %v716_v25 }
 0x4ee   :  { %3737 = vmatprep.mubr.msk.bf16.mxu0 %vm4225_vm0, %v4224_v0  ;;  %3734 = vmatpush3.bf16.msra.mxu0 %v3939_v12 }
 0x4ef   :  { %3735 = vmatprep.subr.bf16.mxu0 %v4224_v0 }
 0x4f2   :  { %3736 = vmatpush3.bf16.msra.mxu0 %v3940_v13 }
 0x4f3   :  { %3749 = vmatprep.subr.bf16.mxu0 %v4224_v0 }
 0x54d   :  { %v639_v28 = vpop.f32.mrb[8].mxu0 }
 0x54e   :  { %v640_v30 = vadd.f32 %v639_v28, %v4591_v26  ;;  %v3713_v31 = vpop.f32.mrb[9].mxu0 }
 0x54f   :  { %v642_v32 = vpop.f32.mrb[10].mxu0 }
 0x550   :  { %v643_v33 = vadd.f32 %v642_v32, %v4596_v29  ;;  %v3714_v34 = vpop.f32.mrb[11].mxu0  ;;  %v646_v35 = vsel %vm111_vm1, %v640_v30, -inf  ;;  %v3938_v32 = vld [vmem:[#allocation2 + $0x8] sm:$0xff]  }
 0x551   :  { %647 = vmax.xlane.f32.xlu0 %v646_v35 }
 0x552   :  { %v649_v36 = vsel %vm111_vm1, %v643_v33, -inf }
 0x553   :  { %650 = vmax.xlane.f32.xlu1 %v649_v36 }
 0x5c0   :  { %v760_v38 = vpop.f32.mrb[12].mxu0 }
 0x5c1   :  { %v761_v39 = vadd.f32 %v760_v38, %v4591_v26  ;;  %v3725_v40 = vpop.f32.mrb[13].mxu0 }
 0x5c2   :  { %v763_v41 = vpop.f32.mrb[14].mxu0 }
 0x5c3   :  { %v764_v42 = vadd.f32 %v763_v41, %v4596_v29  ;;  %v3726_v43 = vpop.f32.mrb[15].mxu0  ;;  %v767_v44 = vsel %vm111_vm1, %v761_v39, -inf }
 0x5c4   :  { %768 = vmax.xlane.f32.xlu0 %v767_v44 }
 0x5c5   :  { %v770_v45 = vsel %vm111_vm1, %v764_v42, -inf }
 0x5c8   :  { %771 = vmax.xlane.f32.xlu0 %v770_v45 }
 0x5de   :  { %v648_v46 = vpop.xlane.xlu0 %647 }
 0x5df   :  { %v652_v47 = vsub.f32 %v640_v30, %v648_v46  ;;  %v3937_v30 = vld [vmem:[#allocation2] sm:$0xff]  }
 0x5e0   :  { %v651_v48 = vpop.xlane.xlu1 %650 }
 0x5e1   :  { %v654_v49 = vmul.f32 1.442695, %v652_v47  ;;  %v653_v50 = vsub.f32 %v643_v33, %v651_v48 }
 0x5e3   :  { %4069 = vpow2.f32 %v654_v49  ;;  %v656_v51 = vmul.f32 1.442695, %v653_v50 }
 0x5e5   :  { %4071 = vpow2.f32 %v656_v51 }
 0x5ed   :  { %v4070_v52 = vpop.eup %4069 }
 0x5ee   :  { %v658_v53 = vsel %vm111_vm1, %v4070_v52, 0.0 }
 0x5ef   :  { %v4072_v54 = vpop.eup %4071  ;;  %659 = vadd.xlane.f32.xlu0 %v658_v53 }
 0x5f0   :  { %v661_v55 = vsel %vm111_vm1, %v4072_v54, 0.0 }
 0x5f1   :  { %662 = vadd.xlane.f32.xlu1 %v661_v55 }
 0x651   :  { %v769_v56 = vpop.xlane.xlu0 %768 }
 0x652   :  { %v773_v57 = vsub.f32 %v761_v39, %v769_v56 }
 0x654   :  { %v775_v58 = vmul.f32 1.442695, %v773_v57 }
 0x655   :  { %v772_v59 = vpop.xlane.xlu0 %771 }
 0x656   :  { %4073 = vpow2.f32 %v775_v58  ;;  %v774_v61 = vsub.f32 %v764_v42, %v772_v59 }
 0x658   :  { %v777_v62 = vmul.f32 1.442695, %v774_v61 }
 0x65a   :  { %4075 = vpow2.f32 %v777_v62 }
 0x660   :  { %v4074_v63 = vpop.eup %4073 }
 0x661   :  { %v779_v1 = vsel %vm111_vm1, %v4074_v63, 0.0 }
 0x662   :  { %780 = vadd.xlane.f32.xlu0 %v779_v1 }
 0x664   :  { %v4076_v2 = vpop.eup %4075 }
 0x665   :  { %v782_v3 = vsel %vm111_vm1, %v4076_v2, 0.0 }
 0x666   :  { %783 = vadd.xlane.f32.xlu1 %v782_v3 }
 0x677   :  { %953 = vrot.lane.b32.xlu1 %v4568_v4, %s5243_s3 }
 0x678   :  { %791 = vrot.lane.b32.xlu0 %v4540_v37, %s4229_s5 }
 0x67b   :  { %951 = vrot.lane.b32.xlu1 %v4575_v21, %s5243_s3 }
 0x67c   :  { %v660_v5 = vpop.xlane.xlu0 %659 }
 0x67d   :  { %4077 = vrcp.f32 %v660_v5 }
 0x67e   :  { %v663_v6 = vpop.xlane.xlu1 %662 }
 0x67f   :  { %4079 = vrcp.f32 %v663_v6 }
 0x687   :  { %v4078_v7 = vpop.eup %4077 }
 0x688   :  { %v666_v9 = vmul.f32 %v4078_v7, %v4070_v52 }
 0x689   :  { %v4080_v8 = vpop.eup %4079 }
 0x68a   :  { %v667_v10 = vmul.f32 %v4080_v8, %v4072_v54 }
 0x68c   :  { %v668_v11 = vpack.c.bf16 %v667_v10, %v666_v9 }
 0x68e   :  { %3718 = vmatmul.mubr.msk.bf16.vlgmr.msra.gmra.mrb[8].mxu1 %vm111_vm1, %v668_v11 }
 0x68f   :  { %3729 = vmatprep.mubr.msk.bf16.mxu1 %vm4225_vm0, %v4224_v0 }
 0x6ef   :  { %v781_v14 = vpop.xlane.xlu0 %780 }
 0x6f0   :  { %4081 = vrcp.f32 %v781_v14 }
 0x6f3   :  { %v784_v15 = vpop.xlane.xlu1 %783  ;;  %v792_v18 = vpop.permute.xlu0 %791 }
 0x6f4   :  { %4083 = vrcp.f32 %v784_v15  ;;  %3728 = vmatpush3.bf16.msra.mxu1 %v792_v18 }
 0x6f5   :  { %3741 = vmatprep.subr.bf16.mxu1 %v4224_v0 }
 0x6f7   :  { %v954_v41 = vpop.permute.xlu1 %953 }
 0x6f8   :  { %v959_v45 = vsel %vm182_vm2, %v954_v41, 0 }
 0x6fa   :  { %v4082_v22 = vpop.eup %4081 }
 0x6fb   :  { %v787_v25 = vmul.f32 %v4082_v22, %v4074_v63  ;;  %v952_v46 = vpop.permute.xlu1 %951 }
 0x6fe   :  { %v4084_v24 = vpop.eup %4083 }
 0x6ff   :  { %v788_v28 = vmul.f32 %v4084_v24, %v4076_v2 }
 0x701   :  { %v789_v31 = vpack.c.bf16 %v788_v28, %v787_v25 }
 0x703   :  { %3730 = vmatmul.mubr.msk.bf16.vlgmr.msra.gmra.mrb[12].mxu1 %vm111_vm1, %v789_v31 }
 0x704   :  { %3742 = vmatpush3.bf16.msra.mxu1 %v3937_v30  ;;  %3745 = vmatprep.mubr.msk.bf16.mxu1 %vm4225_vm0, %v4224_v0 }
 0x705   :  { %3743 = vmatprep.subr.bf16.mxu1 %v4224_v0 }
 0x708   :  { %3744 = vmatpush3.bf16.msra.mxu1 %v3938_v32 }
 0x709   :  { %3755 = vmatprep.subr.bf16.mxu1 %v4224_v0 }
 0x761   :  { %v706_v33 = vpop.f32.mrb[8].mxu1 }
 0x762   :  { %v3719_v34 = vpop.f32.mrb[9].mxu1 }
 0x763   :  { %v709_v35 = vpop.f32.mrb[10].mxu1 }
 0x764   :  { %v713_v36 = vpack.c.bf16 %v709_v35, %v706_v33  ;;  %v3720_v38 = vpop.f32.mrb[11].mxu1  ;;  %v3942_v33 = vld [vmem:[#allocation2 + $0x28] sm:$0xff]  }
 0x766   :  { %3746 = vmatmul.mubr.msk.bf16.vlgmr.msra.gmra.mrb[16].mxu1 %vm182_vm2, %v713_v36 }
 0x767   :  { %3757 = vmatprep.mubr.msk.bf16.mxu1 %vm4225_vm0, %v4224_v0 }
 0x7d6   :  { %v831_v39 = vpop.f32.mrb[12].mxu1 }
 0x7d7   :  { %v3731_v40 = vpop.f32.mrb[13].mxu1 }
 0x7d8   :  { %v834_v42 = vpop.f32.mrb[14].mxu1 }
 0x7d9   :  { %v838_v43 = vpack.c.bf16 %v834_v42, %v831_v39  ;;  %v3732_v44 = vpop.f32.mrb[15].mxu1 }
 0x7db   :  { %3738 = vmatmul.mubr.msk.bf16.vlgmr.msra.gmra.mrb[16].mxu0 %vm182_vm2, %v838_v43 }
 0x7dc   :  { %3750 = vmatpush3.bf16.xpose.msra.mxu0 %v959_v45  ;;  %3751 = vmatprep.mubr.msk.bf16.mxu0 %vm4225_vm0, %v4224_v0 }
 0x7dd   :  { %3761 = vmatprep.subr.bf16.mxu0 %v4224_v0 }
 0x7e3   :  { %3752 = vmatmul.mubr.msk.bf16.vlgmr.msra.gmra.mrb[20].mxu0 %vm182_vm2, %v952_v46 }
 0x7e4   :  { %3765 = vmatprep.mubr.msk.bf16.mxu0 %vm4225_vm0, %v4224_v0 }
 0x839   :  { %v944_v47 = vpop.f32.mrb[16].mxu1 }
 0x83a   :  { %v3747_v48 = vpop.f32.mrb[17].mxu1 }
 0x83b   :  { %v947_v49 = vpop.f32.mrb[18].mxu1 }
 0x83c   :  { %v3748_v50 = vpop.f32.mrb[19].mxu1 }
 0x8ae   :  { %v888_v51 = vpop.f32.mrb[16].mxu0 }
 0x8af   :  { %v4638_v52 = vadd.f32 %v944_v47, %v888_v51  ;;  %v3739_v53 = vpop.f32.mrb[17].mxu0 }
 0x8b0   :  { %v891_v54 = vpop.f32.mrb[18].mxu0 }
 0x8b1   :  { %v4640_v55 = vadd.f32 %v947_v49, %v891_v54  ;;  %v3740_v56 = vpop.f32.mrb[19].mxu0 }
 0x8b6   :  { %v995_v57 = vpop.f32.mrb[20].mxu0 }
 0x8b7   :  { %v996_v58 = vadd.f32 %v995_v57, %v4591_v26  ;;  %v3753_v59 = vpop.f32.mrb[21].mxu0 }
 0x8b8   :  { %v998_v61 = vpop.f32.mrb[22].mxu0 }
 0x8b9   :  { %v999_v62 = vadd.f32 %v998_v61, %v4596_v29  ;;  %v3754_v63 = vpop.f32.mrb[23].mxu0  ;;  %v1002_v1 = vsel %vm111_vm1, %v996_v58, -inf }
 0x8ba   :  { %1003 = vmax.xlane.f32.xlu1 %v1002_v1 }
 0x8bb   :  { %v1005_v2 = vsel %vm111_vm1, %v999_v62, -inf }
 0x8bc   :  { %1006 = vmax.xlane.f32.xlu0 %v1005_v2 }
 0x8cb   :  { %1025 = vrot.lane.b32.xlu1 %v4540_v37, %s5243_s3 }
 0x8cf   :  { %1131 = vrot.lane.b32.xlu1 %v4575_v21, %s5241_s29  ;;  %v3941_v21 = vld [vmem:[#allocation2 + $0x20] sm:$0xff]  }
 0x8d0   :  { %3762 = vmatpush3.bf16.msra.mxu0 %v3941_v21 }
 0x8d1   :  { %3763 = vmatprep.subr.bf16.mxu0 %v4224_v0 }
 0x8d4   :  { %3764 = vmatpush3.bf16.msra.mxu0 %v3942_v33  ;;  %v3945_v33 = vld [vmem:[%s5227_s18] ss:$8 sps:$4 sm:$0xff]  }
 0x8d5   :  { %3775 = vmatprep.subr.bf16.mxu0 %v4224_v0 }
 0x947   :  { %v1004_v3 = vpop.xlane.xlu1 %1003 }
 0x948   :  { %v1008_v5 = vsub.f32 %v996_v58, %v1004_v3  ;;  %v3943_v58 = vld [vmem:[#allocation2 + $0x30] sm:$0xff]  }
 0x949   :  { %v1007_v6 = vpop.xlane.xlu0 %1006 }
 0x94a   :  { %v1010_v7 = vmul.f32 1.442695, %v1008_v5  ;;  %v1009_v8 = vsub.f32 %v999_v62, %v1007_v6 }
 0x94b   :  { %v1026_v9 = vpop.permute.xlu1 %1025 }
 0x94c   :  { %4085 = vpow2.f32 %v1010_v7  ;;  %v1012_v10 = vmul.f32 1.442695, %v1009_v8  ;;  %3756 = vmatpush3.bf16.msra.mxu1 %v1026_v9 }
 0x94d   :  { %3769 = vmatprep.subr.bf16.mxu1 %v4224_v0 }
 0x94e   :  { %4087 = vpow2.f32 %v1012_v10 }
 0x956   :  { %v4086_v11 = vpop.eup %4085 }
 0x957   :  { %v1014_v12 = vsel %vm111_vm1, %v4086_v11, 0.0 }
 0x958   :  { %v4088_v13 = vpop.eup %4087  ;;  %1015 = vadd.xlane.f32.xlu0 %v1014_v12 }
 0x959   :  { %v1017_v14 = vsel %vm111_vm1, %v4088_v13, 0.0 }
 0x95c   :  { %1018 = vadd.xlane.f32.xlu0 %v1017_v14 }
 0x972   :  { %1133 = vrot.lane.b32.xlu0 %v4568_v4, %s5241_s29  ;;  %v1132_v4 = vpop.permute.xlu1 %1131 }
 0x9e5   :  { %v1016_v15 = vpop.xlane.xlu0 %1015 }
 0x9e6   :  { %4089 = vrcp.f32 %v1016_v15 }
 0x9e9   :  { %v1019_v18 = vpop.xlane.xlu0 %1018 }
 0x9ea   :  { %4091 = vrcp.f32 %v1019_v18 }
 0x9ed   :  { %v1134_v30 = vpop.permute.xlu0 %1133 }
 0x9ee   :  { %v1139_v32 = vsel %vm182_vm2, %v1134_v30, 0 }
 0x9f0   :  { %v4090_v22 = vpop.eup %4089 }
 0x9f1   :  { %v1022_v25 = vmul.f32 %v4090_v22, %v4086_v11 }
 0x9f4   :  { %v4092_v24 = vpop.eup %4091 }
 0x9f5   :  { %v1023_v28 = vmul.f32 %v4092_v24, %v4088_v13  ;;  %v3344_v24 = vld [vmem:[%s5224_s15] ss:$0 sm:$0xff] }
 0x9f7   :  { %v1024_v31 = vpack.c.bf16 %v1023_v28, %v1022_v25 }
 0x9f9   :  { %3758 = vmatmul.mubr.msk.bf16.vlgmr.msra.gmra.mrb[20].mxu1 %vm111_vm1, %v1024_v31 }
 0x9fa   :  { %3770 = vmatpush3.bf16.xpose.msra.mxu1 %v1139_v32  ;;  %3771 = vmatprep.mubr.msk.bf16.mxu1 %vm4225_vm0, %v4224_v0 }
 0x9fb   :  { %3781 = vmatprep.subr.bf16.mxu1 %v4224_v0 }
 0xa01   :  { %3772 = vmatmul.mubr.msk.bf16.vlgmr.msra.gmra.mrb[24].mxu1 %vm182_vm2, %v1132_v4 }
 0xa02   :  { %3785 = vmatprep.mubr.msk.bf16.mxu1 %vm4225_vm0, %v4224_v0  ;;  %3782 = vmatpush3.bf16.msra.mxu1 %v3943_v58 }
 0xa03   :  { %3783 = vmatprep.subr.bf16.mxu1 %v4224_v0 }
 0xacc   :  { %v1065_v34 = vpop.f32.mrb[20].mxu1 }
 0xacd   :  { %v3759_v35 = vpop.f32.mrb[21].mxu1 }
 0xace   :  { %v1068_v36 = vpop.f32.mrb[22].mxu1 }
 0xacf   :  { %v1072_v38 = vpack.c.bf16 %v1068_v36, %v1065_v34  ;;  %v3760_v39 = vpop.f32.mrb[23].mxu1  ;;  %v3948_v34 = vld [vmem:[%s5227_s18 + $0x10] ss:$8 sps:$4 sm:$0xff]  }
 0xad1   :  { %3766 = vmatmul.mubr.msk.bf16.vlgmr.msra.gmra.mrb[24].mxu0 %vm182_vm2, %v1072_v38 }
 0xad2   :  { %3777 = vmatprep.mubr.msk.bf16.mxu0 %vm4225_vm0, %v4224_v0 }
 0xad4   :  { %v1175_v40 = vpop.f32.mrb[24].mxu1 }
 0xad5   :  { %v1176_v41 = vadd.f32 %v1175_v40, %v4591_v26  ;;  %v3773_v42 = vpop.f32.mrb[25].mxu1 }
 0xad6   :  { %v1178_v43 = vpop.f32.mrb[26].mxu1 }
 0xad7   :  { %v1179_v44 = vadd.f32 %v1178_v43, %v4596_v29  ;;  %v3774_v45 = vpop.f32.mrb[27].mxu1  ;;  %v1182_v46 = vsel %vm111_vm1, %v1176_v41, -inf }
 0xad8   :  { %1183 = vmax.xlane.f32.xlu1 %v1182_v46  ;;  %v3951_v45 = vld [vmem:[%s5227_s18 + $0x20] ss:$8 sps:$4 sm:$0xff]   ;;  %v3956_v46 = vld [vmem:[%s5227_s18 + $0x34] ss:$8 sps:$4 sm:$0xff]  }
 0xad9   :  { %v1185_v47 = vsel %vm111_vm1, %v1179_v44, -inf }
 0xada   :  { %1186 = vmax.xlane.f32.xlu0 %v1185_v47  ;;  %v3954_v47 = vld [vmem:[%s5227_s18 + $0x30] ss:$8 sps:$4 sm:$0xff]  }
 0xb65   :  { %v1184_v48 = vpop.xlane.xlu1 %1183 }
 0xb66   :  { %v1188_v49 = vsub.f32 %v1176_v41, %v1184_v48  ;;  %v3959_v48 = vld [vmem:[%s5227_s18 + $0x44] ss:$8 sps:$4 sm:$0xff]  }
 0xb67   :  { %v1187_v50 = vpop.xlane.xlu0 %1186 }
 0xb68   :  { %v1190_v51 = vmul.f32 1.442695, %v1188_v49  ;;  %v1189_v53 = vsub.f32 %v1179_v44, %v1187_v50  ;;  %v3953_v44 = vld [vmem:[%s5227_s18 + $0x24] ss:$8 sps:$4 sm:$0xff]   ;;  %v3957_v49 = vld [vmem:[%s5227_s18 + $0x40] ss:$8 sps:$4 sm:$0xff]  }
 0xb69   :  { %v3962_v50 = vld [vmem:[%s5227_s18 + $0x54] ss:$8 sps:$4 sm:$0xff]  }
 0xb6a   :  { %4093 = vpow2.f32 %v1190_v51  ;;  %v1192_v54 = vmul.f32 1.442695, %v1189_v53  ;;  %v3960_v51 = vld [vmem:[%s5227_s18 + $0x50] ss:$8 sps:$4 sm:$0xff]   ;;  %v3965_v53 = vld [vmem:[%s5227_s18 + $0x64] ss:$8 sps:$4 sm:$0xff]  }
 0xb6c   :  { %4095 = vpow2.f32 %v1192_v54  ;;  %v3963_v54 = vld [vmem:[%s5227_s18 + $0x60] ss:$8 sps:$4 sm:$0xff]  }
 0xb74   :  { %v4094_v26 = vpop.eup %4093 }
 0xb75   :  { %v1194_v56 = vsel %vm111_vm1, %v4094_v26, 0.0 }
 0xb76   :  { %v4096_v57 = vpop.eup %4095  ;;  %1195 = vadd.xlane.f32.xlu0 %v1194_v56  ;;  %v3966_v56 = vld [vmem:[%s5227_s18 + $0x70] ss:$8 sps:$4 sm:$0xff]  }
 0xb77   :  { %v1197_v29 = vsel %vm111_vm1, %v4096_v57, 0.0 }
 0xb78   :  { %1198 = vadd.xlane.f32.xlu1 %v1197_v29 }
 0xb8c   :  { %1205 = vrot.lane.b32.xlu0 %v4540_v37, %s5241_s29 }
 0xba4   :  { %v1122_v59 = vpop.f32.mrb[24].mxu0 }
 0xba5   :  { %v1129_v61 = vadd.f32 %v1122_v59, %v4638_v52  ;;  %v3767_v62 = vpop.f32.mrb[25].mxu0  ;;  %v3944_v52 = vld [vmem:[#allocation2 + $0x38] sm:$0xff]  }
 0xba6   :  { %v1125_v63 = vpop.f32.mrb[26].mxu0  ;;  %3784 = vmatpush3.bf16.msra.mxu1 %v3944_v52  ;;  %v3969_v52 = vld [vmem:[%s5229_s20 + $0x40] sm:$0xff]  }
 0xba7   :  { %v1130_v1 = vadd.f32 %v1125_v63, %v4640_v55  ;;  %v3768_v2 = vpop.f32.mrb[27].mxu0  ;;  %3594 = vmatprep.subr.bf16.mxu1 %v3969_v52 }
 0xba8   :  { %v3345_v2 = vld [vmem:[%s5225_s16] ss:$0 sm:$0xff] }
 0xc03   :  { %v1196_v3 = vpop.xlane.xlu0 %1195 }
 0xc04   :  { %4097 = vrcp.f32 %v1196_v3 }
 0xc05   :  { %v1199_v5 = vpop.xlane.xlu1 %1198 }
 0xc06   :  { %4099 = vrcp.f32 %v1199_v5 }
 0xc07   :  { %v1206_v6 = vpop.permute.xlu0 %1205 }
 0xc08   :  { %3776 = vmatpush3.bf16.msra.mxu0 %v1206_v6 }
 0xc0e   :  { %v4098_v7 = vpop.eup %4097 }
 0xc0f   :  { %v1202_v8 = vmul.f32 %v4098_v7, %v4094_v26  ;;  %v3968_v26 = vld [vmem:[%s5227_s18 + $0x74] ss:$8 sps:$4 sm:$0xff]   ;;  %v3346_v7 = vld [vmem:[%s5226_s17] ss:$0 sm:$0xff] }
 0xc10   :  { %v4100_v37 = vpop.eup %4099 }
 0xc11   :  { %v1203_v9 = vmul.f32 %v4100_v37, %v4096_v57 }
 0xc13   :  { %v1204_v10 = vpack.c.bf16 %v1203_v9, %v1202_v8 }
 0xc15   :  { %3778 = vmatmul.mubr.msk.bf16.vlgmr.msra.gmra.mrb[28].mxu0 %vm111_vm1, %v1204_v10 }
 0xc16   :  { %1503 = vmatprep.mubr.bf16.mxu0 %v4226_v60 }
 0xce8   :  { %v1245_v11 = vpop.f32.mrb[28].mxu0 }
 0xce9   :  { %v3779_v55 = vpop.f32.mrb[29].mxu0 }
 0xcea   :  { %v1248_v12 = vpop.f32.mrb[30].mxu0  ;;  %v3971_v55 = vld [vmem:[%s5229_s20 + $0x48] sm:$0xff]  }
 0xceb   :  { %v1252_v13 = vpack.c.bf16 %v1248_v12, %v1245_v11  ;;  %v3780_v14 = vpop.f32.mrb[31].mxu0  ;;  %v3970_v11 = vld [vmem:[%s5229_s20] sm:$0xff]   ;;  %v3972_v12 = vld [vmem:[%s5229_s20 + $0x8] sm:$0xff]  }
 0xcec   :  { %v3974_v14 = vld [vmem:[%s5229_s20 + $0x10] sm:$0xff]  }
 0xced   :  { %3786 = vmatmul.mubr.msk.bf16.vlgmr.msra.gmra.mrb[28].mxu1 %vm182_vm2, %v1252_v13  ;;  %v3973_v13 = vld [vmem:[%s5229_s20 + $0x50] sm:$0xff]  }
 0xcee   :  { %3595 = vmatpush3.bf16.msra.mxu1 %v3970_v11 }
 0xcef   :  { %3596 = vmatprep.subr.bf16.mxu1 %v3971_v55 }
 0xcf2   :  { %3597 = vmatpush3.bf16.msra.mxu1 %v3972_v12 }
 0xcf3   :  { %3598 = vmatprep.subr.bf16.mxu1 %v3973_v13 }
 0xcf6   :  { %3599 = vmatpush3.bf16.msra.mxu1 %v3974_v14 }
 0xdc0   :  { %v1302_v21 = vpop.f32.mrb[28].mxu1 }
 0xdc1   :  { %v1309_v15 = vadd.f32 %v1302_v21, %v1129_v61  ;;  %v3787_v18 = vpop.f32.mrb[29].mxu1  ;;  %v3975_v21 = vld [vmem:[%s5229_s20 + $0x58] sm:$0xff]  }
 0xdc2   :  { %v1305_v22 = vpop.f32.mrb[30].mxu1  ;;  %3600 = vmatprep.subr.bf16.mxu1 %v3975_v21  ;;  %v3977_v18 = vld [vmem:[%s5229_s20 + $0x60] sm:$0xff]  }
 0xdc3   :  { %v1311_v25 = vadd.f32 %v1309_v15, %v4409_v23  ;;  %v1310_v28 = vadd.f32 %v1305_v22, %v1130_v1  ;;  %v3788_v30 = vpop.f32.mrb[31].mxu1  ;;  %v3947_v23 = vld [vmem:[%s5227_s18 + $0x4] ss:$8 sps:$4 sm:$0xff]   ;;  %v3976_v15 = vld [vmem:[%s5229_s20 + $0x18] sm:$0xff]  }
 0xdc4   :  { %1471 = vmatprep.subr.bf16.mxu0 %v3947_v23  ;;  %3601 = vmatpush3.bf16.msra.mxu1 %v3976_v15  ;;  %v3978_v22 = vld [vmem:[%s5229_s20 + $0x20] sm:$0xff]   ;;  %v3982_v30 = vld [vmem:[%s5229_s20 + $0x30] sm:$0xff]  }
 0xdc5   :  { %v1312_v31 = vadd.f32 %v1310_v28, %v4415_v27  ;;  %v4687_v32 = vadd.f32 %v3344_v24, %v1311_v25  ;;  %v3950_v27 = vld [vmem:[%s5227_s18 + $0x14] ss:$8 sps:$4 sm:$0xff]   ;;  %1472 = vmatpush1.bf16.msra.mxu0 %v3945_v33  ;;  %3602 = vmatprep.subr.bf16.mxu1 %v3977_v18  ;;  %v3980_v25 = vld [vmem:[%s5229_s20 + $0x28] sm:$0xff]   ;;  %v1379_v23 = vld [vmem:[%s5228_s19] sm:$0x3] }
 0xdc6   :  { %1473 = vmatprep.subr.bf16.mxu0 %v3950_v27  ;;  %v3981_v28 = vld [vmem:[%s5229_s20 + $0x70] sm:$0xff]   ;;  %v3984_v33 = vld [vmem:[%s5229_s20 + $0x38] sm:$0xff]   ;;  %v1384_v27 = vrot.slane %v1379_v23, %v4532_v20 }
 0xdc7   :  { %1324 = vadd.xlane.f32.xlu1 %v4687_v32  ;;  %v4690_v4 = vadd.f32 %v3344_v24, %v1312_v31  ;;  %v3979_v24 = vld [vmem:[%s5229_s20 + $0x68] sm:$0xff]   ;;  %v3983_v31 = vld [vmem:[%s5229_s20 + $0x78] sm:$0xff]  }
 0xdc8   :  { %3603 = vmatpush3.bf16.msra.mxu1 %v3978_v22 }
 0xdc9   :  { %1474 = vmatpush1.bf16.msra.mxu0 %v3948_v34  ;;  %3604 = vmatprep.subr.bf16.mxu1 %v3979_v24  ;;  %v1388_v34 = vrot.slane %v1379_v23, %v4525_v17  ;;  %v3363_v24 = vld [vmem:[%s5230_s21] ss:$0 sm:$0xff] }
 0xdca   :  { %1475 = vmatprep.subr.bf16.mxu0 %v3953_v44 }
 0xdcb   :  { %1326 = vadd.xlane.f32.xlu1 %v4690_v4 }
 0xdcc   :  { %3605 = vmatpush3.bf16.msra.mxu1 %v3980_v25 }
 0xdcd   :  { %1476 = vmatpush1.bf16.msra.mxu0 %v3951_v45  ;;  %3606 = vmatprep.subr.bf16.mxu1 %v3981_v28 }
 0xdce   :  { %1477 = vmatprep.subr.bf16.mxu0 %v3956_v46 }
 0xdd0   :  { %3607 = vmatpush3.bf16.msra.mxu1 %v3982_v30 }
 0xdd1   :  { %1478 = vmatpush1.bf16.msra.mxu0 %v3954_v47  ;;  %3608 = vmatprep.subr.bf16.mxu1 %v3983_v31 }
 0xdd2   :  { %1479 = vmatprep.subr.bf16.mxu0 %v3959_v48 }
 0xdd4   :  { %3609 = vmatpush3.bf16.msra.mxu1 %v3984_v33 }
 0xdd5   :  { %1480 = vmatpush1.bf16.msra.mxu0 %v3957_v49  ;;  %3789 = vmatprep.subr.bf16.mxu1 %v4224_v0 }
 0xdd6   :  { %1481 = vmatprep.subr.bf16.mxu0 %v3962_v50 }
 0xdd9   :  { %1482 = vmatpush1.bf16.msra.mxu0 %v3960_v51 }
 0xdda   :  { %1483 = vmatprep.subr.bf16.mxu0 %v3965_v53 }
 0xddd   :  { %1484 = vmatpush1.bf16.msra.mxu0 %v3963_v54 }
 0xdde   :  { %1485 = vmatprep.subr.bf16.mxu0 %v3968_v26 }
 0xde1   :  { %1486 = vmatpush1.bf16.msra.mxu0 %v3966_v56 }
 0xe54   :  { %v1325_v35 = vpop.xlane.xlu1 %1324 }
 0xe55   :  { %v1328_v36 = vmul.f32 0.0078125, %v1325_v35 }
 0xe57   :  { %v1330_v38 = vsub.f32 %v4687_v32, %v1328_v36 }
 0xe58   :  { %v1327_v39 = vpop.xlane.xlu1 %1326 }
 0xe59   :  { %v1329_v40 = vmul.f32 0.0078125, %v1327_v39  ;;  %v1332_v41 = vmul.f32 %v1330_v38, %v1330_v38 }
 0xe5b   :  { %v1331_v42 = vsub.f32 %v4690_v4, %v1329_v40  ;;  %1334 = vadd.xlane.f32.xlu1 %v1332_v41 }
 0xe5d   :  { %v1333_v43 = vmul.f32 %v1331_v42, %v1331_v42 }
 0xe5f   :  { %1336 = vadd.xlane.f32.xlu1 %v1333_v43 }
 0xee8   :  { %v1335_v57 = vpop.xlane.xlu1 %1334 }
 0xee9   :  { %v1338_v29 = vmul.f32 0.0078125, %v1335_v57 }
 0xeeb   :  { %v1340_v58 = vadd.f32 1e-05, %v1338_v29 }
 0xeec   :  { %v1337_v59 = vpop.xlane.xlu1 %1336 }
 0xeed   :  { %4101 = vrsqrt.f32 %v1340_v58  ;;  %v1339_v61 = vmul.f32 0.0078125, %v1337_v59 }
 0xeef   :  { %v1341_v62 = vadd.f32 1e-05, %v1339_v61 }
 0xef1   :  { %4103 = vrsqrt.f32 %v1341_v62 }
 0xef7   :  { %v4102_v63 = vpop.eup %4101 }
 0xef8   :  { %v1344_v1 = vmul.f32 %v4102_v63, %v1330_v38 }
 0xefa   :  { %v1352_v6 = vmul.f32 %v3345_v2, %v1344_v1 }
 0xefb   :  { %v4104_v3 = vpop.eup %4103 }
 0xefc   :  { %v1345_v5 = vmul.f32 %v4104_v3, %v1331_v42  ;;  %v1360_v8 = vadd.f32 %v3346_v7, %v1352_v6 }
 0xefe   :  { %v1353_v37 = vmul.f32 %v3345_v2, %v1345_v5 }
 0xf00   :  { %v1361_v9 = vadd.f32 %v3346_v7, %v1353_v37 }
 0xf02   :  { %v1362_v10 = vpack.c.bf16 %v1361_v9, %v1360_v8 }
 0xf04   :  { %1504 = vmatmul.mubr.bf16.vlgmr.msra.gmra.mrb[32].mxu0 %v1362_v10 }
 0xf05   :  { %1984 = vmatprep.mubr.bf16.mxu0 %v4226_v60 }
 0xfd7   :  { %v1505_v35 = vpop.f32.mrb[32].mxu0 }
 0xfd8   :  { %v1506_v36 = vadd.f32 %v1505_v35, %v1384_v27  ;;  %v1507_v38 = vpop.f32.mrb[33].mxu0 }
 0xfd9   :  { %v1508_v39 = vadd.f32 %v1507_v38, %v1388_v34  ;;  %v1509_v40 = vpop.f32.mrb[34].mxu0  ;;  %v3987_v38 = vld [vmem:[%s5221_s12 + $0xc4] ss:$12 sps:$4 sm:$0xff]  }
 0xfda   :  { %v1514_v41 = vmul.f32 %v1506_v36, %v1506_v36  ;;  %v1510_v42 = vadd.f32 %v1509_v40, %v1384_v27  ;;  %v1511_v43 = vpop.f32.mrb[35].mxu0  ;;  %1952 = vmatprep.subr.bf16.mxu0 %v3987_v38 }
 0xfdb   :  { %v1515_v44 = vmul.f32 %v1508_v39, %v1508_v39  ;;  %v1512_v45 = vadd.f32 %v1511_v43, %v1388_v34 }
 0xfdc   :  { %v1518_v46 = vmul.f32 %v1514_v41, %v1506_v36  ;;  %v1516_v47 = vmul.f32 %v1510_v42, %v1510_v42 }
 0xfdd   :  { %v1519_v48 = vmul.f32 %v1515_v44, %v1508_v39  ;;  %v1517_v49 = vmul.f32 %v1512_v45, %v1512_v45 }
 0xfde   :  { %v1522_v50 = vmul.f32 0.044715, %v1518_v46  ;;  %v1520_v51 = vmul.f32 %v1516_v47, %v1510_v42 }
 0xfdf   :  { %v1523_v53 = vmul.f32 0.044715, %v1519_v48  ;;  %v1521_v54 = vmul.f32 %v1517_v49, %v1512_v45  ;;  %v3992_v48 = vld [vmem:[%s5221_s12 + $0xe0] ss:$12 sps:$4 sm:$0xff]  }
 0xfe0   :  { %v1526_v26 = vadd.f32 %v1522_v50, %v1506_v36  ;;  %v1524_v56 = vmul.f32 0.044715, %v1520_v51  ;;  %v3995_v49 = vld [vmem:[%s5221_s12 + $0xf4] ss:$12 sps:$4 sm:$0xff]   ;;  %v3993_v50 = vld [vmem:[%s5221_s12 + $0xf0] ss:$12 sps:$4 sm:$0xff]  }
 0xfe1   :  { %v1527_v57 = vadd.f32 %v1523_v53, %v1508_v39  ;;  %v1525_v29 = vmul.f32 0.044715, %v1521_v54  ;;  %v3996_v51 = vld [vmem:[%s5221_s12 + $0xf8] ss:$12 sps:$4 sm:$0xff]   ;;  %v3997_v54 = vld [vmem:[%s5221_s12 + $0x108] ss:$12 sps:$4 sm:$0xff]  }
 0xfe2   :  { %v1530_v58 = vmul.f32 0.7978846, %v1526_v26  ;;  %v1528_v59 = vadd.f32 %v1524_v56, %v1510_v42  ;;  %v3999_v53 = vld [vmem:[%s5221_s12 + $0x10c] ss:$12 sps:$4 sm:$0xff]   ;;  %v4000_v26 = vld [vmem:[%s5221_s12 + $0x110] ss:$12 sps:$4 sm:$0xff]  }
 0xfe3   :  { %v1531_v61 = vmul.f32 0.7978846, %v1527_v57  ;;  %v1529_v62 = vadd.f32 %v1525_v29, %v1512_v45  ;;  %v4003_v56 = vld [vmem:[%s5221_s12 + $0x124] ss:$12 sps:$4 sm:$0xff]   ;;  %v4001_v57 = vld [vmem:[%s5221_s12 + $0x120] ss:$12 sps:$4 sm:$0xff]  }
 0xfe4   :  { %4105 = vtanh.f32 %v1530_v58  ;;  %v1532_v63 = vmul.f32 0.7978846, %v1528_v59  ;;  %v4004_v29 = vld [vmem:[%s5221_s12 + $0x128] ss:$12 sps:$4 sm:$0xff]   ;;  %v4005_v59 = vld [vmem:[%s5221_s12 + $0x138] ss:$12 sps:$4 sm:$0xff]  }
 0xfe5   :  { %4107 = vtanh.f32 %v1531_v61  ;;  %v1533_v1 = vmul.f32 0.7978846, %v1529_v62  ;;  %v4007_v58 = vld [vmem:[%s5221_s12 + $0x13c] ss:$12 sps:$4 sm:$0xff]   ;;  %v4008_v61 = vld [vmem:[%s5221_s12 + $0x140] ss:$12 sps:$4 sm:$0xff]  }
 0xfe6   :  { %4109 = vtanh.f32 %v1532_v63  ;;  %v4011_v62 = vld [vmem:[%s5221_s12 + $0x154] ss:$12 sps:$4 sm:$0xff]   ;;  %v4009_v63 = vld [vmem:[%s5221_s12 + $0x150] ss:$12 sps:$4 sm:$0xff]  }
 0xfe7   :  { %4111 = vtanh.f32 %v1533_v1  ;;  %v4012_v1 = vld [vmem:[%s5221_s12 + $0x158] ss:$12 sps:$4 sm:$0xff]  }
 0xfee   :  { %v4106_v2 = vpop.eup %4105 }
 0xfef   :  { %v4108_v3 = vpop.eup %4107  ;;  %v1538_v5 = vadd.f32 1.0, %v4106_v2  ;;  %v4015_v2 = vld [vmem:[%s5221_s12 + $0x16c] ss:$12 sps:$4 sm:$0xff]  }
 0xff0   :  { %v4110_v6 = vpop.eup %4109  ;;  %v1539_v7 = vadd.f32 1.0, %v4108_v3  ;;  %v4013_v3 = vld [vmem:[%s5221_s12 + $0x168] ss:$12 sps:$4 sm:$0xff]  }
 0xff1   :  { %v4112_v37 = vpop.eup %4111  ;;  %v1542_v8 = vmul.f32 0.5, %v1538_v5  ;;  %v1540_v9 = vadd.f32 1.0, %v4110_v6  ;;  %v4016_v5 = vld [vmem:[%s5221_s12 + $0x170] ss:$12 sps:$4 sm:$0xff]  }
 0xff2   :  { %v1541_v10 = vadd.f32 1.0, %v4112_v37  ;;  %v1543_v52 = vmul.f32 0.5, %v1539_v7 }
 0xff3   :  { %v1544_v11 = vmul.f32 0.5, %v1540_v9  ;;  %v1546_v12 = vmul.f32 %v1542_v8, %v1506_v36  ;;  %v3985_v36 = vld [vmem:[%s5221_s12 + $0xc0] ss:$12 sps:$4 sm:$0xff]  }
 0xff4   :  { %v1545_v55 = vmul.f32 0.5, %v1541_v10  ;;  %v1547_v14 = vmul.f32 %v1543_v52, %v1508_v39  ;;  %v3991_v39 = vld [vmem:[%s5221_s12 + $0xdc] ss:$12 sps:$4 sm:$0xff]   ;;  %1953 = vmatpush1.bf16.msra.mxu0 %v3985_v36 }
 0xff5   :  { %v1548_v13 = vmul.f32 %v1544_v11, %v1510_v42  ;;  %1954 = vmatprep.subr.bf16.mxu0 %v3991_v39 }
 0xff6   :  { %v1549_v21 = vmul.f32 %v1545_v55, %v1512_v45  ;;  %v3382_v55 = vld [vmem:[%s5219_s10 + $0x1] ss:$0 sm:$0xff] }
 0xff7   :  { %v1550_v15 = vpack.c.bf16 %v1548_v13, %v1546_v12 }
 0xff8   :  { %v1551_v18 = vpack.c.bf16 %v1549_v21, %v1547_v14  ;;  %v3383_v21 = vld [vmem:[%s5220_s11 + $0x1] ss:$0 sm:$0xff]  ;;  %s4231_s11 = smov [#allocation5]  }
 0xffa   :  { %1719 = vmatprep.mubr.bf16.mxu1 %v1551_v18 }
 0xffb   :  { %1720 = vmatmul.mubr.bf16.vlgmr.msra.gmra.mrb[32].mxu1 %v1550_v15 }
 0xffc   :  { %3805 = vmatprep.mubr.msk.bf16.mxu1 %vm4225_vm0, %v4224_v0 }
0x10ce   :  { %v3610_v22 = vpop.f32.mrb[32].mxu1 }
0x10cf   :  { %v3611_v25 = vpop.f32.mrb[33].mxu1 }
0x10d0   :  { %v3612_v28 = vadd.f32 %v3611_v25, %v3610_v22  ;;  %v3613_v30 = vpop.f32.mrb[34].mxu1  ;;  %v3416_v25 = vld [vmem:[%s5222_s13 + $0x3] sm:$0x7]  ;;  %s3279_s13 = sshll.u32 %s4231_s11, 4  ;;  %s3280_s13 = int_to_ptr.vmem [resolvable:$true] %s3279_s13 }
0x10d1   :  { %v3614_v31 = vpop.f32.mrb[35].mxu1  ;;  %v1812_v16 = vrot.slane %v3416_v25, %v4532_v20  ;;  %p4200_p9 = scmp.lt.s32.totalorder %s3280_s13, %s3280_s13 }
0x10d2   :  { %v1722_v33 = vadd.f32 %v3612_v28, %v3363_v24  ;;  %v3615_v23 = vadd.f32 %v3614_v31, %v3613_v30  ;;  %v1816_v28 = vrot.slane %v3416_v25, %v4525_v17  ;;  %v1820_v30 = vrot.slane %v3416_v25, %v325_v19 }
0x10d4   :  { %v1725_v27 = vadd.f32 %v3615_v23, %v3363_v24  ;;  %v4810_v34 = vadd.f32 %v1722_v33, %v4687_v32  ;;  %v3988_v32 = vld [vmem:[%s5221_s12 + $0xc8] ss:$12 sps:$4 sm:$0xff]  }
0x10d5   :  { %3790 = vmatpush3.bf16.msra.mxu1 %v3988_v32 }
0x10d6   :  { %1734 = vadd.xlane.f32.xlu1 %v4810_v34  ;;  %v4814_v35 = vadd.f32 %v1725_v27, %v4690_v4  ;;  %v3989_v4 = vld [vmem:[%s5221_s12 + $0xd8] ss:$12 sps:$4 sm:$0xff]   ;;  %3791 = vmatprep.subr.bf16.mxu1 %v4224_v0 }
0x10d7   :  { %1955 = vmatpush1.bf16.msra.mxu0 %v3989_v4 }
0x10d8   :  { %1956 = vmatprep.subr.bf16.mxu0 %v3995_v49 }
0x10d9   :  { %3792 = vmatpush3.bf16.msra.mxu1 %v3992_v48 }
0x10da   :  { %1736 = vadd.xlane.f32.xlu1 %v4814_v35  ;;  %3793 = vmatprep.subr.bf16.mxu1 %v4224_v0 }
0x10db   :  { %1957 = vmatpush1.bf16.msra.mxu0 %v3993_v50 }
0x10dc   :  { %1958 = vmatprep.subr.bf16.mxu0 %v3999_v53 }
0x10dd   :  { %3794 = vmatpush3.bf16.msra.mxu1 %v3996_v51  ;;  %v4166_v51 = vld [vmem:[%s5260_s26] sm:$0xff] }
0x10de   :  { %3795 = vmatprep.subr.bf16.mxu1 %v4224_v0 }
0x10df   :  { %1959 = vmatpush1.bf16.msra.mxu0 %v3997_v54  ;;  %v4167_v54 = vld [vmem:[%s5261_s30] sm:$0xff] }
0x10e0   :  { %1960 = vmatprep.subr.bf16.mxu0 %v4003_v56  ;;  %v4168_v56 = vld [vmem:[%s5260_s26 + $0x8] sm:$0xff] }
0x10e1   :  { %3796 = vmatpush3.bf16.msra.mxu1 %v4000_v26 }
0x10e2   :  { %3797 = vmatprep.subr.bf16.mxu1 %v4224_v0 }
0x10e3   :  { %1961 = vmatpush1.bf16.msra.mxu0 %v4001_v57 }
0x10e4   :  { %1962 = vmatprep.subr.bf16.mxu0 %v4007_v58 }
0x10e5   :  { %3798 = vmatpush3.bf16.msra.mxu1 %v4004_v29  ;;  %v4169_v29 = vld [vmem:[%s5259_s27 + $0x8] sm:$0xff] }
0x10e6   :  { %3799 = vmatprep.subr.bf16.mxu1 %v4224_v0 }
0x10e7   :  { %1963 = vmatpush1.bf16.msra.mxu0 %v4005_v59 }
0x10e8   :  { %1964 = vmatprep.subr.bf16.mxu0 %v4011_v62 }
0x10e9   :  { %3800 = vmatpush3.bf16.msra.mxu1 %v4008_v61  ;;  %v4170_v61 = vld [vmem:[%s5261_s30 + $0x8] sm:$0xff] }
0x10ea   :  { %3801 = vmatprep.subr.bf16.mxu1 %v4224_v0 }
0x10eb   :  { %1965 = vmatpush1.bf16.msra.mxu0 %v4009_v63 }
0x10ec   :  { %1966 = vmatprep.subr.bf16.mxu0 %v4015_v2 }
0x10ed   :  { %3802 = vmatpush3.bf16.msra.mxu1 %v4012_v1 }
0x10ee   :  { %3803 = vmatprep.subr.bf16.mxu1 %v4224_v0 }
0x10ef   :  { %1967 = vmatpush1.bf16.msra.mxu0 %v4013_v3 }
0x10f0   :  { %3809 = vmatprep.subr.bf16.mxu0 %v4224_v0 }
0x10f1   :  { %3804 = vmatpush3.bf16.msra.mxu1 %v4016_v5 }
0x10f2   :  { %3815 = vmatprep.subr.bf16.mxu1 %v4224_v0 }
0x1163   :  { %v1735_v40 = vpop.xlane.xlu1 %1734 }
0x1164   :  { %v1738_v41 = vmul.f32 0.0078125, %v1735_v40 }
0x1166   :  { %v4834_v42 = vsub.f32 %v4810_v34, %v1738_v41 }
0x1167   :  { %v1737_v43 = vpop.xlane.xlu1 %1736 }
0x1168   :  { %v1739_v44 = vmul.f32 0.0078125, %v1737_v43  ;;  %v1742_v45 = vmul.f32 %v4834_v42, %v4834_v42 }
0x116a   :  { %v1741_v46 = vsub.f32 %v4814_v35, %v1739_v44  ;;  %1744 = vadd.xlane.f32.xlu0 %v1742_v45 }
0x116c   :  { %v1743_v47 = vmul.f32 %v1741_v46, %v1741_v46 }
0x116e   :  { %1746 = vadd.xlane.f32.xlu1 %v1743_v47  ;;  %v4165_v47 = vld [vmem:[%s5259_s27] sm:$0xff] }
0x11f7   :  { %v1745_v6 = vpop.xlane.xlu0 %1744 }
0x11f8   :  { %v1748_v7 = vmul.f32 0.0078125, %v1745_v6 }
0x11fa   :  { %v1750_v37 = vadd.f32 1e-05, %v1748_v7 }
0x11fb   :  { %v1747_v8 = vpop.xlane.xlu1 %1746 }
0x11fc   :  { %4113 = vrsqrt.f32 %v1750_v37  ;;  %v1749_v9 = vmul.f32 0.0078125, %v1747_v8 }
0x11fe   :  { %v1751_v10 = vadd.f32 1e-05, %v1749_v9 }
0x1200   :  { %4115 = vrsqrt.f32 %v1751_v10 }
0x1206   :  { %v4114_v52 = vpop.eup %4113 }
0x1207   :  { %v1754_v11 = vmul.f32 %v4114_v52, %v4834_v42 }
0x1209   :  { %v1762_v14 = vmul.f32 %v3382_v55, %v1754_v11 }
0x120a   :  { %v4116_v12 = vpop.eup %4115 }
0x120b   :  { %v1755_v13 = vmul.f32 %v4116_v12, %v1741_v46  ;;  %v1770_v18 = vadd.f32 %v3383_v21, %v1762_v14 }
0x120d   :  { %v1763_v15 = vmul.f32 %v3382_v55, %v1755_v13 }
0x120f   :  { %v1771_v22 = vadd.f32 %v3383_v21, %v1763_v15 }
0x1211   :  { %v1772_v24 = vpack.c.bf16 %v1771_v22, %v1770_v18 }
0x1213   :  { %1985 = vmatmul.mubr.bf16.vlgmr.msra.gmra.mrb[36].mxu0 %v1772_v24  ;;  %3806 = vmatmul.mubr.bf16.vlgmr.msra.gmra.mrb[36].mxu1 %v1772_v24 }
0x1214   :  { %3811 = vmatprep.mubr.msk.bf16.mxu0 %vm4225_vm0, %v4224_v0  ;;  %3817 = vmatprep.mubr.msk.bf16.mxu1 %vm4225_vm0, %v4224_v0 }
0x12e6   :  { %v1986_v31 = vpop.f32.mrb[36].mxu0  ;;  %v2029_v33 = vpop.f32.mrb[36].mxu1 }
0x12e7   :  { %v1988_v23 = vpop.f32.mrb[37].mxu0  ;;  %v3807_v27 = vpop.f32.mrb[37].mxu1  ;;  %v2030_v39 = vadd.f32 %v2029_v33, %v1820_v30  ;;  %v1987_v19 = vadd.f32 %v1986_v31, %v1812_v16  ;;  %v4975_v33 = vld [vmem:[%s5262_s6] sm:$0xff] }
0x12e8   :  { %v1989_v36 = vadd.f32 %v1988_v23, %v1816_v28  ;;  %v1990_v38 = vpop.f32.mrb[38].mxu0  ;;  %v2032_v32 = vpop.f32.mrb[38].mxu1 }
0x12e9   :  { %v2033_v4 = vadd.f32 %v2032_v32, %v1820_v30  ;;  %v1992_v40 = vpop.f32.mrb[39].mxu0  ;;  %v3808_v41 = vpop.f32.mrb[39].mxu1  ;;  %v1991_v44 = vadd.f32 %v1990_v38, %v1812_v16  ;;  %v2044_v9 = vmul.f32 %v4166_v51, %v1987_v19  ;;  %v4981_v38 = vld [vmem:[%s5262_s6 + $0x8] sm:$0xff]  ;;  %s5263_s6 = smov 64  }
0x12ea   :  { %v1993_v42 = vadd.f32 %v1992_v40, %v1816_v28  ;;  %2056 = vrot.lane.b32.xlu1 %v1989_v36, %s4228_s4  ;;  %v2064_v53 = vmul.f32 %v4166_v51, %v1989_v36 }
0x12eb   :  { %v4922_v43 = vpack.c.bf16 %v2033_v4, %v2030_v39  ;;  %v2045_v55 = vmul.f32 %v4168_v56, %v1991_v44 }
0x12ec   :  { %2062 = vrot.lane.b32.xlu0 %v1993_v42, %s4227_s8  ;;  %v2065_v57 = vmul.f32 %v4168_v56, %v1993_v42 }
0x12ed   :  { %3816 = vmatpush3.bf16.msra.mxu1 %v4922_v43 }
0x12ee   :  { %2060 = vrot.lane.b32.xlu1 %v1989_v36, %s4227_s8  ;;  %3827 = vmatprep.subr.bf16.mxu1 %v4224_v0 }
0x12f2   :  { %2058 = vrot.lane.b32.xlu1 %v1993_v42, %s4228_s4 }
0x12f6   :  { %2036 = vrot.lane.b32.xlu1 %v1987_v19, %s4228_s4 }
0x12fa   :  { %2038 = vrot.lane.b32.xlu1 %v1991_v44, %s4228_s4 }
0x12fe   :  { %2040 = vrot.lane.b32.xlu1 %v1987_v19, %s4227_s8 }
0x1302   :  { %2042 = vrot.lane.b32.xlu1 %v1991_v44, %s4227_s8 }
0x135c   :  { %v2057_v45 = vpop.permute.xlu1 %2056 }
0x135d   :  { %v2066_v48 = vmul.f32 %v4165_v47, %v2057_v45 }
0x135e   :  { %v2063_v49 = vpop.permute.xlu0 %2062 }
0x135f   :  { %v2068_v59 = vadd.f32 %v2066_v48, %v2064_v53  ;;  %v2071_v62 = vmul.f32 %v4170_v61, %v2063_v49 }
0x1360   :  { %v2061_v46 = vpop.permute.xlu1 %2060 }
0x1361   :  { %v2070_v26 = vmul.f32 %v4167_v54, %v2061_v46 }
0x1363   :  { %v2072_v2 = vadd.f32 %v2070_v26, %v2068_v59 }
0x1364   :  { %v2059_v50 = vpop.permute.xlu1 %2058 }
0x1365   :  { %v2067_v58 = vmul.f32 %v4169_v29, %v2059_v50 }
0x1367   :  { %v2069_v63 = vadd.f32 %v2067_v58, %v2065_v57 }
0x1368   :  { %v2037_v1 = vpop.permute.xlu1 %2036 }
0x1369   :  { %v2073_v3 = vadd.f32 %v2071_v62, %v2069_v63  ;;  %v2046_v37 = vmul.f32 %v4165_v47, %v2037_v1 }
0x136b   :  { %v4952_v5 = vpack.c.bf16 %v2073_v3, %v2072_v2  ;;  %v2048_v11 = vadd.f32 %v2046_v37, %v2044_v9 }
0x136c   :  { %v2039_v6 = vpop.permute.xlu1 %2038 }
0x136d   :  { %2213 = vrot.lane.b32.xlu1 %v4952_v5, %s4229_s5  ;;  %v2098_v7 = vsel %vm182_vm2, %v4952_v5, 0  ;;  %v2047_v10 = vmul.f32 %v4169_v29, %v2039_v6 }
0x136e   :  { %3810 = vmatpush3.bf16.xpose.msra.mxu0 %v2098_v7 }
0x136f   :  { %3821 = vmatprep.subr.bf16.mxu0 %v4224_v0  ;;  %v2049_v13 = vadd.f32 %v2047_v10, %v2045_v55 }
0x1370   :  { %v2041_v8 = vpop.permute.xlu1 %2040 }
0x1371   :  { %v2050_v52 = vmul.f32 %v4167_v54, %v2041_v8 }
0x1373   :  { %v2052_v14 = vadd.f32 %v2050_v52, %v2048_v11 }
0x1374   :  { %v2043_v12 = vpop.permute.xlu1 %2042 }
0x1375   :  { %v2051_v21 = vmul.f32 %v4170_v61, %v2043_v12  ;;  %v2054_v18 = vmul.f32 0.17677669, %v2052_v14  ;;  %v4019_v12 = vld [vmem:[#allocation2 + $0x50] sm:$0xff]  }
0x1377   :  { %v2053_v15 = vadd.f32 %v2051_v21, %v2049_v13  ;;  %v4020_v13 = vld [vmem:[#allocation2 + $0x58] sm:$0xff]  }
0x1379   :  { %v2055_v22 = vmul.f32 0.17677669, %v2053_v15 }
0x137b   :  { %v4959_v24 = vpack.c.bf16 %v2055_v22, %v2054_v18 }
0x137d   :  { %2210 = vrot.lane.b32.xlu1 %v4959_v24, %s4229_s5  ;;  %3812 = vmatmul.mubr.msk.bf16.vlgmr.msra.gmra.mrb[40].mxu0 %vm182_vm2, %v4959_v24 }
0x137e   :  { %3823 = vmatprep.mubr.msk.bf16.mxu0 %vm4225_vm0, %v4224_v0 }
0x13df   :  { %v2214_v25 = vpop.permute.xlu1 %2213 }
0x13e0   :  { %v2219_v28 = vsel %vm182_vm2, %v2214_v25, 0 }
0x13e1   :  { %3822 = vmatpush3.bf16.xpose.msra.mxu0 %v2219_v28 }
0x13e2   :  { %3833 = vmatprep.subr.bf16.mxu0 %v4224_v0 }
0x13ef   :  { %v2211_v30 = vpop.permute.xlu1 %2210 }
0x13f0   :  { %3824 = vmatmul.mubr.msk.bf16.vlgmr.msra.gmra.mrb[44].mxu0 %vm182_vm2, %v2211_v30  ;;  %v4017_v30 = vld [vmem:[#allocation2 + $0x40] sm:$0xff]  }
0x13f1   :  { %3837 = vmatprep.mubr.msk.bf16.mxu0 %vm4225_vm0, %v4224_v0  ;;  %3834 = vmatpush3.bf16.msra.mxu0 %v4019_v12  ;;  %v4021_v12 = vld [vmem:[#allocation2 + $0x60] sm:$0xff]  }
0x13f2   :  { %3835 = vmatprep.subr.bf16.mxu0 %v4224_v0 }
0x13f5   :  { %3836 = vmatpush3.bf16.msra.mxu0 %v4020_v13 }
0x13f6   :  { %3849 = vmatprep.subr.bf16.mxu0 %v4224_v0 }
0x1450   :  { %v2134_v31 = vpop.f32.mrb[40].mxu0 }
0x1451   :  { %v2135_v23 = vadd.f32 %v4975_v33, %v2134_v31  ;;  %v3813_v27 = vpop.f32.mrb[41].mxu0 }
0x1452   :  { %v2137_v36 = vpop.f32.mrb[42].mxu0 }
0x1453   :  { %v2138_v32 = vadd.f32 %v4981_v38, %v2137_v36  ;;  %v3814_v39 = vpop.f32.mrb[43].mxu0  ;;  %v2141_v4 = vsel %vm111_vm1, %v2135_v23, -inf }
0x1454   :  { %2142 = vmax.xlane.f32.xlu0 %v2141_v4 }
0x1455   :  { %v2144_v40 = vsel %vm111_vm1, %v2138_v32, -inf }
0x1456   :  { %2145 = vmax.xlane.f32.xlu1 %v2144_v40 }
0x14c3   :  { %v2255_v41 = vpop.f32.mrb[44].mxu0 }
0x14c4   :  { %v2256_v42 = vadd.f32 %v4975_v33, %v2255_v41  ;;  %v3825_v16 = vpop.f32.mrb[45].mxu0 }
0x14c5   :  { %v2258_v19 = vpop.f32.mrb[46].mxu0 }
0x14c6   :  { %v2259_v44 = vadd.f32 %v4981_v38, %v2258_v19  ;;  %v3826_v45 = vpop.f32.mrb[47].mxu0  ;;  %v2262_v46 = vsel %vm111_vm1, %v2256_v42, -inf }
0x14c7   :  { %2263 = vmax.xlane.f32.xlu0 %v2262_v46 }
0x14c8   :  { %v2265_v47 = vsel %vm111_vm1, %v2259_v44, -inf }
0x14cb   :  { %2266 = vmax.xlane.f32.xlu0 %v2265_v47 }
0x14e1   :  { %v2143_v48 = vpop.xlane.xlu0 %2142 }
0x14e2   :  { %v2147_v49 = vsub.f32 %v2135_v23, %v2143_v48  ;;  %v4018_v23 = vld [vmem:[#allocation2 + $0x48] sm:$0xff]  }
0x14e3   :  { %v2146_v50 = vpop.xlane.xlu1 %2145 }
0x14e4   :  { %v2149_v51 = vmul.f32 1.442695, %v2147_v49  ;;  %v2148_v53 = vsub.f32 %v2138_v32, %v2146_v50 }
0x14e6   :  { %4117 = vpow2.f32 %v2149_v51  ;;  %v2151_v54 = vmul.f32 1.442695, %v2148_v53 }
0x14e8   :  { %4119 = vpow2.f32 %v2151_v54 }
0x14f0   :  { %v4118_v26 = vpop.eup %4117 }
0x14f1   :  { %v2153_v56 = vsel %vm111_vm1, %v4118_v26, 0.0 }
0x14f2   :  { %v4120_v57 = vpop.eup %4119  ;;  %2154 = vadd.xlane.f32.xlu1 %v2153_v56 }
0x14f3   :  { %v2156_v29 = vsel %vm111_vm1, %v4120_v57, 0.0 }
0x14f4   :  { %2157 = vadd.xlane.f32.xlu0 %v2156_v29 }
0x1554   :  { %v2264_v58 = vpop.xlane.xlu0 %2263 }
0x1555   :  { %v2268_v59 = vsub.f32 %v2256_v42, %v2264_v58 }
0x1557   :  { %v2270_v61 = vmul.f32 1.442695, %v2268_v59 }
0x1558   :  { %v2267_v62 = vpop.xlane.xlu0 %2266 }
0x1559   :  { %4121 = vpow2.f32 %v2270_v61  ;;  %v2269_v63 = vsub.f32 %v2259_v44, %v2267_v62 }
0x155b   :  { %v2272_v1 = vmul.f32 1.442695, %v2269_v63 }
0x155d   :  { %4123 = vpow2.f32 %v2272_v1 }
0x1563   :  { %v4122_v2 = vpop.eup %4121 }
0x1564   :  { %v2274_v3 = vsel %vm111_vm1, %v4122_v2, 0.0 }
0x1565   :  { %2275 = vadd.xlane.f32.xlu1 %v2274_v3 }
0x1567   :  { %v4124_v6 = vpop.eup %4123 }
0x1568   :  { %v2277_v7 = vsel %vm111_vm1, %v4124_v6, 0.0 }
0x1569   :  { %2278 = vadd.xlane.f32.xlu0 %v2277_v7 }
0x1576   :  { %2286 = vrot.lane.b32.xlu1 %v4922_v43, %s4229_s5  ;;  %s5264_s5 = smov 32  }
0x157a   :  { %2446 = vrot.lane.b32.xlu1 %v4959_v24, %s5263_s6 }
0x157f   :  { %v2155_v37 = vpop.xlane.xlu1 %2154  ;;  %2448 = vrot.lane.b32.xlu0 %v4952_v5, %s5263_s6 }
0x1580   :  { %4125 = vrcp.f32 %v2155_v37 }
0x1581   :  { %v2158_v8 = vpop.xlane.xlu0 %2157 }
0x1582   :  { %4127 = vrcp.f32 %v2158_v8 }
0x158a   :  { %v4126_v9 = vpop.eup %4125 }
0x158b   :  { %v2161_v52 = vmul.f32 %v4126_v9, %v4118_v26 }
0x158c   :  { %v4128_v10 = vpop.eup %4127 }
0x158d   :  { %v2162_v11 = vmul.f32 %v4128_v10, %v4120_v57 }
0x158f   :  { %v2163_v55 = vpack.c.bf16 %v2162_v11, %v2161_v52 }
0x1591   :  { %3818 = vmatmul.mubr.msk.bf16.vlgmr.msra.gmra.mrb[40].mxu1 %vm111_vm1, %v2163_v55 }
0x1592   :  { %3829 = vmatprep.mubr.msk.bf16.mxu1 %vm4225_vm0, %v4224_v0 }
0x15f2   :  { %v2276_v14 = vpop.xlane.xlu1 %2275 }
0x15f3   :  { %4129 = vrcp.f32 %v2276_v14 }
0x15f6   :  { %v2287_v21 = vpop.permute.xlu1 %2286  ;;  %v2279_v15 = vpop.xlane.xlu0 %2278 }
0x15f7   :  { %4131 = vrcp.f32 %v2279_v15  ;;  %3828 = vmatpush3.bf16.msra.mxu1 %v2287_v21 }
0x15f8   :  { %3841 = vmatprep.subr.bf16.mxu1 %v4224_v0 }
0x15fa   :  { %v2449_v42 = vpop.permute.xlu0 %2448  ;;  %v2447_v46 = vpop.permute.xlu1 %2446 }
0x15fb   :  { %v2454_v45 = vsel %vm182_vm2, %v2449_v42, 0 }
0x15fd   :  { %v4130_v18 = vpop.eup %4129 }
0x15fe   :  { %v2282_v25 = vmul.f32 %v4130_v18, %v4122_v2 }
0x1601   :  { %v4132_v22 = vpop.eup %4131 }
0x1602   :  { %v2283_v28 = vmul.f32 %v4132_v22, %v4124_v6 }
0x1604   :  { %v2284_v31 = vpack.c.bf16 %v2283_v28, %v2282_v25 }
0x1606   :  { %3830 = vmatmul.mubr.msk.bf16.vlgmr.msra.gmra.mrb[44].mxu1 %vm111_vm1, %v2284_v31  ;;  %v4022_v31 = vld [vmem:[#allocation2 + $0x68] sm:$0xff]  }
0x1607   :  { %3842 = vmatpush3.bf16.msra.mxu1 %v4017_v30  ;;  %3845 = vmatprep.mubr.msk.bf16.mxu1 %vm4225_vm0, %v4224_v0 }
0x1608   :  { %3843 = vmatprep.subr.bf16.mxu1 %v4224_v0 }
0x160b   :  { %3844 = vmatpush3.bf16.msra.mxu1 %v4018_v23 }
0x160c   :  { %3855 = vmatprep.subr.bf16.mxu1 %v4224_v0 }
0x1664   :  { %v2201_v27 = vpop.f32.mrb[40].mxu1 }
0x1665   :  { %v3819_v36 = vpop.f32.mrb[41].mxu1 }
0x1666   :  { %v2204_v32 = vpop.f32.mrb[42].mxu1 }
0x1667   :  { %v2208_v39 = vpack.c.bf16 %v2204_v32, %v2201_v27  ;;  %v3820_v4 = vpop.f32.mrb[43].mxu1 }
0x1669   :  { %3846 = vmatmul.mubr.msk.bf16.vlgmr.msra.gmra.mrb[48].mxu1 %vm182_vm2, %v2208_v39 }
0x166a   :  { %3857 = vmatprep.mubr.msk.bf16.mxu1 %vm4225_vm0, %v4224_v0 }
0x16d9   :  { %v2326_v40 = vpop.f32.mrb[44].mxu1 }
0x16da   :  { %v3831_v41 = vpop.f32.mrb[45].mxu1 }
0x16db   :  { %v2329_v16 = vpop.f32.mrb[46].mxu1 }
0x16dc   :  { %v2333_v19 = vpack.c.bf16 %v2329_v16, %v2326_v40  ;;  %v3832_v44 = vpop.f32.mrb[47].mxu1 }
0x16de   :  { %3838 = vmatmul.mubr.msk.bf16.vlgmr.msra.gmra.mrb[48].mxu0 %vm182_vm2, %v2333_v19 }
0x16df   :  { %3850 = vmatpush3.bf16.xpose.msra.mxu0 %v2454_v45  ;;  %3851 = vmatprep.mubr.msk.bf16.mxu0 %vm4225_vm0, %v4224_v0 }
0x16e0   :  { %3861 = vmatprep.subr.bf16.mxu0 %v4224_v0 }
0x16e6   :  { %3852 = vmatmul.mubr.msk.bf16.vlgmr.msra.gmra.mrb[52].mxu0 %vm182_vm2, %v2447_v46 }
0x16e7   :  { %3865 = vmatprep.mubr.msk.bf16.mxu0 %vm4225_vm0, %v4224_v0  ;;  %3862 = vmatpush3.bf16.msra.mxu0 %v4021_v12 }
0x16e8   :  { %3863 = vmatprep.subr.bf16.mxu0 %v4224_v0 }
0x16eb   :  { %3864 = vmatpush3.bf16.msra.mxu0 %v4022_v31 }
0x16ec   :  { %3875 = vmatprep.subr.bf16.mxu0 %v4224_v0 }
0x173c   :  { %v2439_v47 = vpop.f32.mrb[48].mxu1 }
0x173d   :  { %v3847_v48 = vpop.f32.mrb[49].mxu1 }
0x173e   :  { %v2442_v49 = vpop.f32.mrb[50].mxu1 }
0x173f   :  { %v3848_v50 = vpop.f32.mrb[51].mxu1 }
0x17b1   :  { %v2383_v51 = vpop.f32.mrb[48].mxu0 }
0x17b2   :  { %v5022_v53 = vadd.f32 %v2439_v47, %v2383_v51  ;;  %v3839_v54 = vpop.f32.mrb[49].mxu0 }
0x17b3   :  { %v2386_v26 = vpop.f32.mrb[50].mxu0 }
0x17b4   :  { %v5024_v56 = vadd.f32 %v2442_v49, %v2386_v26  ;;  %v3840_v57 = vpop.f32.mrb[51].mxu0 }
0x17b9   :  { %v2490_v29 = vpop.f32.mrb[52].mxu0 }
0x17ba   :  { %v2491_v58 = vadd.f32 %v4975_v33, %v2490_v29  ;;  %v3853_v59 = vpop.f32.mrb[53].mxu0  ;;  %v4023_v29 = vld [vmem:[#allocation2 + $0x70] sm:$0xff]  }
0x17bb   :  { %v2493_v61 = vpop.f32.mrb[54].mxu0 }
0x17bc   :  { %v2494_v62 = vadd.f32 %v4981_v38, %v2493_v61  ;;  %v3854_v63 = vpop.f32.mrb[55].mxu0  ;;  %v2497_v1 = vsel %vm111_vm1, %v2491_v58, -inf }
0x17bd   :  { %2498 = vmax.xlane.f32.xlu1 %v2497_v1 }
0x17be   :  { %v2500_v2 = vsel %vm111_vm1, %v2494_v62, -inf }
0x17bf   :  { %2501 = vmax.xlane.f32.xlu0 %v2500_v2 }
0x184a   :  { %v2499_v3 = vpop.xlane.xlu1 %2498 }
0x184b   :  { %v2503_v6 = vsub.f32 %v2491_v58, %v2499_v3 }
0x184c   :  { %v2502_v7 = vpop.xlane.xlu0 %2501 }
0x184d   :  { %v2505_v37 = vmul.f32 1.442695, %v2503_v6  ;;  %v2504_v8 = vsub.f32 %v2494_v62, %v2502_v7 }
0x184f   :  { %4133 = vpow2.f32 %v2505_v37  ;;  %v2507_v9 = vmul.f32 1.442695, %v2504_v8 }
0x1851   :  { %4135 = vpow2.f32 %v2507_v9 }
0x1859   :  { %v4134_v10 = vpop.eup %4133 }
0x185a   :  { %v2509_v52 = vsel %vm111_vm1, %v4134_v10, 0.0 }
0x185b   :  { %v4136_v11 = vpop.eup %4135  ;;  %2510 = vadd.xlane.f32.xlu0 %v2509_v52 }
0x185c   :  { %v2512_v55 = vsel %vm111_vm1, %v4136_v11, 0.0 }
0x185d   :  { %2513 = vadd.xlane.f32.xlu1 %v2512_v55 }
0x186e   :  { %2628 = vrot.lane.b32.xlu1 %v4952_v5, %s5264_s5 }
0x1871   :  { %2520 = vrot.lane.b32.xlu0 %v4922_v43, %s5263_s6 }
0x1872   :  { %2626 = vrot.lane.b32.xlu1 %v4959_v24, %s5264_s5 }
0x18e8   :  { %v2511_v13 = vpop.xlane.xlu0 %2510 }
0x18e9   :  { %4137 = vrcp.f32 %v2511_v13 }
0x18ea   :  { %v2514_v14 = vpop.xlane.xlu1 %2513 }
0x18eb   :  { %4139 = vrcp.f32 %v2514_v14  ;;  %v3462_v14 = vld [vmem:[%s5224_s15 + $0x1] ss:$0 sm:$0xff]  ;;  %s4195_s15 = scalar_lea.vmem %s3280_s13, 256 }
0x18ec   :  { %v2521_v21 = vpop.permute.xlu0 %2520  ;;  %p4196_p8 = scmp.ne.s32.totalorder %s3280_s13, %s4195_s15  ;;  %p4201_p10 = scmp.lt.s32.totalorder %s4195_s15, %s4195_s15 }
0x18ed   :  { %3856 = vmatpush3.bf16.msra.mxu1 %v2521_v21 }
0x18ee   :  { %3869 = vmatprep.subr.bf16.mxu1 %v4224_v0  ;;  %v2629_v25 = vpop.permute.xlu1 %2628  ;;  %p4202_p11 = por %p4201_p10, %p4200_p9 }
0x18ef   :  { %v2634_v24 = vsel %vm182_vm2, %v2629_v25, 0  ;;  %v4025_v25 = vld [vmem:[%s5227_s18 + $0x80] ss:$8 sps:$4 sm:$0xff]  }
0x18f0   :  { %p4203_p12 = pnand %p4202_p11, %p4196_p8 }
0x18f2   :  { %v2627_v30 = vpop.permute.xlu1 %2626 }
0x18f3   :  { %v4138_v15 = vpop.eup %4137 }
0x18f4   :  { %v2517_v18 = vmul.f32 %v4138_v15, %v4134_v10 }
0x18f5   :  { %v4140_v5 = vpop.eup %4139 }
0x18f6   :  { %v2518_v22 = vmul.f32 %v4140_v5, %v4136_v11 }
0x18f8   :  { %v2519_v28 = vpack.c.bf16 %v2518_v22, %v2517_v18 }
0x18fa   :  { %3858 = vmatmul.mubr.msk.bf16.vlgmr.msra.gmra.mrb[52].mxu1 %vm111_vm1, %v2519_v28  ;;  %v4028_v28 = vld [vmem:[%s5227_s18 + $0x90] ss:$8 sps:$4 sm:$0xff]  }
0x18fb   :  { %3870 = vmatpush3.bf16.xpose.msra.mxu1 %v2634_v24  ;;  %3871 = vmatprep.mubr.msk.bf16.mxu1 %vm4225_vm0, %v4224_v0 }
0x18fc   :  { %3881 = vmatprep.subr.bf16.mxu1 %v4224_v0 }
0x1902   :  { %3872 = vmatmul.mubr.msk.bf16.vlgmr.msra.gmra.mrb[56].mxu1 %vm182_vm2, %v2627_v30 }
0x1903   :  { %3885 = vmatprep.mubr.msk.bf16.mxu1 %vm4225_vm0, %v4224_v0  ;;  %3882 = vmatpush3.bf16.msra.mxu1 %v4023_v29 }
0x1904   :  { %3883 = vmatprep.subr.bf16.mxu1 %v4224_v0 }
0x19cd   :  { %v2560_v23 = vpop.f32.mrb[52].mxu1 }
0x19ce   :  { %v3859_v27 = vpop.f32.mrb[53].mxu1 }
0x19cf   :  { %v2563_v36 = vpop.f32.mrb[54].mxu1 }
0x19d0   :  { %v2567_v32 = vpack.c.bf16 %v2563_v36, %v2560_v23  ;;  %v3860_v39 = vpop.f32.mrb[55].mxu1 }
0x19d2   :  { %3866 = vmatmul.mubr.msk.bf16.vlgmr.msra.gmra.mrb[56].mxu0 %vm182_vm2, %v2567_v32 }
0x19d3   :  { %3877 = vmatprep.mubr.msk.bf16.mxu0 %vm4225_vm0, %v4224_v0  ;;  %v4024_v0 = vld [vmem:[#allocation2 + $0x78] sm:$0xff]  }
0x19d4   :  { %3884 = vmatpush3.bf16.msra.mxu1 %v4024_v0  ;;  %v4053_v0 = vld [vmem:[%s5229_s20 + $0xd0] sm:$0xff]  }
0x19d5   :  { %v2670_v4 = vpop.f32.mrb[56].mxu1 }
0x19d6   :  { %v2671_v40 = vadd.f32 %v4975_v33, %v2670_v4  ;;  %v3873_v41 = vpop.f32.mrb[57].mxu1  ;;  %v4033_v4 = vld [vmem:[%s5227_s18 + $0xa4] ss:$8 sps:$4 sm:$0xff]  }
0x19d7   :  { %v2673_v42 = vpop.f32.mrb[58].mxu1  ;;  %v4036_v41 = vld [vmem:[%s5227_s18 + $0xb4] ss:$8 sps:$4 sm:$0xff]  }
0x19d8   :  { %v2674_v16 = vadd.f32 %v4981_v38, %v2673_v42  ;;  %v3874_v19 = vpop.f32.mrb[59].mxu1  ;;  %v2677_v44 = vsel %vm111_vm1, %v2671_v40, -inf  ;;  %v4034_v42 = vld [vmem:[%s5227_s18 + $0xb0] ss:$8 sps:$4 sm:$0xff]  }
0x19d9   :  { %2678 = vmax.xlane.f32.xlu0 %v2677_v44  ;;  %v4037_v19 = vld [vmem:[%s5227_s18 + $0xc0] ss:$8 sps:$4 sm:$0xff]   ;;  %v4042_v44 = vld [vmem:[%s5227_s18 + $0xd4] ss:$8 sps:$4 sm:$0xff]  }
0x19da   :  { %v2680_v45 = vsel %vm111_vm1, %v2674_v16, -inf }
0x19db   :  { %2681 = vmax.xlane.f32.xlu1 %v2680_v45  ;;  %v4040_v45 = vld [vmem:[%s5227_s18 + $0xd0] ss:$8 sps:$4 sm:$0xff]  }
0x19ec   :  { %2700 = vrot.lane.b32.xlu1 %v4922_v43, %s5264_s5 }
0x1a66   :  { %v2679_v46 = vpop.xlane.xlu0 %2678 }
0x1a67   :  { %v2683_v47 = vsub.f32 %v2671_v40, %v2679_v46  ;;  %v4031_v40 = vld [vmem:[%s5227_s18 + $0xa0] ss:$8 sps:$4 sm:$0xff]   ;;  %v4045_v46 = vld [vmem:[%s5227_s18 + $0xe4] ss:$8 sps:$4 sm:$0xff]  }
0x1a68   :  { %v2682_v48 = vpop.xlane.xlu1 %2681 }
0x1a69   :  { %v2685_v49 = vmul.f32 1.442695, %v2683_v47  ;;  %v2684_v50 = vsub.f32 %v2674_v16, %v2682_v48  ;;  %v4039_v16 = vld [vmem:[%s5227_s18 + $0xc4] ss:$8 sps:$4 sm:$0xff]   ;;  %v4043_v47 = vld [vmem:[%s5227_s18 + $0xe0] ss:$8 sps:$4 sm:$0xff]  }
0x1a6a   :  { %v4048_v48 = vld [vmem:[%s5227_s18 + $0xf4] ss:$8 sps:$4 sm:$0xff]  }
0x1a6b   :  { %4141 = vpow2.f32 %v2685_v49  ;;  %v2687_v33 = vmul.f32 1.442695, %v2684_v50  ;;  %v4046_v49 = vld [vmem:[%s5227_s18 + $0xf0] ss:$8 sps:$4 sm:$0xff]  }
0x1a6c   :  { %v2701_v51 = vpop.permute.xlu1 %2700 }
0x1a6d   :  { %4143 = vpow2.f32 %v2687_v33  ;;  %3876 = vmatpush3.bf16.msra.mxu0 %v2701_v51 }
0x1a75   :  { %v4142_v38 = vpop.eup %4141 }
0x1a76   :  { %v2689_v54 = vsel %vm111_vm1, %v4142_v38, 0.0 }
0x1a77   :  { %v4144_v26 = vpop.eup %4143  ;;  %2690 = vadd.xlane.f32.xlu0 %v2689_v54 }
0x1a78   :  { %v2692_v57 = vsel %vm111_vm1, %v4144_v26, 0.0 }
0x1a7b   :  { %2693 = vadd.xlane.f32.xlu0 %v2692_v57 }
0x1aa5   :  { %v2617_v43 = vpop.f32.mrb[56].mxu0 }
0x1aa6   :  { %v2624_v58 = vadd.f32 %v2617_v43, %v5022_v53  ;;  %v3867_v59 = vpop.f32.mrb[57].mxu0  ;;  %v3465_v43 = vld [vmem:[%s5225_s16 + $0x1] ss:$0 sm:$0xff] }
0x1aa7   :  { %v2620_v61 = vpop.f32.mrb[58].mxu0 }
0x1aa8   :  { %v2625_v62 = vadd.f32 %v2620_v61, %v5024_v56  ;;  %v3868_v63 = vpop.f32.mrb[59].mxu0 }
0x1b04   :  { %v2691_v1 = vpop.xlane.xlu0 %2690 }
0x1b05   :  { %4145 = vrcp.f32 %v2691_v1 }
0x1b08   :  { %v2694_v2 = vpop.xlane.xlu0 %2693 }
0x1b09   :  { %4147 = vrcp.f32 %v2694_v2 }
0x1b0f   :  { %v4146_v3 = vpop.eup %4145 }
0x1b10   :  { %v2697_v7 = vmul.f32 %v4146_v3, %v4142_v38 }
0x1b13   :  { %v4148_v6 = vpop.eup %4147 }
0x1b14   :  { %v2698_v37 = vmul.f32 %v4148_v6, %v4144_v26  ;;  %v4049_v6 = vld [vmem:[%s5229_s20 + $0xc0] sm:$0xff]  }
0x1b15   :  { %3653 = vmatprep.subr.bf16.mxu1 %v4049_v6 }
0x1b16   :  { %v2699_v8 = vpack.c.bf16 %v2698_v37, %v2697_v7  ;;  %v4050_v7 = vld [vmem:[%s5229_s20 + $0x80] sm:$0xff]   ;;  %v4051_v37 = vld [vmem:[%s5229_s20 + $0xc8] sm:$0xff]  }
0x1b18   :  { %3878 = vmatmul.mubr.msk.bf16.vlgmr.msra.gmra.mrb[60].mxu0 %vm111_vm1, %v2699_v8  ;;  %v4052_v8 = vld [vmem:[%s5229_s20 + $0x88] sm:$0xff]  }
0x1b19   :  { %3003 = vmatprep.mubr.bf16.mxu0 %v4226_v60 }
0x1beb   :  { %v2740_v53 = vpop.f32.mrb[60].mxu0 }
0x1bec   :  { %v3879_v9 = vpop.f32.mrb[61].mxu0 }
0x1bed   :  { %v2743_v10 = vpop.f32.mrb[62].mxu0  ;;  %v4055_v9 = vld [vmem:[%s5229_s20 + $0xd8] sm:$0xff]  }
0x1bee   :  { %v2747_v56 = vpack.c.bf16 %v2743_v10, %v2740_v53  ;;  %v3880_v52 = vpop.f32.mrb[63].mxu0  ;;  %v4054_v53 = vld [vmem:[%s5229_s20 + $0x90] sm:$0xff]   ;;  %v4056_v10 = vld [vmem:[%s5229_s20 + $0x98] sm:$0xff]  }
0x1bef   :  { %v4058_v52 = vld [vmem:[%s5229_s20 + $0xa0] sm:$0xff]  }
0x1bf0   :  { %3886 = vmatmul.mubr.msk.bf16.vlgmr.msra.gmra.mrb[60].mxu1 %vm182_vm2, %v2747_v56  ;;  %v4057_v56 = vld [vmem:[%s5229_s20 + $0xe0] sm:$0xff]  }
0x1bf1   :  { %3654 = vmatpush3.bf16.msra.mxu1 %v4050_v7 }
0x1bf2   :  { %3655 = vmatprep.subr.bf16.mxu1 %v4051_v37 }
0x1bf5   :  { %3656 = vmatpush3.bf16.msra.mxu1 %v4052_v8 }
0x1bf6   :  { %3657 = vmatprep.subr.bf16.mxu1 %v4053_v0  ;;  %v3533_v0 = vld [vmem:[%s5230_s21 + $0x1] ss:$0 sm:$0xff] }
0x1bf9   :  { %3658 = vmatpush3.bf16.msra.mxu1 %v4054_v53 }
0x1bfa   :  { %3659 = vmatprep.subr.bf16.mxu1 %v4055_v9 }
0x1bfd   :  { %3660 = vmatpush3.bf16.msra.mxu1 %v4056_v10 }
0x1bfe   :  { %3661 = vmatprep.subr.bf16.mxu1 %v4057_v56 }
0x1c01   :  { %3662 = vmatpush3.bf16.msra.mxu1 %v4058_v52 }
0x1cc3   :  { %v2797_v11 = vpop.f32.mrb[60].mxu1 }
0x1cc4   :  { %v2804_v55 = vadd.f32 %v2797_v11, %v2624_v58  ;;  %v3887_v12 = vpop.f32.mrb[61].mxu1  ;;  %v4059_v11 = vld [vmem:[%s5229_s20 + $0xe8] sm:$0xff]  }
0x1cc5   :  { %v2800_v13 = vpop.f32.mrb[62].mxu1  ;;  %3663 = vmatprep.subr.bf16.mxu1 %v4059_v11  ;;  %v4061_v12 = vld [vmem:[%s5229_s20 + $0xf0] sm:$0xff]  }
0x1cc6   :  { %v2806_v21 = vadd.f32 %v2804_v55, %v4810_v34  ;;  %v2805_v60 = vadd.f32 %v2800_v13, %v2625_v62  ;;  %v3888_v15 = vpop.f32.mrb[63].mxu1  ;;  %v4027_v34 = vld [vmem:[%s5227_s18 + $0x84] ss:$8 sps:$4 sm:$0xff]   ;;  %v3466_v62 = vld [vmem:[%s5226_s17 + $0x1] ss:$0 sm:$0xff]  ;;  %v4062_v13 = vld [vmem:[%s5229_s20 + $0xb0] sm:$0xff]  }
0x1cc7   :  { %2971 = vmatprep.subr.bf16.mxu0 %v4027_v34  ;;  %v4060_v55 = vld [vmem:[%s5229_s20 + $0xa8] sm:$0xff]  }
0x1cc8   :  { %v2807_v5 = vadd.f32 %v2805_v60, %v4814_v35  ;;  %v5071_v18 = vadd.f32 %v3462_v14, %v2806_v21  ;;  %v4030_v35 = vld [vmem:[%s5227_s18 + $0x94] ss:$8 sps:$4 sm:$0xff]   ;;  %2972 = vmatpush1.bf16.msra.mxu0 %v4025_v25  ;;  %3664 = vmatpush3.bf16.msra.mxu1 %v4060_v55  ;;  %v3483_v60 = vld [vmem:[%s5228_s19 + $0x2] sm:$0x3] }
0x1cc9   :  { %2973 = vmatprep.subr.bf16.mxu0 %v4030_v35  ;;  %3665 = vmatprep.subr.bf16.mxu1 %v4061_v12  ;;  %v4064_v21 = vld [vmem:[%s5229_s20 + $0xb8] sm:$0xff]   ;;  %v2884_v15 = vrot.slane %v3483_v60, %v4532_v20 }
0x1cca   :  { %2822 = vadd.xlane.f32.xlu0 %v5071_v18  ;;  %v5074_v22 = vadd.f32 %v3462_v14, %v2807_v5  ;;  %v4063_v14 = vld [vmem:[%s5229_s20 + $0xf8] sm:$0xff]   ;;  %v2888_v5 = vrot.slane %v3483_v60, %v4525_v17 }
0x1ccc   :  { %2974 = vmatpush1.bf16.msra.mxu0 %v4028_v28  ;;  %3666 = vmatpush3.bf16.msra.mxu1 %v4062_v13 }
0x1ccd   :  { %2975 = vmatprep.subr.bf16.mxu0 %v4033_v4  ;;  %3667 = vmatprep.subr.bf16.mxu1 %v4063_v14 }
0x1cce   :  { %2824 = vadd.xlane.f32.xlu0 %v5074_v22 }
0x1cd0   :  { %2976 = vmatpush1.bf16.msra.mxu0 %v4031_v40  ;;  %3668 = vmatpush3.bf16.msra.mxu1 %v4064_v21 }
0x1cd1   :  { %2977 = vmatprep.subr.bf16.mxu0 %v4036_v41 }
0x1cd4   :  { %2978 = vmatpush1.bf16.msra.mxu0 %v4034_v42 }
0x1cd5   :  { %2979 = vmatprep.subr.bf16.mxu0 %v4039_v16 }
0x1cd8   :  { %2980 = vmatpush1.bf16.msra.mxu0 %v4037_v19 }
0x1cd9   :  { %2981 = vmatprep.subr.bf16.mxu0 %v4042_v44 }
0x1cdc   :  { %2982 = vmatpush1.bf16.msra.mxu0 %v4040_v45 }
0x1cdd   :  { %2983 = vmatprep.subr.bf16.mxu0 %v4045_v46 }
0x1ce0   :  { %2984 = vmatpush1.bf16.msra.mxu0 %v4043_v47 }
0x1ce1   :  { %2985 = vmatprep.subr.bf16.mxu0 %v4048_v48 }
0x1ce4   :  { %2986 = vmatpush1.bf16.msra.mxu0 %v4046_v49 }
0x1d57   :  { %v2823_v24 = vpop.xlane.xlu0 %2822 }
0x1d58   :  { %v2826_v30 = vmul.f32 0.0078125, %v2823_v24 }
0x1d5a   :  { %v2828_v31 = vsub.f32 %v5071_v18, %v2826_v30 }
0x1d5b   :  { %v2825_v23 = vpop.xlane.xlu0 %2824 }
0x1d5c   :  { %v2827_v27 = vmul.f32 0.0078125, %v2825_v23  ;;  %v2830_v36 = vmul.f32 %v2828_v31, %v2828_v31 }
0x1d5e   :  { %v2829_v32 = vsub.f32 %v5074_v22, %v2827_v27  ;;  %2832 = vadd.xlane.f32.xlu0 %v2830_v36 }
0x1d60   :  { %v2831_v39 = vmul.f32 %v2829_v32, %v2829_v32 }
0x1d62   :  { %2834 = vadd.xlane.f32.xlu0 %v2831_v39 }
0x1deb   :  { %v2833_v50 = vpop.xlane.xlu0 %2832 }
0x1dec   :  { %v2836_v33 = vmul.f32 0.0078125, %v2833_v50 }
0x1dee   :  { %v2838_v51 = vadd.f32 1e-05, %v2836_v33 }
0x1def   :  { %v2835_v38 = vpop.xlane.xlu0 %2834 }
0x1df0   :  { %4149 = vrsqrt.f32 %v2838_v51  ;;  %v2837_v54 = vmul.f32 0.0078125, %v2835_v38 }
0x1df2   :  { %v2839_v26 = vadd.f32 1e-05, %v2837_v54 }
0x1df4   :  { %4151 = vrsqrt.f32 %v2839_v26 }
0x1dfa   :  { %v4150_v57 = vpop.eup %4149 }
0x1dfb   :  { %v2842_v29 = vmul.f32 %v4150_v57, %v2828_v31 }
0x1dfd   :  { %v2850_v61 = vmul.f32 %v3465_v43, %v2842_v29 }
0x1dfe   :  { %v4152_v58 = vpop.eup %4151 }
0x1dff   :  { %v2843_v59 = vmul.f32 %v4152_v58, %v2829_v32  ;;  %v2858_v1 = vadd.f32 %v3466_v62, %v2850_v61 }
0x1e01   :  { %v2851_v63 = vmul.f32 %v3465_v43, %v2843_v59 }
0x1e03   :  { %v2859_v2 = vadd.f32 %v3466_v62, %v2851_v63 }
0x1e05   :  { %v2860_v3 = vpack.c.bf16 %v2859_v2, %v2858_v1 }
0x1e07   :  { %3004 = vmatmul.mubr.bf16.vlgmr.msra.gmra.mrb[64].mxu0 %v2860_v3 }
0x1eda   :  { %v3005_v25 = vpop.f32.mrb[64].mxu0 }
0x1edb   :  { %v3006_v34 = vadd.f32 %v3005_v25, %v2884_v15  ;;  %v3007_v35 = vpop.f32.mrb[65].mxu0 }
0x1edc   :  { %v3008_v28 = vadd.f32 %v3007_v35, %v2888_v5  ;;  %v3009_v24 = vpop.f32.mrb[66].mxu0 }
0x1edd   :  { %v3014_v30 = vmul.f32 %v3006_v34, %v3006_v34  ;;  %v3010_v31 = vadd.f32 %v3009_v24, %v2884_v15  ;;  %v3011_v23 = vpop.f32.mrb[67].mxu0 }
0x1ede   :  { %v3015_v27 = vmul.f32 %v3008_v28, %v3008_v28  ;;  %v3012_v36 = vadd.f32 %v3011_v23, %v2888_v5 }
0x1edf   :  { %v3018_v32 = vmul.f32 %v3014_v30, %v3006_v34  ;;  %v3016_v39 = vmul.f32 %v3010_v31, %v3010_v31 }
0x1ee0   :  { %v3019_v4 = vmul.f32 %v3015_v27, %v3008_v28  ;;  %v3017_v40 = vmul.f32 %v3012_v36, %v3012_v36  ;;  %v3550_v27 = vld [vmem:[%s5231_s22] ss:$0 sm:$0xff] }
0x1ee1   :  { %v3022_v41 = vmul.f32 0.044715, %v3018_v32  ;;  %v3020_v42 = vmul.f32 %v3016_v39, %v3010_v31  ;;  %v3551_v32 = vld [vmem:[%s5232_s23] ss:$0 sm:$0xff] }
0x1ee2   :  { %v3023_v16 = vmul.f32 0.044715, %v3019_v4  ;;  %v3021_v20 = vmul.f32 %v3017_v40, %v3012_v36 }
0x1ee3   :  { %v3026_v19 = vadd.f32 %v3022_v41, %v3006_v34  ;;  %v3024_v17 = vmul.f32 0.044715, %v3020_v42 }
0x1ee4   :  { %v3027_v44 = vadd.f32 %v3023_v16, %v3008_v28  ;;  %v3025_v45 = vmul.f32 0.044715, %v3021_v20 }
0x1ee5   :  { %v3030_v46 = vmul.f32 0.7978846, %v3026_v19  ;;  %v3028_v47 = vadd.f32 %v3024_v17, %v3010_v31 }
0x1ee6   :  { %v3031_v48 = vmul.f32 0.7978846, %v3027_v44  ;;  %v3029_v49 = vadd.f32 %v3025_v45, %v3012_v36 }
0x1ee7   :  { %4153 = vtanh.f32 %v3030_v46  ;;  %v3032_v50 = vmul.f32 0.7978846, %v3028_v47 }
0x1ee8   :  { %4155 = vtanh.f32 %v3031_v48  ;;  %v3033_v33 = vmul.f32 0.7978846, %v3029_v49 }
0x1ee9   :  { %4157 = vtanh.f32 %v3032_v50 }
0x1eea   :  { %4159 = vtanh.f32 %v3033_v33 }
0x1ef1   :  { %v4154_v51 = vpop.eup %4153 }
0x1ef2   :  { %v4156_v38 = vpop.eup %4155  ;;  %v3038_v54 = vadd.f32 1.0, %v4154_v51 }
0x1ef3   :  { %v4158_v26 = vpop.eup %4157  ;;  %v3039_v57 = vadd.f32 1.0, %v4156_v38 }
0x1ef4   :  { %v4160_v29 = vpop.eup %4159  ;;  %v3042_v43 = vmul.f32 0.5, %v3038_v54  ;;  %v3040_v58 = vadd.f32 1.0, %v4158_v26 }
0x1ef5   :  { %v3041_v59 = vadd.f32 1.0, %v4160_v29  ;;  %v3043_v61 = vmul.f32 0.5, %v3039_v57 }
0x1ef6   :  { %v3044_v62 = vmul.f32 0.5, %v3040_v58  ;;  %v3046_v1 = vmul.f32 %v3042_v43, %v3006_v34 }
0x1ef7   :  { %v3045_v63 = vmul.f32 0.5, %v3041_v59  ;;  %v3047_v3 = vmul.f32 %v3043_v61, %v3008_v28 }
0x1ef8   :  { %v3048_v2 = vmul.f32 %v3044_v62, %v3010_v31 }
0x1ef9   :  { %v3049_v6 = vmul.f32 %v3045_v63, %v3012_v36 }
0x1efa   :  { %v3050_v7 = vpack.c.bf16 %v3048_v2, %v3046_v1 }
0x1efb   :  { %v3051_v37 = vpack.c.bf16 %v3049_v6, %v3047_v3 }
0x1efd   :  { %3221 = vmatprep.mubr.bf16.mxu1 %v3051_v37 }
0x1efe   :  { %3222 = vmatmul.mubr.bf16.vlgmr.msra.gmra.mrb[64].mxu1 %v3050_v7 }
0x1fd1   :  { %v3669_v8 = vpop.f32.mrb[64].mxu1 }
0x1fd2   :  { %v3670_v53 = vpop.f32.mrb[65].mxu1 }
0x1fd3   :  { %v3671_v9 = vadd.f32 %v3670_v53, %v3669_v8  ;;  %v3672_v10 = vpop.f32.mrb[66].mxu1 }
0x1fd4   :  { %v3673_v56 = vpop.f32.mrb[67].mxu1 }
0x1fd5   :  { %v3224_v52 = vadd.f32 %v3671_v9, %v3533_v0  ;;  %v3674_v11 = vadd.f32 %v3673_v56, %v3672_v10 }
0x1fd7   :  { %v3227_v55 = vadd.f32 %v3674_v11, %v3533_v0  ;;  %v3230_v12 = vadd.f32 %v3224_v52, %v5071_v18 }
0x1fd9   :  { %3234 = vadd.xlane.f32.xlu0 %v3230_v12  ;;  %v3231_v13 = vadd.f32 %v3227_v55, %v5074_v22 }
0x1fdb   :  { %3236 = vadd.xlane.f32.xlu1 %v3231_v13 }
0x2066   :  { %v3235_v14 = vpop.xlane.xlu0 %3234 }
0x2067   :  { %v3238_v21 = vmul.f32 0.0078125, %v3235_v14 }
0x2068   :  { %v3237_v60 = vpop.xlane.xlu1 %3236 }
0x2069   :  { %v3240_v15 = vsub.f32 %v3230_v12, %v3238_v21  ;;  %v3239_v5 = vmul.f32 0.0078125, %v3237_v60 }
0x206b   :  { %v3241_v25 = vsub.f32 %v3231_v13, %v3239_v5  ;;  %v3242_v34 = vmul.f32 %v3240_v15, %v3240_v15 }
0x206d   :  { %3244 = vadd.xlane.f32.xlu0 %v3242_v34  ;;  %v3243_v35 = vmul.f32 %v3241_v25, %v3241_v25 }
0x2071   :  { %3246 = vadd.xlane.f32.xlu0 %v3243_v35 }
0x20fa   :  { %v3245_v28 = vpop.xlane.xlu0 %3244 }
0x20fb   :  { %v3248_v24 = vmul.f32 0.0078125, %v3245_v28 }
0x20fd   :  { %v3250_v30 = vadd.f32 1e-05, %v3248_v24 }
0x20fe   :  { %v3247_v31 = vpop.xlane.xlu0 %3246 }
0x20ff   :  { %4161 = vrsqrt.f32 %v3250_v30  ;;  %v3249_v18 = vmul.f32 0.0078125, %v3247_v31 }
0x2101   :  { %v3251_v23 = vadd.f32 1e-05, %v3249_v18 }
0x2103   :  { %4163 = vrsqrt.f32 %v3251_v23 }
0x2109   :  { %v4162_v22 = vpop.eup %4161 }
0x210a   :  { %v3254_v36 = vmul.f32 %v4162_v22, %v3240_v15 }
0x210c   :  { %v3262_v39 = vmul.f32 %v3550_v27, %v3254_v36 }
0x210d   :  { %v4164_v4 = vpop.eup %4163 }
0x210e   :  { %v3255_v40 = vmul.f32 %v4164_v4, %v3241_v25  ;;  %v3270_v41 = vadd.f32 %v3551_v32, %v3262_v39 }
0x2110   :  { %v3263_v42 = vmul.f32 %v3550_v27, %v3255_v40  ;;  %3272 = vst [vmem:[#allocation5] sm:$0xff] %v3270_v41 }
0x2112   :  { %v3271_v16 = vadd.f32 %v3551_v32, %v3263_v42 }
0x2114   :  { %3273 = vst [vmem:[#allocation5 + $0x8] sm:$0xff] %v3271_v16 }
0x2115   :  { %4206 = shalt.err (!%p4203_p12)
}
0x2116   :  { %s4207_s0 = scalar_lea.hbm %s5233_s24, 256 }
0x2117   :  { %p4208_p13 = scmp.ne.s32.totalorder %s5233_s24, %s4207_s0  ;;  %p4211_p0 = scmp.lt.u32.totalorder %s4207_s0, %s5233_s24 }
0x2119   :  { %p4213_p1 = pnand %p4211_p0, %p4208_p13 }
0x211b   :  { %4216 = shalt.err (!%p4213_p1)
}
0x211c   :  { %s4232_s29 = smov 128   ;;  %s4233_s25 = smov 8  }
0x211d   :  { %3285 = dma.vmem_to_hbm [thread:$0]  %s3280_s13, 256, %s5233_s24, [#allocation4], %s4232_s29, %s4232_s29, %s4233_s25  }
0x211e   :  { %4219 = dma.done.wait [#allocation4], 256  }
0x211f   :  { %4220 = vsyncadd [#allocation4], 4294967040 }
0x2120   :  { %3289 = vsyncpa [#allocation3], 1 }
0x2121   :  { %3290 = vsyncpa [#allocation4], 1 }

</bundles_post_ra>
